<compile_context>
chip_gen: v5e
topology: v5e:2x2
jax: 0.10.0
libtpu: 0.0.40
codegen_flags: <defaults>
</compile_context>

<pallas_src>
import functools
import math

import jax
import jax.numpy as jnp
from jax import lax
from jax.experimental import pallas as pl
from jax.experimental.pallas import tpu as pltpu

F32 = jnp.float32
MXU_DTYPE = jnp.bfloat16          # matmul operand dtype; accumulation stays f32
NEG_INF = -1e30                   # additive mask value (finite, avoids NaN)
LN_EPS = 1e-5


# --------------------------- compiler-param helpers ---------------------------

def _vmem_limit_bytes():
    """Explicit scoped-VMEM limit, derived per TPU generation with headroom."""
    try:
        cap = int(pltpu.get_tpu_info().vmem_capacity_bytes)
    except Exception:
        cap = 64 << 20            # conservative (v7x per-core VMEM)
    return max(32 << 20, min(cap - (16 << 20), 112 << 20))


_VMEM_LIMIT = _vmem_limit_bytes()


def _params(n_parallel_axes):
    return pltpu.CompilerParams(
        dimension_semantics=("parallel",) * n_parallel_axes,
        vmem_limit_bytes=_VMEM_LIMIT)


def _probe_buffered():
    """Check once whether pipeline_mode=pl.Buffered(1) is supported & correct."""
    try:
        def k(x_ref, w_ref, o_ref):
            o_ref[...] = x_ref[...] + w_ref[...]
        f = pl.pallas_call(
            k,
            out_shape=jax.ShapeDtypeStruct((16, 128), F32),
            grid=(2,),
            in_specs=[pl.BlockSpec((8, 128), lambda i: (i, 0)),
                      pl.BlockSpec((8, 128), lambda i: (0, 0),
                                   pipeline_mode=pl.Buffered(1))],
            out_specs=pl.BlockSpec((8, 128), lambda i: (i, 0)),
            compiler_params=_params(1),
        )
        out = f(jnp.zeros((16, 128), F32), jnp.ones((8, 128), F32))
        jax.block_until_ready(out)
        return bool(jnp.allclose(out, 1.0))
    except Exception:
        return False


_BUFFERED_OK = _probe_buffered()


def _const_spec(shape):
    """BlockSpec for a grid-invariant operand: single-buffered when supported."""
    index_map = lambda *args: (0,) * len(shape)
    if _BUFFERED_OK:
        return pl.BlockSpec(shape, index_map, pipeline_mode=pl.Buffered(1))
    return pl.BlockSpec(shape, index_map)


# --------------------------- in-kernel helpers --------------------------------

def _layernorm(y, gamma, beta):
    mean = jnp.mean(y, axis=-1, keepdims=True)
    var = jnp.mean(jnp.square(y - mean), axis=-1, keepdims=True)
    return (y - mean) * lax.rsqrt(var + LN_EPS) * gamma + beta


# ------------------------------ Pallas kernels --------------------------------

def _linear_kernel(x_ref, w_ref, b_ref, o_ref):
    """(tm, K) @ bf16 (K, N) + bias; output in o_ref.dtype (f32 or bf16)."""
    xb = x_ref[...].astype(MXU_DTYPE)
    y = jnp.dot(xb, w_ref[...], preferred_element_type=jnp.float32) + b_ref[...]
    o_ref[...] = y.astype(o_ref.dtype)


def _qkv_proj_kernel(x_ref, wq_ref, bq_ref, wkv_ref, bkv_ref, q_ref, kv_ref):
    """Fused self-attention Q and K|V projections (reads x once), bf16 outputs."""
    xb = x_ref[...].astype(MXU_DTYPE)
    q = jnp.dot(xb, wq_ref[...], preferred_element_type=jnp.float32) + bq_ref[...]
    kv = jnp.dot(xb, wkv_ref[...], preferred_element_type=jnp.float32) + bkv_ref[...]
    q_ref[...] = q.astype(q_ref.dtype)
    kv_ref[...] = kv.astype(kv_ref.dtype)


def _attn_block_kernel(q_ref, kv_ref, kpm_ref, res_ref, wo_ref, bo_ref,
                       g_ref, b_ref, o_ref, *, num_heads, scale, causal):
    """MHA for one (batch, q-tile) + fused out-proj + residual + LayerNorm.

    q_ref : (1, tq, E)  bf16 (already projected)
    kv_ref: (1, S, 2E)  bf16 (already projected, K | V concatenated)
    """
    q = q_ref[0]                      # (tq, E) bf16
    kv = kv_ref[0]                    # (S, 2E) bf16
    tq, E = q.shape
    S = kv.shape[0]
    Dh = E // num_heads
    k = kv[:, :E]
    v = kv[:, E:]

    # Combined additive bias (key padding [+ causal]), computed ONCE per tile.
    bias = kpm_ref[0]                 # (1, S) f32, broadcasts over query rows
    if causal:                        # statically specialized; no (L,L) DMA
        q0 = pl.program_id(1) * tq
        row = lax.broadcasted_iota(jnp.int32, (tq, S), 0) + q0
        col = lax.broadcasted_iota(jnp.int32, (tq, S), 1)
        bias = bias + jnp.where(col > row, NEG_INF, 0.0).astype(jnp.float32)

    head_outs = []
    for h in range(num_heads):        # static unroll over heads
        lo = h * Dh
        qh = q[:, lo:lo + Dh]
        kh = k[:, lo:lo + Dh]
        vh = v[:, lo:lo + Dh]
        s = lax.dot_general(qh, kh, (((1,), (1,)), ((), ())),
                            preferred_element_type=jnp.float32) * scale + bias
        s = s - jnp.max(s, axis=-1, keepdims=True)
        p = jnp.exp(s)
        p = p * pl.reciprocal(jnp.sum(p, axis=-1, keepdims=True), approx=True)
        head_outs.append(jnp.dot(p.astype(MXU_DTYPE), vh,
                                 preferred_element_type=jnp.float32))
    attn = jnp.concatenate(head_outs, axis=-1)          # (tq, E) f32

    # Single full-width out-projection (contraction dim = E, not Dh).
    y = jnp.dot(attn.astype(MXU_DTYPE), wo_ref[...],
                preferred_element_type=jnp.float32)
    y = y + bo_ref[...] + res_ref[0]
    o_ref[0] = _layernorm(y, g_ref[...], b_ref[...])


def _ffn_block_kernel(x_ref, w1_ref, b1_ref, w2_ref, b2_ref, g_ref, b_ref, o_ref):
    """linear1 + ReLU + linear2 + residual + LayerNorm, fused (bf16 weights)."""
    x = x_ref[...]                    # (tm, E) f32
    h = jnp.maximum(
        jnp.dot(x.astype(MXU_DTYPE), w1_ref[...],
                preferred_element_type=jnp.float32) + b1_ref[...], 0.0)
    y = jnp.dot(h.astype(MXU_DTYPE), w2_ref[...],
                preferred_element_type=jnp.float32) + b2_ref[...] + x
    o_ref[...] = _layernorm(y, g_ref[...], b_ref[...])


# ------------------------------ thin wrappers ---------------------------------

def _choose_tm(M):
    # largest whole-M block for small M; 512-row tiles otherwise.
    return M if M <= 512 else 512


def _choose_tq(L):
    # whole-L query tiles for short sequences; 256-row tiles otherwise.
    # TODO(synk): for very long S also tile the keys flash-style (extra
    # "arbitrary" grid axis with online softmax).
    return L if L <= 256 else 256


def linear(x, w_bf16, b, out_dtype=F32):
    """x: (M, K) @ bf16 w: (K, N) + b: (N,) -> (M, N), tiled over M."""
    M, K = x.shape
    N = w_bf16.shape[1]
    tm = _choose_tm(M)
    return pl.pallas_call(
        _linear_kernel,
        out_shape=jax.ShapeDtypeStruct((M, N), out_dtype),
        grid=(pl.cdiv(M, tm),),
        in_specs=[
            pl.BlockSpec((tm, K), lambda i: (i, 0)),
            _const_spec((K, N)),
            _const_spec((1, N)),
        ],
        out_specs=pl.BlockSpec((tm, N), lambda i: (i, 0)),
        compiler_params=_params(1),
    )(x, w_bf16, b.reshape(1, N))


def qkv_projection(x, wq, bq, wkv, bkv):
    """Self-attention Q and K|V projections, single read of x, bf16 outputs."""
    B, L, E = x.shape
    M = B * L
    tm = _choose_tm(M)
    q, kv = pl.pallas_call(
        _qkv_proj_kernel,
        out_shape=(jax.ShapeDtypeStruct((M, E), MXU_DTYPE),
                   jax.ShapeDtypeStruct((M, 2 * E), MXU_DTYPE)),
        grid=(pl.cdiv(M, tm),),
        in_specs=[
            pl.BlockSpec((tm, E), lambda i: (i, 0)),
            _const_spec((E, E)),
            _const_spec((1, E)),
            _const_spec((E, 2 * E)),
            _const_spec((1, 2 * E)),
        ],
        out_specs=(pl.BlockSpec((tm, E), lambda i: (i, 0)),
                   pl.BlockSpec((tm, 2 * E), lambda i: (i, 0))),
        compiler_params=_params(1),
    )(x.reshape(M, E), wq, bq.reshape(1, E), wkv, bkv.reshape(1, 2 * E))
    return q.reshape(B, L, E), kv.reshape(B, L, 2 * E)


def _kpm_to_additive(mask, B, S):
    if mask is None:
        return jnp.zeros((B, 1, S), F32)
    return jnp.where(mask, NEG_INF, 0.0).astype(F32).reshape(B, 1, S)


def attention_block(q_bf, kv_bf, key_padding_mask, residual, wo, bo,
                    norm_g, norm_b, num_heads, causal):
    """LayerNorm(residual + MHA(q, kv) @ Wo + bo), tiled over query rows."""
    B, L, E = q_bf.shape
    S = kv_bf.shape[1]
    scale = 1.0 / math.sqrt(E // num_heads)
    tq = _choose_tq(L)

    kpm = _kpm_to_additive(key_padding_mask, B, S)
    kern = functools.partial(_attn_block_kernel, num_heads=num_heads,
                             scale=scale, causal=causal)
    return pl.pallas_call(
        kern,
        out_shape=jax.ShapeDtypeStruct((B, L, E), F32),
        grid=(B, pl.cdiv(L, tq)),
        in_specs=[
            pl.BlockSpec((1, tq, E), lambda b, i: (b, i, 0)),      # Q  (bf16)
            pl.BlockSpec((1, S, 2 * E), lambda b, i: (b, 0, 0)),   # K|V (bf16)
            pl.BlockSpec((1, 1, S), lambda b, i: (b, 0, 0)),       # key-pad bias
            pl.BlockSpec((1, tq, E), lambda b, i: (b, i, 0)),      # residual
            _const_spec((E, E)),                                   # Wo (bf16)
            _const_spec((1, E)),                                   # bo
            _const_spec((1, E)),                                   # gamma
            _const_spec((1, E)),                                   # beta
        ],
        out_specs=pl.BlockSpec((1, tq, E), lambda b, i: (b, i, 0)),
        compiler_params=_params(2),
    )(q_bf, kv_bf, kpm, residual, wo, bo.reshape(1, E),
      norm_g.reshape(1, E), norm_b.reshape(1, E))


def self_attn_block(x, attn_p, norm_g, norm_b, num_heads,
                    key_padding_mask=None, causal=False):
    q_bf, kv_bf = qkv_projection(x, attn_p["wq"], attn_p["bq"],
                                 attn_p["wkv"], attn_p["bkv"])
    return attention_block(q_bf, kv_bf, key_padding_mask, x,
                           attn_p["out_w"], attn_p["out_b"],
                           norm_g, norm_b, num_heads, causal)


def cross_attn_block(x, memory, attn_p, norm_g, norm_b, num_heads,
                     key_padding_mask=None):
    B, L, E = x.shape
    S = memory.shape[1]
    q_bf = linear(x.reshape(B * L, E), attn_p["wq"], attn_p["bq"],
                  out_dtype=MXU_DTYPE).reshape(B, L, E)
    kv_bf = linear(memory.reshape(B * S, E), attn_p["wkv"], attn_p["bkv"],
                   out_dtype=MXU_DTYPE).reshape(B, S, 2 * E)
    return attention_block(q_bf, kv_bf, key_padding_mask, x,
                           attn_p["out_w"], attn_p["out_b"],
                           norm_g, norm_b, num_heads, causal=False)


def ffn_block(x, p, norm_g, norm_b):
    """LayerNorm(x + lin2(relu(lin1(x)))), fully fused, tiled over rows."""
    B, L, E = x.shape
    M = B * L
    ff = p["lin1_w"].shape[1]
    tm = _choose_tm(M)
    # TODO(synk): on v7x with E>=1024/ff>=4096 stream (E,tk)/(tk,ff) weight
    # K-tiles via an extra "arbitrary" grid axis instead of whole weights.
    out = pl.pallas_call(
        _ffn_block_kernel,
        out_shape=jax.ShapeDtypeStruct((M, E), F32),
        grid=(pl.cdiv(M, tm),),
        in_specs=[
            pl.BlockSpec((tm, E), lambda i: (i, 0)),               # x
            _const_spec((E, ff)),                                  # w1 (bf16)
            _const_spec((1, ff)),                                  # b1
            _const_spec((ff, E)),                                  # w2 (bf16)
            _const_spec((1, E)),                                   # b2
            _const_spec((1, E)),                                   # gamma
            _const_spec((1, E)),                                   # beta
        ],
        out_specs=pl.BlockSpec((tm, E), lambda i: (i, 0)),
        compiler_params=_params(1),
    )(x.reshape(M, E), p["lin1_w"], p["lin1_b"].reshape(1, ff),
      p["lin2_w"], p["lin2_b"].reshape(1, E),
      norm_g.reshape(1, E), norm_b.reshape(1, E))
    return out.reshape(B, L, E)


# ------------------------ Transformer (post-norm) layers ----------------------

def encoder_layer(x, p, num_heads, src_key_padding_mask):
    x = self_attn_block(x, p["self_attn"], p["norm1_g"], p["norm1_b"],
                        num_heads, key_padding_mask=src_key_padding_mask)
    return ffn_block(x, p, p["norm2_g"], p["norm2_b"])


def decoder_layer(x, memory, p, num_heads, tgt_kpm, mem_kpm, causal_tgt):
    x = self_attn_block(x, p["self_attn"], p["norm1_g"], p["norm1_b"],
                        num_heads, key_padding_mask=tgt_kpm, causal=causal_tgt)
    x = cross_attn_block(x, memory, p["cross_attn"], p["norm2_g"], p["norm2_b"],
                         num_heads, key_padding_mask=mem_kpm)
    return ffn_block(x, p, p["norm3_g"], p["norm3_b"])


def transformer_forward(params, src, tgt, src_key_padding_mask,
                        tgt_key_padding_mask, num_heads, causal_tgt_mask=True):
    # TODO(synk): arbitrary float tgt_mask tensors are not plumbed; the
    # standard causal mask is generated in-kernel (broadcasted_iota) instead.
    B, Ls, _ = src.shape
    _, Lt, _ = tgt.shape
    E = params["pos_enc"].shape[-1]

    s = linear(src.reshape(B * Ls, -1), params["src_emb_w"],
               params["src_emb_b"]).reshape(B, Ls, E)
    s = s + params["pos_enc"][:, :Ls, :]
    t = linear(tgt.reshape(B * Lt, -1), params["tgt_emb_w"],
               params["tgt_emb_b"]).reshape(B, Lt, E)
    t = t + params["pos_enc"][:, :Lt, :]

    memory = s
    for lp in params["enc_layers"]:
        memory = encoder_layer(memory, lp, num_heads, src_key_padding_mask)

    out = t
    for lp in params["dec_layers"]:
        out = decoder_layer(out, memory, lp, num_heads,
                            tgt_key_padding_mask, src_key_padding_mask,
                            causal_tgt_mask)

    # Final projection: pad the output width to a lane-dense multiple of 128
    # (avoids masked vst epilogue, v5e in particular), slice back after.
    fc_w, fc_b = params["fc_w"], params["fc_b"]
    N = fc_w.shape[1]
    Np = ((N + 127) // 128) * 128
    if Np != N:
        fc_w = jnp.pad(fc_w, ((0, 0), (0, Np - N)))
        fc_b = jnp.pad(fc_b, (0, Np - N))
    y = linear(out.reshape(B * Lt, E), fc_w, fc_b).reshape(B, Lt, Np)
    return y[..., :N]


# -------------------------------- parameters ----------------------------------

def init_params(key, src_in, tgt_in, E, max_len, out_dim, num_layers, ff=2048):
    keys = [key]

    def nxt():
        keys[0], sub = jax.random.split(keys[0])
        return sub

    def w(shape, scale=0.05):
        return jax.random.normal(nxt(), shape, F32) * scale

    def attn():
        return dict(in_proj_w=w((E, 3 * E)), in_proj_b=w((3 * E,)),
                    out_w=w((E, E)), out_b=w((E,)))

    def enc():
        return dict(self_attn=attn(),
                    lin1_w=w((E, ff)), lin1_b=w((ff,)),
                    lin2_w=w((ff, E)), lin2_b=w((E,)),
                    norm1_g=jnp.ones((E,), F32), norm1_b=jnp.zeros((E,), F32),
                    norm2_g=jnp.ones((E,), F32), norm2_b=jnp.zeros((E,), F32))

    def dec():
        return dict(self_attn=attn(), cross_attn=attn(),
                    lin1_w=w((E, ff)), lin1_b=w((ff,)),
                    lin2_w=w((ff, E)), lin2_b=w((E,)),
                    norm1_g=jnp.ones((E,), F32), norm1_b=jnp.zeros((E,), F32),
                    norm2_g=jnp.ones((E,), F32), norm2_b=jnp.zeros((E,), F32),
                    norm3_g=jnp.ones((E,), F32), norm3_b=jnp.zeros((E,), F32))

    return dict(
        src_emb_w=w((src_in, E)), src_emb_b=w((E,)),
        tgt_emb_w=w((tgt_in, E)), tgt_emb_b=w((E,)),
        # nn.Parameter(torch.zeros(1, max_seq_len, embed_dim)) -> zeros
        pos_enc=jnp.zeros((1, max_len, E), F32),
        enc_layers=[enc() for _ in range(num_layers)],
        dec_layers=[dec() for _ in range(num_layers)],
        fc_w=w((E, out_dim)), fc_b=w((out_dim,)),
    )


def prepare_params(params):
    """One-time TPU prep: split in_proj into Q / K|V parts and pre-cast every
    matmul weight to bf16 in HBM (halves weight DMA + buffered VMEM)."""
    def attn(p):
        E = p["out_w"].shape[0]
        return dict(
            wq=p["in_proj_w"][:, :E].astype(MXU_DTYPE),
            bq=p["in_proj_b"][:E],
            wkv=p["in_proj_w"][:, E:].astype(MXU_DTYPE),
            bkv=p["in_proj_b"][E:],
            out_w=p["out_w"].astype(MXU_DTYPE),
            out_b=p["out_b"])

    def enc(p):
        q = dict(p)
        q["self_attn"] = attn(p["self_attn"])
        q["lin1_w"] = p["lin1_w"].astype(MXU_DTYPE)
        q["lin2_w"] = p["lin2_w"].astype(MXU_DTYPE)
        return q

    def dec(p):
        q = enc(p)
        q["cross_attn"] = attn(p["cross_attn"])
        return q

    out = dict(params)
    out["src_emb_w"] = params["src_emb_w"].astype(MXU_DTYPE)
    out["tgt_emb_w"] = params["tgt_emb_w"].astype(MXU_DTYPE)
    out["fc_w"] = params["fc_w"].astype(MXU_DTYPE)
    out["enc_layers"] = [enc(p) for p in params["enc_layers"]]
    out["dec_layers"] = [dec(p) for p in params["dec_layers"]]
    return out


# ------------------------------------ main -------------------------------------

if __name__ == "__main__":
    B, S_SRC, S_TGT = 2, 8, 8
    SRC_IN, TGT_IN = 12, 10
    EMBED, HEADS, LAYERS = 32, 4, 2
    MAX_LEN, OUT_DIM = 16, 8

    key = jax.random.PRNGKey(0)
    k_src, k_tgt, k_par = jax.random.split(key, 3)

    src = jax.random.normal(k_src, (B, S_SRC, SRC_IN), F32)
    tgt = jax.random.normal(k_tgt, (B, S_TGT, TGT_IN), F32)
    params = prepare_params(
        init_params(k_par, SRC_IN, TGT_IN, EMBED, MAX_LEN, OUT_DIM, LAYERS))

    # key-padding masks (bool, True = padded position)
    src_kpm = jnp.zeros((B, S_SRC), bool).at[1, S_SRC - 2:].set(True)
    tgt_kpm = jnp.zeros((B, S_TGT), bool).at[1, S_TGT - 1:].set(True)

    fwd = jax.jit(functools.partial(transformer_forward,
                                    num_heads=HEADS, causal_tgt_mask=True))
    out = fwd(params, src, tgt, src_kpm, tgt_kpm)
    jax.block_until_ready(out)
    assert out.shape == (B, S_TGT, OUT_DIM), out.shape
    assert bool(jnp.all(jnp.isfinite(out)))
    print("KERNEL_OK")
</pallas_src>

<mosaic_0001>
module attributes {stable_mosaic.version = 11 : i64} {
  func.func @k(%arg0: i32, %arg1: memref<8x128xf32, #tpu.memory_space<vmem>>, %arg2: memref<8x128xf32, #tpu.memory_space<vmem>>, %arg3: memref<8x128xf32, #tpu.memory_space<vmem>>) attributes {dimension_semantics = [#tpu.dimension_semantics<parallel>], iteration_bounds = array<i64: 2>, scalar_prefetch = 0 : i64, scratch_operands = 0 : i64, tpu.core_type = #tpu.core_type<tc>, window_params = [{transform_indices = @transform_0, window_bounds = array<i64: 8, 128>}, {pipeline_mode = #tpu.pipeline_mode<synchronous>, transform_indices = @transform_1, window_bounds = array<i64: 8, 128>}, {transform_indices = @transform_2, window_bounds = array<i64: 8, 128>}]} {
    %c0 = arith.constant 0 : index
    %c0_0 = arith.constant 0 : index
    %0 = vector.load %arg1[%c0, %c0_0] : memref<8x128xf32, #tpu.memory_space<vmem>>, vector<8x128xf32>
    %c0_1 = arith.constant 0 : index
    %c0_2 = arith.constant 0 : index
    %1 = vector.load %arg2[%c0_1, %c0_2] : memref<8x128xf32, #tpu.memory_space<vmem>>, vector<8x128xf32>
    %2 = arith.addf %0, %1 : vector<8x128xf32>
    %c0_3 = arith.constant 0 : index
    %c0_4 = arith.constant 0 : index
    %3 = vector.load %arg3[%c0_3, %c0_4] : memref<8x128xf32, #tpu.memory_space<vmem>>, vector<8x128xf32>
    tpu.vector_store %arg3[%c0_3, %c0_4], %2 {strides = array<i32>} : memref<8x128xf32, #tpu.memory_space<vmem>>, vector<8x128xf32>,
    return
  }
  func.func @transform_0(%arg0: i32) -> (i32, i32) {
    %c0_i32 = arith.constant 0 : i32
    %c0_i32_0 = arith.constant 0 : i32
    return %arg0, %c0_i32 : i32, i32
  }
  func.func @transform_1(%arg0: i32) -> (i32, i32) {
    %c0_i32 = arith.constant 0 : i32
    %c0_i32_0 = arith.constant 0 : i32
    %c0_i32_1 = arith.constant 0 : i32
    return %c0_i32, %c0_i32_0 : i32, i32
  }
  func.func @transform_2(%arg0: i32) -> (i32, i32) {
    %c0_i32 = arith.constant 0 : i32
    %c0_i32_0 = arith.constant 0 : i32
    return %arg0, %c0_i32 : i32, i32
  }
}

module attributes {stable_mosaic.version = 11 : i64} {
  func.func @_linear_kernel(%arg0: i32, %arg1: memref<16x10xf32, #tpu.memory_space<vmem>>, %arg2: memref<10x32xbf16, #tpu.memory_space<vmem>>, %arg3: memref<1x32xf32, #tpu.memory_space<vmem>>, %arg4: memref<16x32xf32, #tpu.memory_space<vmem>>) attributes {dimension_semantics = [#tpu.dimension_semantics<parallel>], iteration_bounds = array<i64: 1>, scalar_prefetch = 0 : i64, scratch_operands = 0 : i64, tpu.core_type = #tpu.core_type<tc>, window_params = [{transform_indices = @transform_0, window_bounds = array<i64: 16, 10>}, {pipeline_mode = #tpu.pipeline_mode<synchronous>, transform_indices = @transform_1, window_bounds = array<i64: 10, 32>}, {pipeline_mode = #tpu.pipeline_mode<synchronous>, transform_indices = @transform_2, window_bounds = array<i64: 1, 32>}, {transform_indices = @transform_3, window_bounds = array<i64: 16, 32>}]} {
    %c0 = arith.constant 0 : index
    %c0_0 = arith.constant 0 : index
    %0 = vector.load %arg1[%c0, %c0_0] : memref<16x10xf32, #tpu.memory_space<vmem>>, vector<16x10xf32>
    %1 = arith.truncf %0 : vector<16x10xf32> to vector<16x10xbf16>
    %c0_1 = arith.constant 0 : index
    %c0_2 = arith.constant 0 : index
    %2 = vector.load %arg2[%c0_1, %c0_2] : memref<10x32xbf16, #tpu.memory_space<vmem>>, vector<10x32xbf16>
    %cst = arith.constant dense<0.000000e+00> : vector<16x32xf32>
    %3 = tpu.matmul %1, %2, %cst {dimension_numbers = #tpu.dot_dimension_numbers<[1], [0], [0], [1], [0, 0, 1, 1], [], []>} : vector<16x10xbf16>, vector<10x32xbf16>, vector<16x32xf32> -> vector<16x32xf32>
    %c0_3 = arith.constant 0 : index
    %c0_4 = arith.constant 0 : index
    %4 = vector.load %arg3[%c0_3, %c0_4] : memref<1x32xf32, #tpu.memory_space<vmem>>, vector<1x32xf32>
    %5 = vector.broadcast %4 : vector<1x32xf32> to vector<16x32xf32>
    %6 = arith.addf %3, %5 : vector<16x32xf32>
    %c0_5 = arith.constant 0 : index
    %c0_6 = arith.constant 0 : index
    %7 = vector.load %arg4[%c0_5, %c0_6] : memref<16x32xf32, #tpu.memory_space<vmem>>, vector<16x32xf32>
    tpu.vector_store %arg4[%c0_5, %c0_6], %6 {strides = array<i32>} : memref<16x32xf32, #tpu.memory_space<vmem>>, vector<16x32xf32>,
    return
  }
  func.func @transform_0(%arg0: i32) -> (i32, i32) {
    %c0_i32 = arith.constant 0 : i32
    %c0_i32_0 = arith.constant 0 : i32
    return %arg0, %c0_i32 : i32, i32
  }
  func.func @transform_1(%arg0: i32) -> (i32, i32) {
    %c0_i32 = arith.constant 0 : i32
    %c0_i32_0 = arith.constant 0 : i32
    %c0_i32_1 = arith.constant 0 : i32
    return %c0_i32, %c0_i32_0 : i32, i32
  }
  func.func @transform_2(%arg0: i32) -> (i32, i32) {
    %c0_i32 = arith.constant 0 : i32
    %c0_i32_0 = arith.constant 0 : i32
    %c0_i32_1 = arith.constant 0 : i32
    return %c0_i32, %c0_i32_0 : i32, i32
  }
  func.func @transform_3(%arg0: i32) -> (i32, i32) {
    %c0_i32 = arith.constant 0 : i32
    %c0_i32_0 = arith.constant 0 : i32
    return %arg0, %c0_i32 : i32, i32
  }
}

module attributes {stable_mosaic.version = 11 : i64} {
  func.func @_linear_kernel(%arg0: i32, %arg1: memref<16x12xf32, #tpu.memory_space<vmem>>, %arg2: memref<12x32xbf16, #tpu.memory_space<vmem>>, %arg3: memref<1x32xf32, #tpu.memory_space<vmem>>, %arg4: memref<16x32xf32, #tpu.memory_space<vmem>>) attributes {dimension_semantics = [#tpu.dimension_semantics<parallel>], iteration_bounds = array<i64: 1>, scalar_prefetch = 0 : i64, scratch_operands = 0 : i64, tpu.core_type = #tpu.core_type<tc>, window_params = [{transform_indices = @transform_0, window_bounds = array<i64: 16, 12>}, {pipeline_mode = #tpu.pipeline_mode<synchronous>, transform_indices = @transform_1, window_bounds = array<i64: 12, 32>}, {pipeline_mode = #tpu.pipeline_mode<synchronous>, transform_indices = @transform_2, window_bounds = array<i64: 1, 32>}, {transform_indices = @transform_3, window_bounds = array<i64: 16, 32>}]} {
    %c0 = arith.constant 0 : index
    %c0_0 = arith.constant 0 : index
    %0 = vector.load %arg1[%c0, %c0_0] : memref<16x12xf32, #tpu.memory_space<vmem>>, vector<16x12xf32>
    %1 = arith.truncf %0 : vector<16x12xf32> to vector<16x12xbf16>
    %c0_1 = arith.constant 0 : index
    %c0_2 = arith.constant 0 : index
    %2 = vector.load %arg2[%c0_1, %c0_2] : memref<12x32xbf16, #tpu.memory_space<vmem>>, vector<12x32xbf16>
    %cst = arith.constant dense<0.000000e+00> : vector<16x32xf32>
    %3 = tpu.matmul %1, %2, %cst {dimension_numbers = #tpu.dot_dimension_numbers<[1], [0], [0], [1], [0, 0, 1, 1], [], []>} : vector<16x12xbf16>, vector<12x32xbf16>, vector<16x32xf32> -> vector<16x32xf32>
    %c0_3 = arith.constant 0 : index
    %c0_4 = arith.constant 0 : index
    %4 = vector.load %arg3[%c0_3, %c0_4] : memref<1x32xf32, #tpu.memory_space<vmem>>, vector<1x32xf32>
    %5 = vector.broadcast %4 : vector<1x32xf32> to vector<16x32xf32>
    %6 = arith.addf %3, %5 : vector<16x32xf32>
    %c0_5 = arith.constant 0 : index
    %c0_6 = arith.constant 0 : index
    %7 = vector.load %arg4[%c0_5, %c0_6] : memref<16x32xf32, #tpu.memory_space<vmem>>, vector<16x32xf32>
    tpu.vector_store %arg4[%c0_5, %c0_6], %6 {strides = array<i32>} : memref<16x32xf32, #tpu.memory_space<vmem>>, vector<16x32xf32>,
    return
  }
  func.func @transform_0(%arg0: i32) -> (i32, i32) {
    %c0_i32 = arith.constant 0 : i32
    %c0_i32_0 = arith.constant 0 : i32
    return %arg0, %c0_i32 : i32, i32
  }
  func.func @transform_1(%arg0: i32) -> (i32, i32) {
    %c0_i32 = arith.constant 0 : i32
    %c0_i32_0 = arith.constant 0 : i32
    %c0_i32_1 = arith.constant 0 : i32
    return %c0_i32, %c0_i32_0 : i32, i32
  }
  func.func @transform_2(%arg0: i32) -> (i32, i32) {
    %c0_i32 = arith.constant 0 : i32
    %c0_i32_0 = arith.constant 0 : i32
    %c0_i32_1 = arith.constant 0 : i32
    return %c0_i32, %c0_i32_0 : i32, i32
  }
  func.func @transform_3(%arg0: i32) -> (i32, i32) {
    %c0_i32 = arith.constant 0 : i32
    %c0_i32_0 = arith.constant 0 : i32
    return %arg0, %c0_i32 : i32, i32
  }
}

module attributes {stable_mosaic.version = 11 : i64} {
  func.func @_attn_block_kernel(%arg0: i32, %arg1: i32, %arg2: memref<1x8x32xbf16, #tpu.memory_space<vmem>>, %arg3: memref<1x8x64xbf16, #tpu.memory_space<vmem>>, %arg4: memref<1x1x8xf32, #tpu.memory_space<vmem>>, %arg5: memref<1x8x32xf32, #tpu.memory_space<vmem>>, %arg6: memref<32x32xbf16, #tpu.memory_space<vmem>>, %arg7: memref<1x32xf32, #tpu.memory_space<vmem>>, %arg8: memref<1x32xf32, #tpu.memory_space<vmem>>, %arg9: memref<1x32xf32, #tpu.memory_space<vmem>>, %arg10: memref<1x8x32xf32, #tpu.memory_space<vmem>>) attributes {dimension_semantics = [#tpu.dimension_semantics<parallel>, #tpu.dimension_semantics<parallel>], iteration_bounds = array<i64: 2, 1>, scalar_prefetch = 0 : i64, scratch_operands = 0 : i64, tpu.core_type = #tpu.core_type<tc>, window_params = [{transform_indices = @transform_0, window_bounds = array<i64: 1, 8, 32>}, {transform_indices = @transform_1, window_bounds = array<i64: 1, 8, 64>}, {transform_indices = @transform_2, window_bounds = array<i64: 1, 1, 8>}, {transform_indices = @transform_3, window_bounds = array<i64: 1, 8, 32>}, {pipeline_mode = #tpu.pipeline_mode<synchronous>, transform_indices = @transform_4, window_bounds = array<i64: 32, 32>}, {pipeline_mode = #tpu.pipeline_mode<synchronous>, transform_indices = @transform_5, window_bounds = array<i64: 1, 32>}, {pipeline_mode = #tpu.pipeline_mode<synchronous>, transform_indices = @transform_6, window_bounds = array<i64: 1, 32>}, {pipeline_mode = #tpu.pipeline_mode<synchronous>, transform_indices = @transform_7, window_bounds = array<i64: 1, 32>}, {transform_indices = @transform_8, window_bounds = array<i64: 1, 8, 32>}]} {
    %c0 = arith.constant 0 : index
    %c0_0 = arith.constant 0 : index
    %c0_1 = arith.constant 0 : index
    %0 = vector.load %arg2[%c0, %c0_0, %c0_1] : memref<1x8x32xbf16, #tpu.memory_space<vmem>>, vector<1x8x32xbf16>
    %1 = vector.shape_cast %0 : vector<1x8x32xbf16> to vector<8x32xbf16>
    %c0_2 = arith.constant 0 : index
    %c0_3 = arith.constant 0 : index
    %c0_4 = arith.constant 0 : index
    %2 = vector.load %arg3[%c0_2, %c0_3, %c0_4] : memref<1x8x64xbf16, #tpu.memory_space<vmem>>, vector<1x8x64xbf16>
    %3 = vector.shape_cast %2 : vector<1x8x64xbf16> to vector<8x64xbf16>
    %4 = vector.extract_strided_slice %3 {offsets = [0, 0], sizes = [8, 32], strides = [1, 1]} : vector<8x64xbf16> to vector<8x32xbf16>
    %5 = vector.extract_strided_slice %3 {offsets = [0, 32], sizes = [8, 32], strides = [1, 1]} : vector<8x64xbf16> to vector<8x32xbf16>
    %c0_5 = arith.constant 0 : index
    %c0_6 = arith.constant 0 : index
    %c0_7 = arith.constant 0 : index
    %6 = vector.load %arg4[%c0_5, %c0_6, %c0_7] : memref<1x1x8xf32, #tpu.memory_space<vmem>>, vector<1x1x8xf32>
    %7 = vector.shape_cast %6 : vector<1x1x8xf32> to vector<1x8xf32>
    %c8_i32 = arith.constant 8 : i32
    %8 = arith.muli %arg1, %c8_i32 : i32
    %9 = tpu.iota {dimensions = array<i32: 0>} : vector<8x8xi32>
    %10 = vector.broadcast %8 : i32 to vector<8x8xi32>
    %11 = arith.addi %9, %10 : vector<8x8xi32>
    %12 = tpu.iota {dimensions = array<i32: 1>} : vector<8x8xi32>
    %13 = arith.cmpi sgt, %12, %11 : vector<8x8xi32>
    %cst = arith.constant -1.000000e+30 : f32
    %cst_8 = arith.constant 0.000000e+00 : f32
    %14 = vector.broadcast %cst : f32 to vector<8x8xf32>
    %15 = vector.broadcast %cst_8 : f32 to vector<8x8xf32>
    %16 = arith.select %13, %14, %15 : vector<8x8xi1>, vector<8x8xf32>
    %17 = vector.broadcast %7 : vector<1x8xf32> to vector<8x8xf32>
    %18 = arith.addf %17, %16 : vector<8x8xf32>
    %19 = vector.extract_strided_slice %1 {offsets = [0, 0], sizes = [8, 8], strides = [1, 1]} : vector<8x32xbf16> to vector<8x8xbf16>
    %20 = vector.extract_strided_slice %4 {offsets = [0, 0], sizes = [8, 8], strides = [1, 1]} : vector<8x32xbf16> to vector<8x8xbf16>
    %21 = vector.extract_strided_slice %5 {offsets = [0, 0], sizes = [8, 8], strides = [1, 1]} : vector<8x32xbf16> to vector<8x8xbf16>
    %cst_9 = arith.constant dense<0.000000e+00> : vector<8x8xf32>
    %22 = tpu.matmul %19, %20, %cst_9 {dimension_numbers = #tpu.dot_dimension_numbers<[1], [1], [0], [0], [0, 0, 1, 0], [], []>} : vector<8x8xbf16>, vector<8x8xbf16>, vector<8x8xf32> -> vector<8x8xf32>
    %cst_10 = arith.constant 0.353553385 : f32
    %23 = vector.broadcast %cst_10 : f32 to vector<8x8xf32>
    %24 = arith.mulf %22, %23 : vector<8x8xf32>
    %25 = arith.addf %24, %18 : vector<8x8xf32>
    %cst_11 = arith.constant dense<0xFF800000> : vector<8xf32>
    %26 = vector.multi_reduction <maximumf>, %25, %cst_11 [1] : vector<8x8xf32> to vector<8xf32>
    %27 = vector.shape_cast %26 : vector<8xf32> to vector<8x1xf32>
    %28 = vector.broadcast %27 : vector<8x1xf32> to vector<8x8xf32>
    %29 = arith.subf %25, %28 : vector<8x8xf32>
    %30 = math.exp %29 : vector<8x8xf32>
    %cst_12 = arith.constant dense<0.000000e+00> : vector<8xf32>
    %31 = vector.multi_reduction <add>, %30, %cst_12 [1] : vector<8x8xf32> to vector<8xf32>
    %32 = vector.shape_cast %31 : vector<8xf32> to vector<8x1xf32>
    %33 = tpu.reciprocal %32 {approx = true} : vector<8x1xf32> -> vector<8x1xf32>
    %34 = vector.broadcast %33 : vector<8x1xf32> to vector<8x8xf32>
    %35 = arith.mulf %30, %34 : vector<8x8xf32>
    %36 = arith.truncf %35 : vector<8x8xf32> to vector<8x8xbf16>
    %cst_13 = arith.constant dense<0.000000e+00> : vector<8x8xf32>
    %37 = tpu.matmul %36, %21, %cst_13 {dimension_numbers = #tpu.dot_dimension_numbers<[1], [0], [0], [1], [0, 0, 1, 1], [], []>} : vector<8x8xbf16>, vector<8x8xbf16>, vector<8x8xf32> -> vector<8x8xf32>
    %38 = vector.extract_strided_slice %1 {offsets = [0, 8], sizes = [8, 8], strides = [1, 1]} : vector<8x32xbf16> to vector<8x8xbf16>
    %39 = vector.extract_strided_slice %4 {offsets = [0, 8], sizes = [8, 8], strides = [1, 1]} : vector<8x32xbf16> to vector<8x8xbf16>
    %40 = vector.extract_strided_slice %5 {offsets = [0, 8], sizes = [8, 8], strides = [1, 1]} : vector<8x32xbf16> to vector<8x8xbf16>
    %cst_14 = arith.constant dense<0.000000e+00> : vector<8x8xf32>
    %41 = tpu.matmul %38, %39, %cst_14 {dimension_numbers = #tpu.dot_dimension_numbers<[1], [1], [0], [0], [0, 0, 1, 0], [], []>} : vector<8x8xbf16>, vector<8x8xbf16>, vector<8x8xf32> -> vector<8x8xf32>
    %cst_15 = arith.constant 0.353553385 : f32
    %42 = vector.broadcast %cst_15 : f32 to vector<8x8xf32>
    %43 = arith.mulf %41, %42 : vector<8x8xf32>
    %44 = arith.addf %43, %18 : vector<8x8xf32>
    %cst_16 = arith.constant dense<0xFF800000> : vector<8xf32>
    %45 = vector.multi_reduction <maximumf>, %44, %cst_16 [1] : vector<8x8xf32> to vector<8xf32>
    %46 = vector.shape_cast %45 : vector<8xf32> to vector<8x1xf32>
    %47 = vector.broadcast %46 : vector<8x1xf32> to vector<8x8xf32>
    %48 = arith.subf %44, %47 : vector<8x8xf32>
    %49 = math.exp %48 : vector<8x8xf32>
    %cst_17 = arith.constant dense<0.000000e+00> : vector<8xf32>
    %50 = vector.multi_reduction <add>, %49, %cst_17 [1] : vector<8x8xf32> to vector<8xf32>
    %51 = vector.shape_cast %50 : vector<8xf32> to vector<8x1xf32>
    %52 = tpu.reciprocal %51 {approx = true} : vector<8x1xf32> -> vector<8x1xf32>
    %53 = vector.broadcast %52 : vector<8x1xf32> to vector<8x8xf32>
    %54 = arith.mulf %49, %53 : vector<8x8xf32>
    %55 = arith.truncf %54 : vector<8x8xf32> to vector<8x8xbf16>
    %cst_18 = arith.constant dense<0.000000e+00> : vector<8x8xf32>
    %56 = tpu.matmul %55, %40, %cst_18 {dimension_numbers = #tpu.dot_dimension_numbers<[1], [0], [0], [1], [0, 0, 1, 1], [], []>} : vector<8x8xbf16>, vector<8x8xbf16>, vector<8x8xf32> -> vector<8x8xf32>
    %57 = vector.extract_strided_slice %1 {offsets = [0, 16], sizes = [8, 8], strides = [1, 1]} : vector<8x32xbf16> to vector<8x8xbf16>
    %58 = vector.extract_strided_slice %4 {offsets = [0, 16], sizes = [8, 8], strides = [1, 1]} : vector<8x32xbf16> to vector<8x8xbf16>
    %59 = vector.extract_strided_slice %5 {offsets = [0, 16], sizes = [8, 8], strides = [1, 1]} : vector<8x32xbf16> to vector<8x8xbf16>
    %cst_19 = arith.constant dense<0.000000e+00> : vector<8x8xf32>
    %60 = tpu.matmul %57, %58, %cst_19 {dimension_numbers = #tpu.dot_dimension_numbers<[1], [1], [0], [0], [0, 0, 1, 0], [], []>} : vector<8x8xbf16>, vector<8x8xbf16>, vector<8x8xf32> -> vector<8x8xf32>
    %cst_20 = arith.constant 0.353553385 : f32
    %61 = vector.broadcast %cst_20 : f32 to vector<8x8xf32>
    %62 = arith.mulf %60, %61 : vector<8x8xf32>
    %63 = arith.addf %62, %18 : vector<8x8xf32>
    %cst_21 = arith.constant dense<0xFF800000> : vector<8xf32>
    %64 = vector.multi_reduction <maximumf>, %63, %cst_21 [1] : vector<8x8xf32> to vector<8xf32>
    %65 = vector.shape_cast %64 : vector<8xf32> to vector<8x1xf32>
    %66 = vector.broadcast %65 : vector<8x1xf32> to vector<8x8xf32>
    %67 = arith.subf %63, %66 : vector<8x8xf32>
    %68 = math.exp %67 : vector<8x8xf32>
    %cst_22 = arith.constant dense<0.000000e+00> : vector<8xf32>
    %69 = vector.multi_reduction <add>, %68, %cst_22 [1] : vector<8x8xf32> to vector<8xf32>
    %70 = vector.shape_cast %69 : vector<8xf32> to vector<8x1xf32>
    %71 = tpu.reciprocal %70 {approx = true} : vector<8x1xf32> -> vector<8x1xf32>
    %72 = vector.broadcast %71 : vector<8x1xf32> to vector<8x8xf32>
    %73 = arith.mulf %68, %72 : vector<8x8xf32>
    %74 = arith.truncf %73 : vector<8x8xf32> to vector<8x8xbf16>
    %cst_23 = arith.constant dense<0.000000e+00> : vector<8x8xf32>
    %75 = tpu.matmul %74, %59, %cst_23 {dimension_numbers = #tpu.dot_dimension_numbers<[1], [0], [0], [1], [0, 0, 1, 1], [], []>} : vector<8x8xbf16>, vector<8x8xbf16>, vector<8x8xf32> -> vector<8x8xf32>
    %76 = vector.extract_strided_slice %1 {offsets = [0, 24], sizes = [8, 8], strides = [1, 1]} : vector<8x32xbf16> to vector<8x8xbf16>
    %77 = vector.extract_strided_slice %4 {offsets = [0, 24], sizes = [8, 8], strides = [1, 1]} : vector<8x32xbf16> to vector<8x8xbf16>
    %78 = vector.extract_strided_slice %5 {offsets = [0, 24], sizes = [8, 8], strides = [1, 1]} : vector<8x32xbf16> to vector<8x8xbf16>
    %cst_24 = arith.constant dense<0.000000e+00> : vector<8x8xf32>
    %79 = tpu.matmul %76, %77, %cst_24 {dimension_numbers = #tpu.dot_dimension_numbers<[1], [1], [0], [0], [0, 0, 1, 0], [], []>} : vector<8x8xbf16>, vector<8x8xbf16>, vector<8x8xf32> -> vector<8x8xf32>
    %cst_25 = arith.constant 0.353553385 : f32
    %80 = vector.broadcast %cst_25 : f32 to vector<8x8xf32>
    %81 = arith.mulf %79, %80 : vector<8x8xf32>
    %82 = arith.addf %81, %18 : vector<8x8xf32>
    %cst_26 = arith.constant dense<0xFF800000> : vector<8xf32>
    %83 = vector.multi_reduction <maximumf>, %82, %cst_26 [1] : vector<8x8xf32> to vector<8xf32>
    %84 = vector.shape_cast %83 : vector<8xf32> to vector<8x1xf32>
    %85 = vector.broadcast %84 : vector<8x1xf32> to vector<8x8xf32>
    %86 = arith.subf %82, %85 : vector<8x8xf32>
    %87 = math.exp %86 : vector<8x8xf32>
    %cst_27 = arith.constant dense<0.000000e+00> : vector<8xf32>
    %88 = vector.multi_reduction <add>, %87, %cst_27 [1] : vector<8x8xf32> to vector<8xf32>
    %89 = vector.shape_cast %88 : vector<8xf32> to vector<8x1xf32>
    %90 = tpu.reciprocal %89 {approx = true} : vector<8x1xf32> -> vector<8x1xf32>
    %91 = vector.broadcast %90 : vector<8x1xf32> to vector<8x8xf32>
    %92 = arith.mulf %87, %91 : vector<8x8xf32>
    %93 = arith.truncf %92 : vector<8x8xf32> to vector<8x8xbf16>
    %cst_28 = arith.constant dense<0.000000e+00> : vector<8x8xf32>
    %94 = tpu.matmul %93, %78, %cst_28 {dimension_numbers = #tpu.dot_dimension_numbers<[1], [0], [0], [1], [0, 0, 1, 1], [], []>} : vector<8x8xbf16>, vector<8x8xbf16>, vector<8x8xf32> -> vector<8x8xf32>
    %95 = tpu.concatenate %37, %56, %75, %94 in 1 : vector<8x8xf32>, vector<8x8xf32>, vector<8x8xf32>, vector<8x8xf32> -> vector<8x32xf32>
    %96 = arith.truncf %95 : vector<8x32xf32> to vector<8x32xbf16>
    %c0_29 = arith.constant 0 : index
    %c0_30 = arith.constant 0 : index
    %97 = vector.load %arg6[%c0_29, %c0_30] : memref<32x32xbf16, #tpu.memory_space<vmem>>, vector<32x32xbf16>
    %cst_31 = arith.constant dense<0.000000e+00> : vector<8x32xf32>
    %98 = tpu.matmul %96, %97, %cst_31 {dimension_numbers = #tpu.dot_dimension_numbers<[1], [0], [0], [1], [0, 0, 1, 1], [], []>} : vector<8x32xbf16>, vector<32x32xbf16>, vector<8x32xf32> -> vector<8x32xf32>
    %c0_32 = arith.constant 0 : index
    %c0_33 = arith.constant 0 : index
    %99 = vector.load %arg7[%c0_32, %c0_33] : memref<1x32xf32, #tpu.memory_space<vmem>>, vector<1x32xf32>
    %100 = vector.broadcast %99 : vector<1x32xf32> to vector<8x32xf32>
    %101 = arith.addf %98, %100 : vector<8x32xf32>
    %c0_34 = arith.constant 0 : index
    %c0_35 = arith.constant 0 : index
    %c0_36 = arith.constant 0 : index
    %102 = vector.load %arg5[%c0_34, %c0_35, %c0_36] : memref<1x8x32xf32, #tpu.memory_space<vmem>>, vector<1x8x32xf32>
    %103 = vector.shape_cast %102 : vector<1x8x32xf32> to vector<8x32xf32>
    %104 = arith.addf %101, %103 : vector<8x32xf32>
    %c0_37 = arith.constant 0 : index
    %c0_38 = arith.constant 0 : index
    %105 = vector.load %arg8[%c0_37, %c0_38] : memref<1x32xf32, #tpu.memory_space<vmem>>, vector<1x32xf32>
    %c0_39 = arith.constant 0 : index
    %c0_40 = arith.constant 0 : index
    %106 = vector.load %arg9[%c0_39, %c0_40] : memref<1x32xf32, #tpu.memory_space<vmem>>, vector<1x32xf32>
    %cst_41 = arith.constant dense<0.000000e+00> : vector<8xf32>
    %107 = vector.multi_reduction <add>, %104, %cst_41 [1] : vector<8x32xf32> to vector<8xf32>
    %108 = vector.shape_cast %107 : vector<8xf32> to vector<8x1xf32>
    %cst_42 = arith.constant 3.200000e+01 : f32
    %109 = vector.broadcast %cst_42 : f32 to vector<8x1xf32>
    %110 = arith.divf %108, %109 : vector<8x1xf32>
    %111 = vector.broadcast %110 : vector<8x1xf32> to vector<8x32xf32>
    %112 = arith.subf %104, %111 : vector<8x32xf32>
    %113 = arith.mulf %112, %112 : vector<8x32xf32>
    %cst_43 = arith.constant dense<0.000000e+00> : vector<8xf32>
    %114 = vector.multi_reduction <add>, %113, %cst_43 [1] : vector<8x32xf32> to vector<8xf32>
    %115 = vector.shape_cast %114 : vector<8xf32> to vector<8x1xf32>
    %cst_44 = arith.constant 3.200000e+01 : f32
    %116 = vector.broadcast %cst_44 : f32 to vector<8x1xf32>
    %117 = arith.divf %115, %116 : vector<8x1xf32>
    %118 = vector.broadcast %110 : vector<8x1xf32> to vector<8x32xf32>
    %119 = arith.subf %104, %118 : vector<8x32xf32>
    %cst_45 = arith.constant 9.99999974E-6 : f32
    %120 = vector.broadcast %cst_45 : f32 to vector<8x1xf32>
    %121 = arith.addf %117, %120 : vector<8x1xf32>
    %122 = math.rsqrt %121 : vector<8x1xf32>
    %123 = vector.broadcast %122 : vector<8x1xf32> to vector<8x32xf32>
    %124 = arith.mulf %119, %123 : vector<8x32xf32>
    %125 = vector.broadcast %105 : vector<1x32xf32> to vector<8x32xf32>
    %126 = arith.mulf %124, %125 : vector<8x32xf32>
    %127 = vector.broadcast %106 : vector<1x32xf32> to vector<8x32xf32>
    %128 = arith.addf %126, %127 : vector<8x32xf32>
    %c0_46 = arith.constant 0 : index
    %c0_47 = arith.constant 0 : index
    %c0_48 = arith.constant 0 : index
    %129 = vector.load %arg10[%c0_46, %c0_47, %c0_48] : memref<1x8x32xf32, #tpu.memory_space<vmem>>, vector<1x8x32xf32>
    %130 = vector.shape_cast %129 : vector<1x8x32xf32> to vector<8x32xf32>
    %131 = vector.shape_cast %128 : vector<8x32xf32> to vector<1x8x32xf32>
    tpu.vector_store %arg10[%c0_46, %c0_47, %c0_48], %131 {strides = array<i32>} : memref<1x8x32xf32, #tpu.memory_space<vmem>>, vector<1x8x32xf32>,
    return
  }
  func.func @transform_0(%arg0: i32, %arg1: i32) -> (i32, i32, i32) {
    %c0_i32 = arith.constant 0 : i32
    %c0_i32_0 = arith.constant 0 : i32
    return %arg0, %arg1, %c0_i32 : i32, i32, i32
  }
  func.func @transform_1(%arg0: i32, %arg1: i32) -> (i32, i32, i32) {
    %c0_i32 = arith.constant 0 : i32
    %c0_i32_0 = arith.constant 0 : i32
    %c0_i32_1 = arith.constant 0 : i32
    return %arg0, %c0_i32, %c0_i32_0 : i32, i32, i32
  }
  func.func @transform_2(%arg0: i32, %arg1: i32) -> (i32, i32, i32) {
    %c0_i32 = arith.constant 0 : i32
    %c0_i32_0 = arith.constant 0 : i32
    %c0_i32_1 = arith.constant 0 : i32
    return %arg0, %c0_i32, %c0_i32_0 : i32, i32, i32
  }
  func.func @transform_3(%arg0: i32, %arg1: i32) -> (i32, i32, i32) {
    %c0_i32 = arith.constant 0 : i32
    %c0_i32_0 = arith.constant 0 : i32
    return %arg0, %arg1, %c0_i32 : i32, i32, i32
  }
  func.func @transform_4(%arg0: i32, %arg1: i32) -> (i32, i32) {
    %c0_i32 = arith.constant 0 : i32
    %c0_i32_0 = arith.constant 0 : i32
    %c0_i32_1 = arith.constant 0 : i32
    return %c0_i32, %c0_i32_0 : i32, i32
  }
  func.func @transform_5(%arg0: i32, %arg1: i32) -> (i32, i32) {
    %c0_i32 = arith.constant 0 : i32
    %c0_i32_0 = arith.constant 0 : i32
    %c0_i32_1 = arith.constant 0 : i32
    return %c0_i32, %c0_i32_0 : i32, i32
  }
  func.func @transform_6(%arg0: i32, %arg1: i32) -> (i32, i32) {
    %c0_i32 = arith.constant 0 : i32
    %c0_i32_0 = arith.constant 0 : i32
    %c0_i32_1 = arith.constant 0 : i32
    return %c0_i32, %c0_i32_0 : i32, i32
  }
  func.func @transform_7(%arg0: i32, %arg1: i32) -> (i32, i32) {
    %c0_i32 = arith.constant 0 : i32
    %c0_i32_0 = arith.constant 0 : i32
    %c0_i32_1 = arith.constant 0 : i32
    return %c0_i32, %c0_i32_0 : i32, i32
  }
  func.func @transform_8(%arg0: i32, %arg1: i32) -> (i32, i32, i32) {
    %c0_i32 = arith.constant 0 : i32
    %c0_i32_0 = arith.constant 0 : i32
    return %arg0, %arg1, %c0_i32 : i32, i32, i32
  }
}

module attributes {stable_mosaic.version = 11 : i64} {
  func.func @_qkv_proj_kernel(%arg0: i32, %arg1: memref<16x32xf32, #tpu.memory_space<vmem>>, %arg2: memref<32x32xbf16, #tpu.memory_space<vmem>>, %arg3: memref<1x32xf32, #tpu.memory_space<vmem>>, %arg4: memref<32x64xbf16, #tpu.memory_space<vmem>>, %arg5: memref<1x64xf32, #tpu.memory_space<vmem>>, %arg6: memref<16x32xbf16, #tpu.memory_space<vmem>>, %arg7: memref<16x64xbf16, #tpu.memory_space<vmem>>) attributes {dimension_semantics = [#tpu.dimension_semantics<parallel>], iteration_bounds = array<i64: 1>, scalar_prefetch = 0 : i64, scratch_operands = 0 : i64, tpu.core_type = #tpu.core_type<tc>, window_params = [{transform_indices = @transform_0, window_bounds = array<i64: 16, 32>}, {pipeline_mode = #tpu.pipeline_mode<synchronous>, transform_indices = @transform_1, window_bounds = array<i64: 32, 32>}, {pipeline_mode = #tpu.pipeline_mode<synchronous>, transform_indices = @transform_2, window_bounds = array<i64: 1, 32>}, {pipeline_mode = #tpu.pipeline_mode<synchronous>, transform_indices = @transform_3, window_bounds = array<i64: 32, 64>}, {pipeline_mode = #tpu.pipeline_mode<synchronous>, transform_indices = @transform_4, window_bounds = array<i64: 1, 64>}, {transform_indices = @transform_5, window_bounds = array<i64: 16, 32>}, {transform_indices = @transform_6, window_bounds = array<i64: 16, 64>}]} {
    %c0 = arith.constant 0 : index
    %c0_0 = arith.constant 0 : index
    %0 = vector.load %arg1[%c0, %c0_0] : memref<16x32xf32, #tpu.memory_space<vmem>>, vector<16x32xf32>
    %1 = arith.truncf %0 : vector<16x32xf32> to vector<16x32xbf16>
    %c0_1 = arith.constant 0 : index
    %c0_2 = arith.constant 0 : index
    %2 = vector.load %arg2[%c0_1, %c0_2] : memref<32x32xbf16, #tpu.memory_space<vmem>>, vector<32x32xbf16>
    %cst = arith.constant dense<0.000000e+00> : vector<16x32xf32>
    %3 = tpu.matmul %1, %2, %cst {dimension_numbers = #tpu.dot_dimension_numbers<[1], [0], [0], [1], [0, 0, 1, 1], [], []>} : vector<16x32xbf16>, vector<32x32xbf16>, vector<16x32xf32> -> vector<16x32xf32>
    %c0_3 = arith.constant 0 : index
    %c0_4 = arith.constant 0 : index
    %4 = vector.load %arg3[%c0_3, %c0_4] : memref<1x32xf32, #tpu.memory_space<vmem>>, vector<1x32xf32>
    %5 = vector.broadcast %4 : vector<1x32xf32> to vector<16x32xf32>
    %6 = arith.addf %3, %5 : vector<16x32xf32>
    %c0_5 = arith.constant 0 : index
    %c0_6 = arith.constant 0 : index
    %7 = vector.load %arg4[%c0_5, %c0_6] : memref<32x64xbf16, #tpu.memory_space<vmem>>, vector<32x64xbf16>
    %cst_7 = arith.constant dense<0.000000e+00> : vector<16x64xf32>
    %8 = tpu.matmul %1, %7, %cst_7 {dimension_numbers = #tpu.dot_dimension_numbers<[1], [0], [0], [1], [0, 0, 1, 1], [], []>} : vector<16x32xbf16>, vector<32x64xbf16>, vector<16x64xf32> -> vector<16x64xf32>
    %c0_8 = arith.constant 0 : index
    %c0_9 = arith.constant 0 : index
    %9 = vector.load %arg5[%c0_8, %c0_9] : memref<1x64xf32, #tpu.memory_space<vmem>>, vector<1x64xf32>
    %10 = vector.broadcast %9 : vector<1x64xf32> to vector<16x64xf32>
    %11 = arith.addf %8, %10 : vector<16x64xf32>
    %12 = arith.truncf %6 : vector<16x32xf32> to vector<16x32xbf16>
    %c0_10 = arith.constant 0 : index
    %c0_11 = arith.constant 0 : index
    %13 = vector.load %arg6[%c0_10, %c0_11] : memref<16x32xbf16, #tpu.memory_space<vmem>>, vector<16x32xbf16>
    tpu.vector_store %arg6[%c0_10, %c0_11], %12 {strides = array<i32>} : memref<16x32xbf16, #tpu.memory_space<vmem>>, vector<16x32xbf16>,
    %14 = arith.truncf %11 : vector<16x64xf32> to vector<16x64xbf16>
    %c0_12 = arith.constant 0 : index
    %c0_13 = arith.constant 0 : index
    %15 = vector.load %arg7[%c0_12, %c0_13] : memref<16x64xbf16, #tpu.memory_space<vmem>>, vector<16x64xbf16>
    tpu.vector_store %arg7[%c0_12, %c0_13], %14 {strides = array<i32>} : memref<16x64xbf16, #tpu.memory_space<vmem>>, vector<16x64xbf16>,
    return
  }
  func.func @transform_0(%arg0: i32) -> (i32, i32) {
    %c0_i32 = arith.constant 0 : i32
    %c0_i32_0 = arith.constant 0 : i32
    return %arg0, %c0_i32 : i32, i32
  }
  func.func @transform_1(%arg0: i32) -> (i32, i32) {
    %c0_i32 = arith.constant 0 : i32
    %c0_i32_0 = arith.constant 0 : i32
    %c0_i32_1 = arith.constant 0 : i32
    return %c0_i32, %c0_i32_0 : i32, i32
  }
  func.func @transform_2(%arg0: i32) -> (i32, i32) {
    %c0_i32 = arith.constant 0 : i32
    %c0_i32_0 = arith.constant 0 : i32
    %c0_i32_1 = arith.constant 0 : i32
    return %c0_i32, %c0_i32_0 : i32, i32
  }
  func.func @transform_3(%arg0: i32) -> (i32, i32) {
    %c0_i32 = arith.constant 0 : i32
    %c0_i32_0 = arith.constant 0 : i32
    %c0_i32_1 = arith.constant 0 : i32
    return %c0_i32, %c0_i32_0 : i32, i32
  }
  func.func @transform_4(%arg0: i32) -> (i32, i32) {
    %c0_i32 = arith.constant 0 : i32
    %c0_i32_0 = arith.constant 0 : i32
    %c0_i32_1 = arith.constant 0 : i32
    return %c0_i32, %c0_i32_0 : i32, i32
  }
  func.func @transform_5(%arg0: i32) -> (i32, i32) {
    %c0_i32 = arith.constant 0 : i32
    %c0_i32_0 = arith.constant 0 : i32
    return %arg0, %c0_i32 : i32, i32
  }
  func.func @transform_6(%arg0: i32) -> (i32, i32) {
    %c0_i32 = arith.constant 0 : i32
    %c0_i32_0 = arith.constant 0 : i32
    return %arg0, %c0_i32 : i32, i32
  }
}

module attributes {stable_mosaic.version = 11 : i64} {
  func.func @_linear_kernel(%arg0: i32, %arg1: memref<16x32xf32, #tpu.memory_space<vmem>>, %arg2: memref<32x32xbf16, #tpu.memory_space<vmem>>, %arg3: memref<1x32xf32, #tpu.memory_space<vmem>>, %arg4: memref<16x32xbf16, #tpu.memory_space<vmem>>) attributes {dimension_semantics = [#tpu.dimension_semantics<parallel>], iteration_bounds = array<i64: 1>, scalar_prefetch = 0 : i64, scratch_operands = 0 : i64, tpu.core_type = #tpu.core_type<tc>, window_params = [{transform_indices = @transform_0, window_bounds = array<i64: 16, 32>}, {pipeline_mode = #tpu.pipeline_mode<synchronous>, transform_indices = @transform_1, window_bounds = array<i64: 32, 32>}, {pipeline_mode = #tpu.pipeline_mode<synchronous>, transform_indices = @transform_2, window_bounds = array<i64: 1, 32>}, {transform_indices = @transform_3, window_bounds = array<i64: 16, 32>}]} {
    %c0 = arith.constant 0 : index
    %c0_0 = arith.constant 0 : index
    %0 = vector.load %arg1[%c0, %c0_0] : memref<16x32xf32, #tpu.memory_space<vmem>>, vector<16x32xf32>
    %1 = arith.truncf %0 : vector<16x32xf32> to vector<16x32xbf16>
    %c0_1 = arith.constant 0 : index
    %c0_2 = arith.constant 0 : index
    %2 = vector.load %arg2[%c0_1, %c0_2] : memref<32x32xbf16, #tpu.memory_space<vmem>>, vector<32x32xbf16>
    %cst = arith.constant dense<0.000000e+00> : vector<16x32xf32>
    %3 = tpu.matmul %1, %2, %cst {dimension_numbers = #tpu.dot_dimension_numbers<[1], [0], [0], [1], [0, 0, 1, 1], [], []>} : vector<16x32xbf16>, vector<32x32xbf16>, vector<16x32xf32> -> vector<16x32xf32>
    %c0_3 = arith.constant 0 : index
    %c0_4 = arith.constant 0 : index
    %4 = vector.load %arg3[%c0_3, %c0_4] : memref<1x32xf32, #tpu.memory_space<vmem>>, vector<1x32xf32>
    %5 = vector.broadcast %4 : vector<1x32xf32> to vector<16x32xf32>
    %6 = arith.addf %3, %5 : vector<16x32xf32>
    %7 = arith.truncf %6 : vector<16x32xf32> to vector<16x32xbf16>
    %c0_5 = arith.constant 0 : index
    %c0_6 = arith.constant 0 : index
    %8 = vector.load %arg4[%c0_5, %c0_6] : memref<16x32xbf16, #tpu.memory_space<vmem>>, vector<16x32xbf16>
    tpu.vector_store %arg4[%c0_5, %c0_6], %7 {strides = array<i32>} : memref<16x32xbf16, #tpu.memory_space<vmem>>, vector<16x32xbf16>,
    return
  }
  func.func @transform_0(%arg0: i32) -> (i32, i32) {
    %c0_i32 = arith.constant 0 : i32
    %c0_i32_0 = arith.constant 0 : i32
    return %arg0, %c0_i32 : i32, i32
  }
  func.func @transform_1(%arg0: i32) -> (i32, i32) {
    %c0_i32 = arith.constant 0 : i32
    %c0_i32_0 = arith.constant 0 : i32
    %c0_i32_1 = arith.constant 0 : i32
    return %c0_i32, %c0_i32_0 : i32, i32
  }
  func.func @transform_2(%arg0: i32) -> (i32, i32) {
    %c0_i32 = arith.constant 0 : i32
    %c0_i32_0 = arith.constant 0 : i32
    %c0_i32_1 = arith.constant 0 : i32
    return %c0_i32, %c0_i32_0 : i32, i32
  }
  func.func @transform_3(%arg0: i32) -> (i32, i32) {
    %c0_i32 = arith.constant 0 : i32
    %c0_i32_0 = arith.constant 0 : i32
    return %arg0, %c0_i32 : i32, i32
  }
}

module attributes {stable_mosaic.version = 11 : i64} {
  func.func @_attn_block_kernel(%arg0: i32, %arg1: i32, %arg2: memref<1x8x32xbf16, #tpu.memory_space<vmem>>, %arg3: memref<1x8x64xbf16, #tpu.memory_space<vmem>>, %arg4: memref<1x1x8xf32, #tpu.memory_space<vmem>>, %arg5: memref<1x8x32xf32, #tpu.memory_space<vmem>>, %arg6: memref<32x32xbf16, #tpu.memory_space<vmem>>, %arg7: memref<1x32xf32, #tpu.memory_space<vmem>>, %arg8: memref<1x32xf32, #tpu.memory_space<vmem>>, %arg9: memref<1x32xf32, #tpu.memory_space<vmem>>, %arg10: memref<1x8x32xf32, #tpu.memory_space<vmem>>) attributes {dimension_semantics = [#tpu.dimension_semantics<parallel>, #tpu.dimension_semantics<parallel>], iteration_bounds = array<i64: 2, 1>, scalar_prefetch = 0 : i64, scratch_operands = 0 : i64, tpu.core_type = #tpu.core_type<tc>, window_params = [{transform_indices = @transform_0, window_bounds = array<i64: 1, 8, 32>}, {transform_indices = @transform_1, window_bounds = array<i64: 1, 8, 64>}, {transform_indices = @transform_2, window_bounds = array<i64: 1, 1, 8>}, {transform_indices = @transform_3, window_bounds = array<i64: 1, 8, 32>}, {pipeline_mode = #tpu.pipeline_mode<synchronous>, transform_indices = @transform_4, window_bounds = array<i64: 32, 32>}, {pipeline_mode = #tpu.pipeline_mode<synchronous>, transform_indices = @transform_5, window_bounds = array<i64: 1, 32>}, {pipeline_mode = #tpu.pipeline_mode<synchronous>, transform_indices = @transform_6, window_bounds = array<i64: 1, 32>}, {pipeline_mode = #tpu.pipeline_mode<synchronous>, transform_indices = @transform_7, window_bounds = array<i64: 1, 32>}, {transform_indices = @transform_8, window_bounds = array<i64: 1, 8, 32>}]} {
    %c0 = arith.constant 0 : index
    %c0_0 = arith.constant 0 : index
    %c0_1 = arith.constant 0 : index
    %0 = vector.load %arg2[%c0, %c0_0, %c0_1] : memref<1x8x32xbf16, #tpu.memory_space<vmem>>, vector<1x8x32xbf16>
    %1 = vector.shape_cast %0 : vector<1x8x32xbf16> to vector<8x32xbf16>
    %c0_2 = arith.constant 0 : index
    %c0_3 = arith.constant 0 : index
    %c0_4 = arith.constant 0 : index
    %2 = vector.load %arg3[%c0_2, %c0_3, %c0_4] : memref<1x8x64xbf16, #tpu.memory_space<vmem>>, vector<1x8x64xbf16>
    %3 = vector.shape_cast %2 : vector<1x8x64xbf16> to vector<8x64xbf16>
    %4 = vector.extract_strided_slice %3 {offsets = [0, 0], sizes = [8, 32], strides = [1, 1]} : vector<8x64xbf16> to vector<8x32xbf16>
    %5 = vector.extract_strided_slice %3 {offsets = [0, 32], sizes = [8, 32], strides = [1, 1]} : vector<8x64xbf16> to vector<8x32xbf16>
    %c0_5 = arith.constant 0 : index
    %c0_6 = arith.constant 0 : index
    %c0_7 = arith.constant 0 : index
    %6 = vector.load %arg4[%c0_5, %c0_6, %c0_7] : memref<1x1x8xf32, #tpu.memory_space<vmem>>, vector<1x1x8xf32>
    %7 = vector.shape_cast %6 : vector<1x1x8xf32> to vector<1x8xf32>
    %8 = vector.extract_strided_slice %1 {offsets = [0, 0], sizes = [8, 8], strides = [1, 1]} : vector<8x32xbf16> to vector<8x8xbf16>
    %9 = vector.extract_strided_slice %4 {offsets = [0, 0], sizes = [8, 8], strides = [1, 1]} : vector<8x32xbf16> to vector<8x8xbf16>
    %10 = vector.extract_strided_slice %5 {offsets = [0, 0], sizes = [8, 8], strides = [1, 1]} : vector<8x32xbf16> to vector<8x8xbf16>
    %cst = arith.constant dense<0.000000e+00> : vector<8x8xf32>
    %11 = tpu.matmul %8, %9, %cst {dimension_numbers = #tpu.dot_dimension_numbers<[1], [1], [0], [0], [0, 0, 1, 0], [], []>} : vector<8x8xbf16>, vector<8x8xbf16>, vector<8x8xf32> -> vector<8x8xf32>
    %cst_8 = arith.constant 0.353553385 : f32
    %12 = vector.broadcast %cst_8 : f32 to vector<8x8xf32>
    %13 = arith.mulf %11, %12 : vector<8x8xf32>
    %14 = vector.broadcast %7 : vector<1x8xf32> to vector<8x8xf32>
    %15 = arith.addf %13, %14 : vector<8x8xf32>
    %cst_9 = arith.constant dense<0xFF800000> : vector<8xf32>
    %16 = vector.multi_reduction <maximumf>, %15, %cst_9 [1] : vector<8x8xf32> to vector<8xf32>
    %17 = vector.shape_cast %16 : vector<8xf32> to vector<8x1xf32>
    %18 = vector.broadcast %17 : vector<8x1xf32> to vector<8x8xf32>
    %19 = arith.subf %15, %18 : vector<8x8xf32>
    %20 = math.exp %19 : vector<8x8xf32>
    %cst_10 = arith.constant dense<0.000000e+00> : vector<8xf32>
    %21 = vector.multi_reduction <add>, %20, %cst_10 [1] : vector<8x8xf32> to vector<8xf32>
    %22 = vector.shape_cast %21 : vector<8xf32> to vector<8x1xf32>
    %23 = tpu.reciprocal %22 {approx = true} : vector<8x1xf32> -> vector<8x1xf32>
    %24 = vector.broadcast %23 : vector<8x1xf32> to vector<8x8xf32>
    %25 = arith.mulf %20, %24 : vector<8x8xf32>
    %26 = arith.truncf %25 : vector<8x8xf32> to vector<8x8xbf16>
    %cst_11 = arith.constant dense<0.000000e+00> : vector<8x8xf32>
    %27 = tpu.matmul %26, %10, %cst_11 {dimension_numbers = #tpu.dot_dimension_numbers<[1], [0], [0], [1], [0, 0, 1, 1], [], []>} : vector<8x8xbf16>, vector<8x8xbf16>, vector<8x8xf32> -> vector<8x8xf32>
    %28 = vector.extract_strided_slice %1 {offsets = [0, 8], sizes = [8, 8], strides = [1, 1]} : vector<8x32xbf16> to vector<8x8xbf16>
    %29 = vector.extract_strided_slice %4 {offsets = [0, 8], sizes = [8, 8], strides = [1, 1]} : vector<8x32xbf16> to vector<8x8xbf16>
    %30 = vector.extract_strided_slice %5 {offsets = [0, 8], sizes = [8, 8], strides = [1, 1]} : vector<8x32xbf16> to vector<8x8xbf16>
    %cst_12 = arith.constant dense<0.000000e+00> : vector<8x8xf32>
    %31 = tpu.matmul %28, %29, %cst_12 {dimension_numbers = #tpu.dot_dimension_numbers<[1], [1], [0], [0], [0, 0, 1, 0], [], []>} : vector<8x8xbf16>, vector<8x8xbf16>, vector<8x8xf32> -> vector<8x8xf32>
    %cst_13 = arith.constant 0.353553385 : f32
    %32 = vector.broadcast %cst_13 : f32 to vector<8x8xf32>
    %33 = arith.mulf %31, %32 : vector<8x8xf32>
    %34 = vector.broadcast %7 : vector<1x8xf32> to vector<8x8xf32>
    %35 = arith.addf %33, %34 : vector<8x8xf32>
    %cst_14 = arith.constant dense<0xFF800000> : vector<8xf32>
    %36 = vector.multi_reduction <maximumf>, %35, %cst_14 [1] : vector<8x8xf32> to vector<8xf32>
    %37 = vector.shape_cast %36 : vector<8xf32> to vector<8x1xf32>
    %38 = vector.broadcast %37 : vector<8x1xf32> to vector<8x8xf32>
    %39 = arith.subf %35, %38 : vector<8x8xf32>
    %40 = math.exp %39 : vector<8x8xf32>
    %cst_15 = arith.constant dense<0.000000e+00> : vector<8xf32>
    %41 = vector.multi_reduction <add>, %40, %cst_15 [1] : vector<8x8xf32> to vector<8xf32>
    %42 = vector.shape_cast %41 : vector<8xf32> to vector<8x1xf32>
    %43 = tpu.reciprocal %42 {approx = true} : vector<8x1xf32> -> vector<8x1xf32>
    %44 = vector.broadcast %43 : vector<8x1xf32> to vector<8x8xf32>
    %45 = arith.mulf %40, %44 : vector<8x8xf32>
    %46 = arith.truncf %45 : vector<8x8xf32> to vector<8x8xbf16>
    %cst_16 = arith.constant dense<0.000000e+00> : vector<8x8xf32>
    %47 = tpu.matmul %46, %30, %cst_16 {dimension_numbers = #tpu.dot_dimension_numbers<[1], [0], [0], [1], [0, 0, 1, 1], [], []>} : vector<8x8xbf16>, vector<8x8xbf16>, vector<8x8xf32> -> vector<8x8xf32>
    %48 = vector.extract_strided_slice %1 {offsets = [0, 16], sizes = [8, 8], strides = [1, 1]} : vector<8x32xbf16> to vector<8x8xbf16>
    %49 = vector.extract_strided_slice %4 {offsets = [0, 16], sizes = [8, 8], strides = [1, 1]} : vector<8x32xbf16> to vector<8x8xbf16>
    %50 = vector.extract_strided_slice %5 {offsets = [0, 16], sizes = [8, 8], strides = [1, 1]} : vector<8x32xbf16> to vector<8x8xbf16>
    %cst_17 = arith.constant dense<0.000000e+00> : vector<8x8xf32>
    %51 = tpu.matmul %48, %49, %cst_17 {dimension_numbers = #tpu.dot_dimension_numbers<[1], [1], [0], [0], [0, 0, 1, 0], [], []>} : vector<8x8xbf16>, vector<8x8xbf16>, vector<8x8xf32> -> vector<8x8xf32>
    %cst_18 = arith.constant 0.353553385 : f32
    %52 = vector.broadcast %cst_18 : f32 to vector<8x8xf32>
    %53 = arith.mulf %51, %52 : vector<8x8xf32>
    %54 = vector.broadcast %7 : vector<1x8xf32> to vector<8x8xf32>
    %55 = arith.addf %53, %54 : vector<8x8xf32>
    %cst_19 = arith.constant dense<0xFF800000> : vector<8xf32>
    %56 = vector.multi_reduction <maximumf>, %55, %cst_19 [1] : vector<8x8xf32> to vector<8xf32>
    %57 = vector.shape_cast %56 : vector<8xf32> to vector<8x1xf32>
    %58 = vector.broadcast %57 : vector<8x1xf32> to vector<8x8xf32>
    %59 = arith.subf %55, %58 : vector<8x8xf32>
    %60 = math.exp %59 : vector<8x8xf32>
    %cst_20 = arith.constant dense<0.000000e+00> : vector<8xf32>
    %61 = vector.multi_reduction <add>, %60, %cst_20 [1] : vector<8x8xf32> to vector<8xf32>
    %62 = vector.shape_cast %61 : vector<8xf32> to vector<8x1xf32>
    %63 = tpu.reciprocal %62 {approx = true} : vector<8x1xf32> -> vector<8x1xf32>
    %64 = vector.broadcast %63 : vector<8x1xf32> to vector<8x8xf32>
    %65 = arith.mulf %60, %64 : vector<8x8xf32>
    %66 = arith.truncf %65 : vector<8x8xf32> to vector<8x8xbf16>
    %cst_21 = arith.constant dense<0.000000e+00> : vector<8x8xf32>
    %67 = tpu.matmul %66, %50, %cst_21 {dimension_numbers = #tpu.dot_dimension_numbers<[1], [0], [0], [1], [0, 0, 1, 1], [], []>} : vector<8x8xbf16>, vector<8x8xbf16>, vector<8x8xf32> -> vector<8x8xf32>
    %68 = vector.extract_strided_slice %1 {offsets = [0, 24], sizes = [8, 8], strides = [1, 1]} : vector<8x32xbf16> to vector<8x8xbf16>
    %69 = vector.extract_strided_slice %4 {offsets = [0, 24], sizes = [8, 8], strides = [1, 1]} : vector<8x32xbf16> to vector<8x8xbf16>
    %70 = vector.extract_strided_slice %5 {offsets = [0, 24], sizes = [8, 8], strides = [1, 1]} : vector<8x32xbf16> to vector<8x8xbf16>
    %cst_22 = arith.constant dense<0.000000e+00> : vector<8x8xf32>
    %71 = tpu.matmul %68, %69, %cst_22 {dimension_numbers = #tpu.dot_dimension_numbers<[1], [1], [0], [0], [0, 0, 1, 0], [], []>} : vector<8x8xbf16>, vector<8x8xbf16>, vector<8x8xf32> -> vector<8x8xf32>
    %cst_23 = arith.constant 0.353553385 : f32
    %72 = vector.broadcast %cst_23 : f32 to vector<8x8xf32>
    %73 = arith.mulf %71, %72 : vector<8x8xf32>
    %74 = vector.broadcast %7 : vector<1x8xf32> to vector<8x8xf32>
    %75 = arith.addf %73, %74 : vector<8x8xf32>
    %cst_24 = arith.constant dense<0xFF800000> : vector<8xf32>
    %76 = vector.multi_reduction <maximumf>, %75, %cst_24 [1] : vector<8x8xf32> to vector<8xf32>
    %77 = vector.shape_cast %76 : vector<8xf32> to vector<8x1xf32>
    %78 = vector.broadcast %77 : vector<8x1xf32> to vector<8x8xf32>
    %79 = arith.subf %75, %78 : vector<8x8xf32>
    %80 = math.exp %79 : vector<8x8xf32>
    %cst_25 = arith.constant dense<0.000000e+00> : vector<8xf32>
    %81 = vector.multi_reduction <add>, %80, %cst_25 [1] : vector<8x8xf32> to vector<8xf32>
    %82 = vector.shape_cast %81 : vector<8xf32> to vector<8x1xf32>
    %83 = tpu.reciprocal %82 {approx = true} : vector<8x1xf32> -> vector<8x1xf32>
    %84 = vector.broadcast %83 : vector<8x1xf32> to vector<8x8xf32>
    %85 = arith.mulf %80, %84 : vector<8x8xf32>
    %86 = arith.truncf %85 : vector<8x8xf32> to vector<8x8xbf16>
    %cst_26 = arith.constant dense<0.000000e+00> : vector<8x8xf32>
    %87 = tpu.matmul %86, %70, %cst_26 {dimension_numbers = #tpu.dot_dimension_numbers<[1], [0], [0], [1], [0, 0, 1, 1], [], []>} : vector<8x8xbf16>, vector<8x8xbf16>, vector<8x8xf32> -> vector<8x8xf32>
    %88 = tpu.concatenate %27, %47, %67, %87 in 1 : vector<8x8xf32>, vector<8x8xf32>, vector<8x8xf32>, vector<8x8xf32> -> vector<8x32xf32>
    %89 = arith.truncf %88 : vector<8x32xf32> to vector<8x32xbf16>
    %c0_27 = arith.constant 0 : index
    %c0_28 = arith.constant 0 : index
    %90 = vector.load %arg6[%c0_27, %c0_28] : memref<32x32xbf16, #tpu.memory_space<vmem>>, vector<32x32xbf16>
    %cst_29 = arith.constant dense<0.000000e+00> : vector<8x32xf32>
    %91 = tpu.matmul %89, %90, %cst_29 {dimension_numbers = #tpu.dot_dimension_numbers<[1], [0], [0], [1], [0, 0, 1, 1], [], []>} : vector<8x32xbf16>, vector<32x32xbf16>, vector<8x32xf32> -> vector<8x32xf32>
    %c0_30 = arith.constant 0 : index
    %c0_31 = arith.constant 0 : index
    %92 = vector.load %arg7[%c0_30, %c0_31] : memref<1x32xf32, #tpu.memory_space<vmem>>, vector<1x32xf32>
    %93 = vector.broadcast %92 : vector<1x32xf32> to vector<8x32xf32>
    %94 = arith.addf %91, %93 : vector<8x32xf32>
    %c0_32 = arith.constant 0 : index
    %c0_33 = arith.constant 0 : index
    %c0_34 = arith.constant 0 : index
    %95 = vector.load %arg5[%c0_32, %c0_33, %c0_34] : memref<1x8x32xf32, #tpu.memory_space<vmem>>, vector<1x8x32xf32>
    %96 = vector.shape_cast %95 : vector<1x8x32xf32> to vector<8x32xf32>
    %97 = arith.addf %94, %96 : vector<8x32xf32>
    %c0_35 = arith.constant 0 : index
    %c0_36 = arith.constant 0 : index
    %98 = vector.load %arg8[%c0_35, %c0_36] : memref<1x32xf32, #tpu.memory_space<vmem>>, vector<1x32xf32>
    %c0_37 = arith.constant 0 : index
    %c0_38 = arith.constant 0 : index
    %99 = vector.load %arg9[%c0_37, %c0_38] : memref<1x32xf32, #tpu.memory_space<vmem>>, vector<1x32xf32>
    %cst_39 = arith.constant dense<0.000000e+00> : vector<8xf32>
    %100 = vector.multi_reduction <add>, %97, %cst_39 [1] : vector<8x32xf32> to vector<8xf32>
    %101 = vector.shape_cast %100 : vector<8xf32> to vector<8x1xf32>
    %cst_40 = arith.constant 3.200000e+01 : f32
    %102 = vector.broadcast %cst_40 : f32 to vector<8x1xf32>
    %103 = arith.divf %101, %102 : vector<8x1xf32>
    %104 = vector.broadcast %103 : vector<8x1xf32> to vector<8x32xf32>
    %105 = arith.subf %97, %104 : vector<8x32xf32>
    %106 = arith.mulf %105, %105 : vector<8x32xf32>
    %cst_41 = arith.constant dense<0.000000e+00> : vector<8xf32>
    %107 = vector.multi_reduction <add>, %106, %cst_41 [1] : vector<8x32xf32> to vector<8xf32>
    %108 = vector.shape_cast %107 : vector<8xf32> to vector<8x1xf32>
    %cst_42 = arith.constant 3.200000e+01 : f32
    %109 = vector.broadcast %cst_42 : f32 to vector<8x1xf32>
    %110 = arith.divf %108, %109 : vector<8x1xf32>
    %111 = vector.broadcast %103 : vector<8x1xf32> to vector<8x32xf32>
    %112 = arith.subf %97, %111 : vector<8x32xf32>
    %cst_43 = arith.constant 9.99999974E-6 : f32
    %113 = vector.broadcast %cst_43 : f32 to vector<8x1xf32>
    %114 = arith.addf %110, %113 : vector<8x1xf32>
    %115 = math.rsqrt %114 : vector<8x1xf32>
    %116 = vector.broadcast %115 : vector<8x1xf32> to vector<8x32xf32>
    %117 = arith.mulf %112, %116 : vector<8x32xf32>
    %118 = vector.broadcast %98 : vector<1x32xf32> to vector<8x32xf32>
    %119 = arith.mulf %117, %118 : vector<8x32xf32>
    %120 = vector.broadcast %99 : vector<1x32xf32> to vector<8x32xf32>
    %121 = arith.addf %119, %120 : vector<8x32xf32>
    %c0_44 = arith.constant 0 : index
    %c0_45 = arith.constant 0 : index
    %c0_46 = arith.constant 0 : index
    %122 = vector.load %arg10[%c0_44, %c0_45, %c0_46] : memref<1x8x32xf32, #tpu.memory_space<vmem>>, vector<1x8x32xf32>
    %123 = vector.shape_cast %122 : vector<1x8x32xf32> to vector<8x32xf32>
    %124 = vector.shape_cast %121 : vector<8x32xf32> to vector<1x8x32xf32>
    tpu.vector_store %arg10[%c0_44, %c0_45, %c0_46], %124 {strides = array<i32>} : memref<1x8x32xf32, #tpu.memory_space<vmem>>, vector<1x8x32xf32>,
    return
  }
  func.func @transform_0(%arg0: i32, %arg1: i32) -> (i32, i32, i32) {
    %c0_i32 = arith.constant 0 : i32
    %c0_i32_0 = arith.constant 0 : i32
    return %arg0, %arg1, %c0_i32 : i32, i32, i32
  }
  func.func @transform_1(%arg0: i32, %arg1: i32) -> (i32, i32, i32) {
    %c0_i32 = arith.constant 0 : i32
    %c0_i32_0 = arith.constant 0 : i32
    %c0_i32_1 = arith.constant 0 : i32
    return %arg0, %c0_i32, %c0_i32_0 : i32, i32, i32
  }
  func.func @transform_2(%arg0: i32, %arg1: i32) -> (i32, i32, i32) {
    %c0_i32 = arith.constant 0 : i32
    %c0_i32_0 = arith.constant 0 : i32
    %c0_i32_1 = arith.constant 0 : i32
    return %arg0, %c0_i32, %c0_i32_0 : i32, i32, i32
  }
  func.func @transform_3(%arg0: i32, %arg1: i32) -> (i32, i32, i32) {
    %c0_i32 = arith.constant 0 : i32
    %c0_i32_0 = arith.constant 0 : i32
    return %arg0, %arg1, %c0_i32 : i32, i32, i32
  }
  func.func @transform_4(%arg0: i32, %arg1: i32) -> (i32, i32) {
    %c0_i32 = arith.constant 0 : i32
    %c0_i32_0 = arith.constant 0 : i32
    %c0_i32_1 = arith.constant 0 : i32
    return %c0_i32, %c0_i32_0 : i32, i32
  }
  func.func @transform_5(%arg0: i32, %arg1: i32) -> (i32, i32) {
    %c0_i32 = arith.constant 0 : i32
    %c0_i32_0 = arith.constant 0 : i32
    %c0_i32_1 = arith.constant 0 : i32
    return %c0_i32, %c0_i32_0 : i32, i32
  }
  func.func @transform_6(%arg0: i32, %arg1: i32) -> (i32, i32) {
    %c0_i32 = arith.constant 0 : i32
    %c0_i32_0 = arith.constant 0 : i32
    %c0_i32_1 = arith.constant 0 : i32
    return %c0_i32, %c0_i32_0 : i32, i32
  }
  func.func @transform_7(%arg0: i32, %arg1: i32) -> (i32, i32) {
    %c0_i32 = arith.constant 0 : i32
    %c0_i32_0 = arith.constant 0 : i32
    %c0_i32_1 = arith.constant 0 : i32
    return %c0_i32, %c0_i32_0 : i32, i32
  }
  func.func @transform_8(%arg0: i32, %arg1: i32) -> (i32, i32, i32) {
    %c0_i32 = arith.constant 0 : i32
    %c0_i32_0 = arith.constant 0 : i32
    return %arg0, %arg1, %c0_i32 : i32, i32, i32
  }
}

module attributes {stable_mosaic.version = 11 : i64} {
  func.func @_ffn_block_kernel(%arg0: i32, %arg1: memref<16x32xf32, #tpu.memory_space<vmem>>, %arg2: memref<32x2048xbf16, #tpu.memory_space<vmem>>, %arg3: memref<1x2048xf32, #tpu.memory_space<vmem>>, %arg4: memref<2048x32xbf16, #tpu.memory_space<vmem>>, %arg5: memref<1x32xf32, #tpu.memory_space<vmem>>, %arg6: memref<1x32xf32, #tpu.memory_space<vmem>>, %arg7: memref<1x32xf32, #tpu.memory_space<vmem>>, %arg8: memref<16x32xf32, #tpu.memory_space<vmem>>) attributes {dimension_semantics = [#tpu.dimension_semantics<parallel>], iteration_bounds = array<i64: 1>, scalar_prefetch = 0 : i64, scratch_operands = 0 : i64, tpu.core_type = #tpu.core_type<tc>, window_params = [{transform_indices = @transform_0, window_bounds = array<i64: 16, 32>}, {pipeline_mode = #tpu.pipeline_mode<synchronous>, transform_indices = @transform_1, window_bounds = array<i64: 32, 2048>}, {pipeline_mode = #tpu.pipeline_mode<synchronous>, transform_indices = @transform_2, window_bounds = array<i64: 1, 2048>}, {pipeline_mode = #tpu.pipeline_mode<synchronous>, transform_indices = @transform_3, window_bounds = array<i64: 2048, 32>}, {pipeline_mode = #tpu.pipeline_mode<synchronous>, transform_indices = @transform_4, window_bounds = array<i64: 1, 32>}, {pipeline_mode = #tpu.pipeline_mode<synchronous>, transform_indices = @transform_5, window_bounds = array<i64: 1, 32>}, {pipeline_mode = #tpu.pipeline_mode<synchronous>, transform_indices = @transform_6, window_bounds = array<i64: 1, 32>}, {transform_indices = @transform_7, window_bounds = array<i64: 16, 32>}]} {
    %c0 = arith.constant 0 : index
    %c0_0 = arith.constant 0 : index
    %0 = vector.load %arg1[%c0, %c0_0] : memref<16x32xf32, #tpu.memory_space<vmem>>, vector<16x32xf32>
    %1 = arith.truncf %0 : vector<16x32xf32> to vector<16x32xbf16>
    %c0_1 = arith.constant 0 : index
    %c0_2 = arith.constant 0 : index
    %2 = vector.load %arg2[%c0_1, %c0_2] : memref<32x2048xbf16, #tpu.memory_space<vmem>>, vector<32x2048xbf16>
    %cst = arith.constant dense<0.000000e+00> : vector<16x2048xf32>
    %3 = tpu.matmul %1, %2, %cst {dimension_numbers = #tpu.dot_dimension_numbers<[1], [0], [0], [1], [0, 0, 1, 1], [], []>} : vector<16x32xbf16>, vector<32x2048xbf16>, vector<16x2048xf32> -> vector<16x2048xf32>
    %c0_3 = arith.constant 0 : index
    %c0_4 = arith.constant 0 : index
    %4 = vector.load %arg3[%c0_3, %c0_4] : memref<1x2048xf32, #tpu.memory_space<vmem>>, vector<1x2048xf32>
    %5 = vector.broadcast %4 : vector<1x2048xf32> to vector<16x2048xf32>
    %6 = arith.addf %3, %5 : vector<16x2048xf32>
    %cst_5 = arith.constant 0.000000e+00 : f32
    %7 = vector.broadcast %cst_5 : f32 to vector<16x2048xf32>
    %8 = arith.maximumf %6, %7 : vector<16x2048xf32>
    %9 = arith.truncf %8 : vector<16x2048xf32> to vector<16x2048xbf16>
    %c0_6 = arith.constant 0 : index
    %c0_7 = arith.constant 0 : index
    %10 = vector.load %arg4[%c0_6, %c0_7] : memref<2048x32xbf16, #tpu.memory_space<vmem>>, vector<2048x32xbf16>
    %cst_8 = arith.constant dense<0.000000e+00> : vector<16x32xf32>
    %11 = tpu.matmul %9, %10, %cst_8 {dimension_numbers = #tpu.dot_dimension_numbers<[1], [0], [0], [1], [0, 0, 1, 1], [], []>} : vector<16x2048xbf16>, vector<2048x32xbf16>, vector<16x32xf32> -> vector<16x32xf32>
    %c0_9 = arith.constant 0 : index
    %c0_10 = arith.constant 0 : index
    %12 = vector.load %arg5[%c0_9, %c0_10] : memref<1x32xf32, #tpu.memory_space<vmem>>, vector<1x32xf32>
    %13 = vector.broadcast %12 : vector<1x32xf32> to vector<16x32xf32>
    %14 = arith.addf %11, %13 : vector<16x32xf32>
    %15 = arith.addf %14, %0 : vector<16x32xf32>
    %c0_11 = arith.constant 0 : index
    %c0_12 = arith.constant 0 : index
    %16 = vector.load %arg6[%c0_11, %c0_12] : memref<1x32xf32, #tpu.memory_space<vmem>>, vector<1x32xf32>
    %c0_13 = arith.constant 0 : index
    %c0_14 = arith.constant 0 : index
    %17 = vector.load %arg7[%c0_13, %c0_14] : memref<1x32xf32, #tpu.memory_space<vmem>>, vector<1x32xf32>
    %cst_15 = arith.constant dense<0.000000e+00> : vector<16xf32>
    %18 = vector.multi_reduction <add>, %15, %cst_15 [1] : vector<16x32xf32> to vector<16xf32>
    %19 = vector.shape_cast %18 : vector<16xf32> to vector<16x1xf32>
    %cst_16 = arith.constant 3.200000e+01 : f32
    %20 = vector.broadcast %cst_16 : f32 to vector<16x1xf32>
    %21 = arith.divf %19, %20 : vector<16x1xf32>
    %22 = vector.broadcast %21 : vector<16x1xf32> to vector<16x32xf32>
    %23 = arith.subf %15, %22 : vector<16x32xf32>
    %24 = arith.mulf %23, %23 : vector<16x32xf32>
    %cst_17 = arith.constant dense<0.000000e+00> : vector<16xf32>
    %25 = vector.multi_reduction <add>, %24, %cst_17 [1] : vector<16x32xf32> to vector<16xf32>
    %26 = vector.shape_cast %25 : vector<16xf32> to vector<16x1xf32>
    %cst_18 = arith.constant 3.200000e+01 : f32
    %27 = vector.broadcast %cst_18 : f32 to vector<16x1xf32>
    %28 = arith.divf %26, %27 : vector<16x1xf32>
    %29 = vector.broadcast %21 : vector<16x1xf32> to vector<16x32xf32>
    %30 = arith.subf %15, %29 : vector<16x32xf32>
    %cst_19 = arith.constant 9.99999974E-6 : f32
    %31 = vector.broadcast %cst_19 : f32 to vector<16x1xf32>
    %32 = arith.addf %28, %31 : vector<16x1xf32>
    %33 = math.rsqrt %32 : vector<16x1xf32>
    %34 = vector.broadcast %33 : vector<16x1xf32> to vector<16x32xf32>
    %35 = arith.mulf %30, %34 : vector<16x32xf32>
    %36 = vector.broadcast %16 : vector<1x32xf32> to vector<16x32xf32>
    %37 = arith.mulf %35, %36 : vector<16x32xf32>
    %38 = vector.broadcast %17 : vector<1x32xf32> to vector<16x32xf32>
    %39 = arith.addf %37, %38 : vector<16x32xf32>
    %c0_20 = arith.constant 0 : index
    %c0_21 = arith.constant 0 : index
    %40 = vector.load %arg8[%c0_20, %c0_21] : memref<16x32xf32, #tpu.memory_space<vmem>>, vector<16x32xf32>
    tpu.vector_store %arg8[%c0_20, %c0_21], %39 {strides = array<i32>} : memref<16x32xf32, #tpu.memory_space<vmem>>, vector<16x32xf32>,
    return
  }
  func.func @transform_0(%arg0: i32) -> (i32, i32) {
    %c0_i32 = arith.constant 0 : i32
    %c0_i32_0 = arith.constant 0 : i32
    return %arg0, %c0_i32 : i32, i32
  }
  func.func @transform_1(%arg0: i32) -> (i32, i32) {
    %c0_i32 = arith.constant 0 : i32
    %c0_i32_0 = arith.constant 0 : i32
    %c0_i32_1 = arith.constant 0 : i32
    return %c0_i32, %c0_i32_0 : i32, i32
  }
  func.func @transform_2(%arg0: i32) -> (i32, i32) {
    %c0_i32 = arith.constant 0 : i32
    %c0_i32_0 = arith.constant 0 : i32
    %c0_i32_1 = arith.constant 0 : i32
    return %c0_i32, %c0_i32_0 : i32, i32
  }
  func.func @transform_3(%arg0: i32) -> (i32, i32) {
    %c0_i32 = arith.constant 0 : i32
    %c0_i32_0 = arith.constant 0 : i32
    %c0_i32_1 = arith.constant 0 : i32
    return %c0_i32, %c0_i32_0 : i32, i32
  }
  func.func @transform_4(%arg0: i32) -> (i32, i32) {
    %c0_i32 = arith.constant 0 : i32
    %c0_i32_0 = arith.constant 0 : i32
    %c0_i32_1 = arith.constant 0 : i32
    return %c0_i32, %c0_i32_0 : i32, i32
  }
  func.func @transform_5(%arg0: i32) -> (i32, i32) {
    %c0_i32 = arith.constant 0 : i32
    %c0_i32_0 = arith.constant 0 : i32
    %c0_i32_1 = arith.constant 0 : i32
    return %c0_i32, %c0_i32_0 : i32, i32
  }
  func.func @transform_6(%arg0: i32) -> (i32, i32) {
    %c0_i32 = arith.constant 0 : i32
    %c0_i32_0 = arith.constant 0 : i32
    %c0_i32_1 = arith.constant 0 : i32
    return %c0_i32, %c0_i32_0 : i32, i32
  }
  func.func @transform_7(%arg0: i32) -> (i32, i32) {
    %c0_i32 = arith.constant 0 : i32
    %c0_i32_0 = arith.constant 0 : i32
    return %arg0, %c0_i32 : i32, i32
  }
}

module attributes {stable_mosaic.version = 11 : i64} {
  func.func @_linear_kernel(%arg0: i32, %arg1: memref<16x32xf32, #tpu.memory_space<vmem>>, %arg2: memref<32x64xbf16, #tpu.memory_space<vmem>>, %arg3: memref<1x64xf32, #tpu.memory_space<vmem>>, %arg4: memref<16x64xbf16, #tpu.memory_space<vmem>>) attributes {dimension_semantics = [#tpu.dimension_semantics<parallel>], iteration_bounds = array<i64: 1>, scalar_prefetch = 0 : i64, scratch_operands = 0 : i64, tpu.core_type = #tpu.core_type<tc>, window_params = [{transform_indices = @transform_0, window_bounds = array<i64: 16, 32>}, {pipeline_mode = #tpu.pipeline_mode<synchronous>, transform_indices = @transform_1, window_bounds = array<i64: 32, 64>}, {pipeline_mode = #tpu.pipeline_mode<synchronous>, transform_indices = @transform_2, window_bounds = array<i64: 1, 64>}, {transform_indices = @transform_3, window_bounds = array<i64: 16, 64>}]} {
    %c0 = arith.constant 0 : index
    %c0_0 = arith.constant 0 : index
    %0 = vector.load %arg1[%c0, %c0_0] : memref<16x32xf32, #tpu.memory_space<vmem>>, vector<16x32xf32>
    %1 = arith.truncf %0 : vector<16x32xf32> to vector<16x32xbf16>
    %c0_1 = arith.constant 0 : index
    %c0_2 = arith.constant 0 : index
    %2 = vector.load %arg2[%c0_1, %c0_2] : memref<32x64xbf16, #tpu.memory_space<vmem>>, vector<32x64xbf16>
    %cst = arith.constant dense<0.000000e+00> : vector<16x64xf32>
    %3 = tpu.matmul %1, %2, %cst {dimension_numbers = #tpu.dot_dimension_numbers<[1], [0], [0], [1], [0, 0, 1, 1], [], []>} : vector<16x32xbf16>, vector<32x64xbf16>, vector<16x64xf32> -> vector<16x64xf32>
    %c0_3 = arith.constant 0 : index
    %c0_4 = arith.constant 0 : index
    %4 = vector.load %arg3[%c0_3, %c0_4] : memref<1x64xf32, #tpu.memory_space<vmem>>, vector<1x64xf32>
    %5 = vector.broadcast %4 : vector<1x64xf32> to vector<16x64xf32>
    %6 = arith.addf %3, %5 : vector<16x64xf32>
    %7 = arith.truncf %6 : vector<16x64xf32> to vector<16x64xbf16>
    %c0_5 = arith.constant 0 : index
    %c0_6 = arith.constant 0 : index
    %8 = vector.load %arg4[%c0_5, %c0_6] : memref<16x64xbf16, #tpu.memory_space<vmem>>, vector<16x64xbf16>
    tpu.vector_store %arg4[%c0_5, %c0_6], %7 {strides = array<i32>} : memref<16x64xbf16, #tpu.memory_space<vmem>>, vector<16x64xbf16>,
    return
  }
  func.func @transform_0(%arg0: i32) -> (i32, i32) {
    %c0_i32 = arith.constant 0 : i32
    %c0_i32_0 = arith.constant 0 : i32
    return %arg0, %c0_i32 : i32, i32
  }
  func.func @transform_1(%arg0: i32) -> (i32, i32) {
    %c0_i32 = arith.constant 0 : i32
    %c0_i32_0 = arith.constant 0 : i32
    %c0_i32_1 = arith.constant 0 : i32
    return %c0_i32, %c0_i32_0 : i32, i32
  }
  func.func @transform_2(%arg0: i32) -> (i32, i32) {
    %c0_i32 = arith.constant 0 : i32
    %c0_i32_0 = arith.constant 0 : i32
    %c0_i32_1 = arith.constant 0 : i32
    return %c0_i32, %c0_i32_0 : i32, i32
  }
  func.func @transform_3(%arg0: i32) -> (i32, i32) {
    %c0_i32 = arith.constant 0 : i32
    %c0_i32_0 = arith.constant 0 : i32
    return %arg0, %c0_i32 : i32, i32
  }
}

module attributes {stable_mosaic.version = 11 : i64} {
  func.func @_linear_kernel(%arg0: i32, %arg1: memref<16x32xf32, #tpu.memory_space<vmem>>, %arg2: memref<32x128xbf16, #tpu.memory_space<vmem>>, %arg3: memref<1x128xf32, #tpu.memory_space<vmem>>, %arg4: memref<16x128xf32, #tpu.memory_space<vmem>>) attributes {dimension_semantics = [#tpu.dimension_semantics<parallel>], iteration_bounds = array<i64: 1>, scalar_prefetch = 0 : i64, scratch_operands = 0 : i64, tpu.core_type = #tpu.core_type<tc>, window_params = [{transform_indices = @transform_0, window_bounds = array<i64: 16, 32>}, {pipeline_mode = #tpu.pipeline_mode<synchronous>, transform_indices = @transform_1, window_bounds = array<i64: 32, 128>}, {pipeline_mode = #tpu.pipeline_mode<synchronous>, transform_indices = @transform_2, window_bounds = array<i64: 1, 128>}, {transform_indices = @transform_3, window_bounds = array<i64: 16, 128>}]} {
    %c0 = arith.constant 0 : index
    %c0_0 = arith.constant 0 : index
    %0 = vector.load %arg1[%c0, %c0_0] : memref<16x32xf32, #tpu.memory_space<vmem>>, vector<16x32xf32>
    %1 = arith.truncf %0 : vector<16x32xf32> to vector<16x32xbf16>
    %c0_1 = arith.constant 0 : index
    %c0_2 = arith.constant 0 : index
    %2 = vector.load %arg2[%c0_1, %c0_2] : memref<32x128xbf16, #tpu.memory_space<vmem>>, vector<32x128xbf16>
    %cst = arith.constant dense<0.000000e+00> : vector<16x128xf32>
    %3 = tpu.matmul %1, %2, %cst {dimension_numbers = #tpu.dot_dimension_numbers<[1], [0], [0], [1], [0, 0, 1, 1], [], []>} : vector<16x32xbf16>, vector<32x128xbf16>, vector<16x128xf32> -> vector<16x128xf32>
    %c0_3 = arith.constant 0 : index
    %c0_4 = arith.constant 0 : index
    %4 = vector.load %arg3[%c0_3, %c0_4] : memref<1x128xf32, #tpu.memory_space<vmem>>, vector<1x128xf32>
    %5 = vector.broadcast %4 : vector<1x128xf32> to vector<16x128xf32>
    %6 = arith.addf %3, %5 : vector<16x128xf32>
    %c0_5 = arith.constant 0 : index
    %c0_6 = arith.constant 0 : index
    %7 = vector.load %arg4[%c0_5, %c0_6] : memref<16x128xf32, #tpu.memory_space<vmem>>, vector<16x128xf32>
    tpu.vector_store %arg4[%c0_5, %c0_6], %6 {strides = array<i32>} : memref<16x128xf32, #tpu.memory_space<vmem>>, vector<16x128xf32>,
    return
  }
  func.func @transform_0(%arg0: i32) -> (i32, i32) {
    %c0_i32 = arith.constant 0 : i32
    %c0_i32_0 = arith.constant 0 : i32
    return %arg0, %c0_i32 : i32, i32
  }
  func.func @transform_1(%arg0: i32) -> (i32, i32) {
    %c0_i32 = arith.constant 0 : i32
    %c0_i32_0 = arith.constant 0 : i32
    %c0_i32_1 = arith.constant 0 : i32
    return %c0_i32, %c0_i32_0 : i32, i32
  }
  func.func @transform_2(%arg0: i32) -> (i32, i32) {
    %c0_i32 = arith.constant 0 : i32
    %c0_i32_0 = arith.constant 0 : i32
    %c0_i32_1 = arith.constant 0 : i32
    return %c0_i32, %c0_i32_0 : i32, i32
  }
  func.func @transform_3(%arg0: i32) -> (i32, i32) {
    %c0_i32 = arith.constant 0 : i32
    %c0_i32_0 = arith.constant 0 : i32
    return %arg0, %c0_i32 : i32, i32
  }
}

</mosaic_0001>

<bundles_post_ra>
// kernel: tpu_custom_call.1
= control target key start
LH: loop header
LB: loop body
LE: loop exit
PB: predicated region body
PF: predicated region fallthrough
CT: control target
= control target key end

     0   :  { %7 = vsyncpa [#allocation3], 0  ;;  %s633_s0 = inlined_call_operand.hbm [shape: f32[16,128], index: 0, kind: input, shape index: {}]   ;;  %s634_s1 = inlined_call_operand.hbm [shape: f32[8,128], index: 1, kind: input, shape index: {}]   ;;  %s635_s2 = inlined_call_operand.hbm [shape: f32[16,128], index: 2, kind: output, shape index: {}]  }
   0x1   :  { %9 = vsyncpa [#allocation3 + $0x1], 0 }
   0x2   :  { %10 = vsyncpa [#allocation6], 0 }
   0x3   :  { %11 = vsyncpa [#allocation4], 0 }
   0x4   :  { %13 = vsyncpa [#allocation4 + $0x1], 0  ;;  %s495_s9 = smov 0   ;;  %s497_s10 = smov 0  }
   0x5   :  { %s499_s11 = smov 0   ;;  %s501_s12 = smov 0  }
   0x6 LB: > { %s516_s13 = sadd.s32 4294967295, %s477_s12   ;;  %s276_s14 = sadd.s32 4294967294, %s477_s12   ;;  %s477_s12 = sphi %s501_s12, %s645_s12   ;;  %s473_s11 = sphi %s499_s11, %s644_s11   ;;  %s469_s10 = sphi %s497_s10, %s643_s10   ;;  %s465_s9 = sphi %s495_s9, %s642_s9  }
   0x7   : > { %p39_p0 = scmp.ne.s32.totalorder %s469_s10, %s465_s9  ;;  %p40_p1 = scmp.eq.s32.totalorder %s516_s13, 0 }
   0x8   : > { %p84_p2 = scmp.eq.s32.totalorder %s516_s13, 1  ;;  %p90_p3 = scmp.eq.s32.totalorder %s276_s14, 1 }
   0x9   : > { %p525_p4 = por %p40_p1, %p39_p0  ;;  %p277_p5 = scmp.ge.s32.totalorder %s477_s12, 1 }
   0xa   : > { %p530_p6 = por %p90_p3, %p39_p0  ;;  %p97_p7 = scmp.lt.s32.totalorder %s477_s12, 3 }
   0xb   : > { %s109_s19 = sshll.u32 %s634_s1, 4  ;;  %s479_s21 = smov [#allocation5]   ;;  %s110_s19 = int_to_ptr.hbm [resolvable:$true] %s109_s19 }
   0xc   : > { %p538_p8 = pnand %p277_p5, %p97_p7  ;;  %s111_s22 = sshll.u32 %s479_s21, 4  ;;  %s112_s22 = int_to_ptr.vmem [resolvable:$true] %s111_s22 }
   0xd   : > { %s548_s23 = sadd.s32 1, %s477_s12   ;;  %s26_s24 = sadd.s32 1, %s473_s11 }
   0xe   : > { %p298_p10 = pneg %p538_p8  ;;  %s23_s25 = ssub.s32 %s477_s12, %s548_s23 }
   0xf   : > { %p24_p12 = scmp.eq.s32.totalorder %s23_s25, 0  ;;  %p33_p13 = scmp.ne.s32.totalorder %s473_s11, %s469_s10 }
  0x10   : > { %p299_p11 = pnand %p298_p10, %p40_p1  ;;  %p34_p0 = scmp.eq.s32.totalorder %s477_s12, 0 }
  0x11   : > { %s557_s26 = scalar_select %p24_p12, %s473_s11, %s26_s24  }
  0x12   : > { %301 = dma.hbm_to_vmem [thread:$0]  (!%p299_p11), %s110_s19, 128, %s112_s22, [#allocation6]  }
  0x13   : > { %p561_p3 = por %p84_p2, %p33_p13  ;;  %p311_p5 = scmp.lt.s32.totalorder %s477_s12, 2 }
  0x14   : > { %s122_s28 = sand.u32 1, %s473_s11   ;;  %s281_s29 = sshll.u32 %s477_s12, 3 }
  0x15   : > { %p35_p7 = por %p34_p0, %p33_p13  ;;  %s280_s30 = sshll.u32 %s122_s28, 3 }
  0x16   : > { %s130_s5 = scalar_lea.hbm %s633_s0, %s281_s29  ;;  %s126_s7 = scalar_lea.vmem [#allocation2], %s280_s30 }
  0x17   : > { %s132_s6 = sshll.u32 %s130_s5, 4  ;;  %s134_s8 = sshll.u32 %s126_s7, 4  ;;  %s133_s6 = int_to_ptr.hbm [resolvable:$true] %s132_s6  ;;  %s135_s8 = int_to_ptr.vmem [resolvable:$true] %s134_s8 }
  0x18   : > { %p571_p10 = pnand %p311_p5, %p35_p7  ;;  %s123_s17 = scalar_lea.sflag [#allocation3], %s122_s28 }
  0x19   : > { %s377_s18 = sshra.s32 %s133_s6, 4  ;;  %s384_s24 = scalar_lea.hbm %s633_s0, 16  ;;  %s378_s18 = int_to_ptr.hbm [resolvable:$true] %s377_s18 }
  0x1a   : > { %s379_s19 = scalar_lea.hbm %s378_s18, 8  ;;  %p381_p11 = pneg %p571_p10 }
  0x1b   : > { %p380_p2 = scmp.ne.s32.totalorder %s378_s18, %s379_s19  ;;  %p385_p0 = scmp.lt.s32.totalorder %s378_s18, %s633_s0 }
  0x1c   : > { %p386_p5 = scmp.lt.s32.totalorder %s384_s24, %s379_s19 }
  0x1d   : > { %p382_p12 = pnand %p381_p11, %p380_p2 }
  0x1e   : > { %p387_p7 = por %p386_p5, %p385_p0 }
  0x1f   : > { %p383_p13 = pneg %p382_p12 }
  0x21   : > { %p388_p9 = pnand %p387_p7, %p383_p13 }
  0x23   : > { %391 = shalt.err (!%p388_p9)
}
  0x24   : > { %305 = dma.hbm_to_vmem [thread:$0]  (!%p571_p10), %s133_s6, 128, %s135_s8, %s123_s17  }
  0x25   : > { %143 = sbr.rel (%p538_p8) target bundleno = 60 (0x3c), region = 28  ;;  %s588_s28 = sand.u32 (!%p538_p8), 1, %s469_s10  }
  0x26   : > { %s283_s30 = sshll.u32 (!%p538_p8), %s588_s28, 3  ;;  %s146_s3 = scalar_lea.sflag (!%p538_p8), [#allocation3], %s588_s28 }
  0x27   : > { %s149_s4 = scalar_lea.vmem (!%p538_p8), [#allocation2], %s283_s30 }
  0x2a   : > { %452 = dma.done.wait (%p525_p4), %s146_s3, 128  }
  0x2b   : > { %454 = vsyncadd (%p525_p4), %s146_s3, 4294967168 }
  0x2c   : > { %456 = dma.done.wait (%p40_p1), [#allocation6], 128  }
  0x2d   : > { %458 = vsyncadd (%p40_p1), [#allocation6], 4294967168  ;;  %s287_s20 = sshll.u32 %s516_s13, 3  ;;  %s175_s8 = scalar_lea.vmem [#allocation7], %s283_s30  ;;  %v176_v0 = vld [vmem:[%s149_s4] sm:$0xff]  ;;  %v177_v1 = vld [vmem:[#allocation5] sm:$0xff] }
  0x2e   : > { %s191_s7 = scalar_lea.hbm %s635_s2, %s287_s20  ;;  %s193_s14 = sshll.u32 %s175_s8, 4  ;;  %v178_v2 = vadd.f32 %v177_v1, %v176_v0  ;;  %s194_s14 = int_to_ptr.vmem [resolvable:$true] %s193_s14 }
  0x2f   : > { %s195_s17 = sshll.u32 %s191_s7, 4  ;;  %s181_s15 = scalar_lea.sflag [#allocation4], %s588_s28  ;;  %s196_s17 = int_to_ptr.hbm [resolvable:$true] %s195_s17 }
  0x30   : > { %179 = vst [vmem:[%s175_s8] sm:$0xff] %v178_v2  ;;  %s421_s18 = sshra.s32 %s196_s17, 4  ;;  %s427_s22 = scalar_lea.hbm %s635_s2, 16  ;;  %s422_s18 = int_to_ptr.hbm [resolvable:$true] %s421_s18 }
  0x31   : > { %s423_s19 = scalar_lea.hbm %s422_s18, 8  ;;  %p428_p9 = scmp.lt.s32.totalorder %s422_s18, %s635_s2 }
  0x32   : > { %p424_p1 = scmp.ne.s32.totalorder %s422_s18, %s423_s19  ;;  %p429_p10 = scmp.lt.s32.totalorder %s427_s22, %s423_s19 }
  0x34   : > { %p425_p4 = pnand %p424_p1, %p561_p3  ;;  %p430_p2 = por %p429_p10, %p428_p9 }
  0x36   : > { %p426_p8 = pneg %p425_p4 }
  0x38   : > { %p431_p11 = pnand %p430_p2, %p426_p8 }
  0x3a   : > { %434 = shalt.err (!%p431_p11)
}
  0x3b   : > { %296 = dma.vmem_to_hbm [thread:$0]  (%p561_p3), %s194_s14, 128, %s196_s17, %s181_s15  }
  0x3c PF: > { %s207_s29 = sand.u32 1, %s465_s9   ;;  %p641_p12 = scmp.ge.s32.totalorder %s477_s12, 2 }
  0x3d   : > { %s208_s28 = scalar_lea.sflag [#allocation4], %s207_s29 }
  0x3e   : > { %p307_p13 = pnand %p641_p12, %p530_p6 }
  0x40   : > { %p308_p0 = pneg %p307_p13 }
  0x42   : > { %460 = dma.done.wait (%p308_p0), %s208_s28, 128  }
  0x43   : > { %462 = vsyncadd (%p308_p0), %s208_s28, 4294967168  ;;  %p16_p5 = scmp.ge.s32.totalorder %s548_s23, 4   ;;  %s642_s9 = smov %s469_s10 }
  0x44   : > { %s643_s10 = smov %s473_s11  ;;  %s644_s11 = smov %s557_s26 }
  0x45   : > { %s645_s12 = smov %s548_s23  ;;  %18 = sbr.rel (!%p16_p5) target bundleno = 6 (0x6), region = 77 }
  0x4a   :  { %214 = vsyncpa [#allocation3], 1 }
  0x4b   :  { %216 = vsyncpa [#allocation3 + $0x1], 1 }
  0x4c   :  { %217 = vsyncpa [#allocation6], 1 }
  0x4d   :  { %218 = vsyncpa [#allocation4], 1 }
  0x4e   :  { %220 = vsyncpa [#allocation4 + $0x1], 1 }

// kernel: transformer_forward.21
= control target key start
LH: loop header
LB: loop body
LE: loop exit
PB: predicated region body
PF: predicated region fallthrough
CT: control target
= control target key end

     0   :  { %vm33_vm0 = vcmask 1045504   ;;  %vm29_vm1 = vcmask 97280   ;;  %vm51_vm2 = vcmask 261120   ;;  %s106_s1 = inlined_call_operand.vmem [shape: bf16[12,32], index: 1, kind: input, shape index: {}]   ;;  %s107_s0 = inlined_call_operand.vmem [shape: f32[16,12], index: 0, kind: input, shape index: {}]   ;;  %s108_s2 = inlined_call_operand.vmem [shape: f32[1,32], index: 2, kind: input, shape index: {}]   ;;  %s109_s3 = inlined_call_operand.vmem [shape: f32[16,32], index: 3, kind: output, shape index: {}]  }
   0x1   :  { %v60_v0 = vld [vmem:[%s106_s1] sm:$0xf]  ;;  %v63_v1 = vld [vmem:[%s106_s1] sm:$0x30]  ;;  %v16_v4 = vld [vmem:[%s107_s0 + $0x8] sm:$0xff] }
   0x2   :  { %v15_v2 = vld [vmem:[%s107_s0] sm:$0xff]  ;;  %v61_v3 = vor.u32 %v63_v1, %v60_v0 }
   0x3   :  { %v17_v6 = vpack.c.bf16 %v16_v4, %v15_v2  ;;  %v64_v7 = vld [vmem:[%s108_s2] ss:$0 sm:$0xff] }
   0x4   :  { %v35_v5 = vsel %vm33_vm0, %v61_v3, 0 }
   0x5   :  { %44 = vmatpush.bf16.msra.mxu0 %v35_v5 }
   0x8   :  { %62 = vmatmul.msk.bf16.vlgmr.msra.gmra.mxu0 %vm29_vm1, %v17_v6 }
  0x85   :  { %v46_v8 = vpop.f32.mrf.mxu0 }
  0x86   :  { %v47_v9 = vadd.f32 %v64_v7, %v46_v8 }
  0x88   :  { %52 = vst.msk [vmem:[%s109_s3] sm:$0xff] %vm51_vm2, %v47_v9 }
  0x8d   :  { %v48_v10 = vpop.f32.mrf.mxu0 }
  0x8e   :  { %v49_v11 = vadd.f32 %v64_v7, %v48_v10 }
  0x90   :  { %53 = vst.msk [vmem:[%s109_s3 + $0x8] sm:$0xff] %vm51_vm2, %v49_v11 }

// kernel: transformer_forward.22
= control target key start
LH: loop header
LB: loop body
LE: loop exit
PB: predicated region body
PF: predicated region fallthrough
CT: control target
= control target key end

     0   :  { %vm33_vm0 = vcmask 1044480   ;;  %vm29_vm1 = vcmask 80896   ;;  %vm51_vm2 = vcmask 261120   ;;  %s106_s1 = inlined_call_operand.vmem [shape: bf16[10,32], index: 1, kind: input, shape index: {}]   ;;  %s107_s0 = inlined_call_operand.vmem [shape: f32[16,10], index: 0, kind: input, shape index: {}]   ;;  %s108_s2 = inlined_call_operand.vmem [shape: f32[1,32], index: 2, kind: input, shape index: {}]   ;;  %s109_s3 = inlined_call_operand.vmem [shape: f32[16,32], index: 3, kind: output, shape index: {}]  }
   0x1   :  { %v60_v0 = vld [vmem:[%s106_s1] sm:$0xf]  ;;  %v63_v1 = vld [vmem:[%s106_s1] sm:$0x10]  ;;  %v16_v4 = vld [vmem:[%s107_s0 + $0x8] sm:$0xff] }
   0x2   :  { %v15_v2 = vld [vmem:[%s107_s0] sm:$0xff]  ;;  %v61_v3 = vor.u32 %v63_v1, %v60_v0 }
   0x3   :  { %v17_v6 = vpack.c.bf16 %v16_v4, %v15_v2  ;;  %v64_v7 = vld [vmem:[%s108_s2] ss:$0 sm:$0xff] }
   0x4   :  { %v35_v5 = vsel %vm33_vm0, %v61_v3, 0 }
   0x5   :  { %44 = vmatpush.bf16.msra.mxu0 %v35_v5 }
   0x8   :  { %62 = vmatmul.msk.bf16.vlgmr.msra.gmra.mxu0 %vm29_vm1, %v17_v6 }
  0x85   :  { %v46_v8 = vpop.f32.mrf.mxu0 }
  0x86   :  { %v47_v9 = vadd.f32 %v64_v7, %v46_v8 }
  0x88   :  { %52 = vst.msk [vmem:[%s109_s3] sm:$0xff] %vm51_vm2, %v47_v9 }
  0x8d   :  { %v48_v10 = vpop.f32.mrf.mxu0 }
  0x8e   :  { %v49_v11 = vadd.f32 %v64_v7, %v48_v10 }
  0x90   :  { %53 = vst.msk [vmem:[%s109_s3 + $0x8] sm:$0xff] %vm51_vm2, %v49_v11 }

// kernel: transformer_forward.29
= control target key start
LH: loop header
LB: loop body
LE: loop exit
PB: predicated region body
PF: predicated region fallthrough
CT: control target
= control target key end

     0   :  { %vm46_vm0 = vcmask 261120   ;;  %vm100_vm1 = vcmask 257024   ;;  %vm105_vm2 = vcmask 519168   ;;  %s211_s1 = inlined_call_operand.vmem [shape: bf16[32,32], index: 1, kind: input, shape index: {}]   ;;  %s212_s3 = inlined_call_operand.vmem [shape: bf16[32,64], index: 3, kind: input, shape index: {}]   ;;  %s213_s0 = inlined_call_operand.vmem [shape: f32[16,32], index: 0, kind: input, shape index: {}]   ;;  %s214_s2 = inlined_call_operand.vmem [shape: f32[1,32], index: 2, kind: input, shape index: {}]   ;;  %s215_s4 = inlined_call_operand.vmem [shape: f32[1,64], index: 4, kind: input, shape index: {}]   ;;  %s216_s5 = inlined_call_operand.vmem [shape: bf16[16,32], index: 5, kind: output, shape index: {0}]   ;;  %s217_s6 = inlined_call_operand.vmem [shape: bf16[16,64], index: 6, kind: output, shape index: {1}]  }
   0x1   :  { %v135_v0 = vld [vmem:[%s211_s1 + $0x8] sm:$0xff]  ;;  %v134_v2 = vld [vmem:[%s211_s1] sm:$0xff] }
   0x2   :  { %v137_v1 = vld [vmem:[%s212_s3 + $0x8] sm:$0xff]  ;;  %v136_v3 = vld [vmem:[%s212_s3] sm:$0xff]  ;;  %56 = vmatpush.bf16.msra.mxu0 %v135_v0 }
   0x3   :  { %90 = vmatpush.bf16.msra.mxu1 %v137_v1  ;;  %v23_v4 = vld [vmem:[%s213_s0] sm:$0xff]  ;;  %v24_v5 = vld [vmem:[%s213_s0 + $0x8] sm:$0xff] }
   0x4   :  { %v25_v6 = vpack.c.bf16 %v24_v5, %v23_v4  ;;  %v138_v7 = vld [vmem:[%s214_s2] ss:$0 sm:$0xff] }
   0x5   :  { %v139_v8 = vld [vmem:[%s215_s4] ss:$0 sm:$0xff] }
   0x6   :  { %57 = vmatpush.bf16.msra.mxu0 %v134_v2 }
   0x7   :  { %91 = vmatpush.bf16.msra.mxu1 %v136_v3 }
   0x9   :  { %124 = vmatmul.msk.bf16.vlgmr.msra.gmra.mxu0 %vm46_vm0, %v25_v6 }
   0xa   :  { %133 = vmatmul.msk.bf16.vlgmr.msra.gmra.mxu1 %vm46_vm0, %v25_v6 }
  0x86   :  { %v59_v9 = vpop.f32.mrf.mxu0 }
  0x87   :  { %v93_v10 = vpop.f32.mrf.mxu1  ;;  %v60_v11 = vadd.f32 %v138_v7, %v59_v9 }
  0x88   :  { %v94_v12 = vadd.f32 %v139_v8, %v93_v10 }
  0x89   :  { %v98_v13 = vpack.c.bf16 %v60_v11, %v60_v11 }
  0x8a   :  { %v103_v14 = vpack.c.bf16 %v94_v12, %v94_v12 }
  0x8b   :  { %101 = vst.msk [vmem:[%s216_s5] sm:$0xf] %vm100_vm1, %v98_v13 }
  0x8c   :  { %106 = vst.msk [vmem:[%s217_s6] sm:$0xf] %vm105_vm2, %v103_v14 }
  0x8e   :  { %v61_v15 = vpop.f32.mrf.mxu0 }
  0x8f   :  { %v95_v16 = vpop.f32.mrf.mxu1  ;;  %v62_v17 = vadd.f32 %v138_v7, %v61_v15 }
  0x90   :  { %v96_v18 = vadd.f32 %v139_v8, %v95_v16 }
  0x91   :  { %v99_v19 = vpack.c.bf16 %v62_v17, %v62_v17 }
  0x92   :  { %v104_v20 = vpack.c.bf16 %v96_v18, %v96_v18 }
  0x93   :  { %102 = vst.msk [vmem:[%s216_s5 + $0x4] sm:$0xf] %vm100_vm1, %v99_v19 }
  0x94   :  { %107 = vst.msk [vmem:[%s217_s6 + $0x4] sm:$0xf] %vm105_vm2, %v104_v20 }

// kernel: transformer_forward.30
= control target key start
LH: loop header
LB: loop body
LE: loop exit
PB: predicated region body
PF: predicated region fallthrough
CT: control target
= control target key end

     0   :  { %s1022_s27 = smov 0   ;;  %s1024_s28 = smov 0   ;;  %s1129_s0 = inlined_call_operand.vmem [shape: bf16[2,8,32], index: 0, kind: input, shape index: {}]   ;;  %s1130_s1 = inlined_call_operand.vmem [shape: bf16[2,8,64], index: 1, kind: input, shape index: {}]   ;;  %s1131_s2 = inlined_call_operand.vmem [shape: f32[2,1,8], index: 2, kind: input, shape index: {}]   ;;  %s1132_s3 = inlined_call_operand.vmem [shape: f32[2,8,32], index: 3, kind: input, shape index: {}]   ;;  %s1133_s4 = inlined_call_operand.vmem [shape: bf16[32,32], index: 4, kind: input, shape index: {}]   ;;  %s1134_s5 = inlined_call_operand.vmem [shape: f32[1,32], index: 5, kind: input, shape index: {}]   ;;  %s1135_s6 = inlined_call_operand.vmem [shape: f32[1,32], index: 6, kind: input, shape index: {}]   ;;  %s1136_s7 = inlined_call_operand.vmem [shape: f32[1,32], index: 7, kind: input, shape index: {}]   ;;  %s1137_s8 = inlined_call_operand.vmem [shape: f32[2,8,32], index: 8, kind: output, shape index: {}]  }
   0x1   :  { %s1026_s29 = smov 0  }
   0x2 LB: > { %s30_s30 = sadd.s32 1, %s959_s28  ;;  %p855_p0 = scmp.ge.s32.totalorder %s963_s29, 1  ;;  %s963_s29 = sphi %s1026_s29, %s18_s29   ;;  %s959_s28 = sphi %s1024_s28, %s1139_s28   ;;  %s955_s27 = sphi %s1022_s27, %s1138_s27  }
   0x3   : > { %p32_p1 = scmp.ge.s32.totalorder %s30_s30, 2  ;;  %p311_p2 = scmp.lt.s32.totalorder %s963_s29, 3 }
   0x5   : > { %s1141_s30 = smov (%p32_p1, %s30_s30), 0  ;;  %p312_p3 = pnand %p855_p0, %p311_p2 }
   0x6   : > { %p363_p4 = scmp.lt.s32.totalorder (!%p312_p3), %s955_s27, 1  ;;  %s965_s19 = smov (!%p312_p3), 96  }
   0x7   : > { %315 = sbr.rel (%p312_p3) target bundleno = 1481 (0x5c9), region = 52  ;;  %s966_s20 = smov (!%p312_p3), 112  }
   0x8   : > { %s967_s21 = smov (!%p312_p3), 104   ;;  %s969_s22 = smov (!%p312_p3), 120  }
   0x9   : > { %s970_s23 = smov (!%p312_p3), 88   ;;  %s971_s24 = smov (!%p312_p3), 80  }
   0xa   : > { %s972_s25 = smov (!%p312_p3), 72   ;;  %s973_s26 = smov (!%p312_p3), 8  }
   0xb   : > { %s975_s10 = smov (!%p312_p3), 16  }
   0xc   : > { %s1143_s27 = smov (!%p363_p4, %s955_s27), 1  ;;  %vm408_vm0 = vcmask 64512   ;;  %v396_v7 = vlaneseq  ;;  %v968_v11 = vmov 0.0   ;;  %vm450_vm2 = vcmask 1043456  }
   0xd   : > { %s856_s9 = sshll.u32 %s1143_s27, 2  ;;  %s376_s12 = scalar_lea.vmem %s1131_s2, %s1143_s27  ;;  %vm657_vm3 = vcmask 130048   ;;  %vm659_vm4 = vcmask 195584   ;;  %vm682_vm5 = vcmask 261120  }
   0xe   : > { %s373_s15 = scalar_lea.vmem %s1130_s1, %s856_s9  ;;  %s369_s18 = scalar_lea.vmem %s1129_s0, %s856_s9  ;;  %v397_v8 = vshrl.u32 %v396_v7, 7  ;;  %v401_v9 = vand.u32 127, %v396_v7  ;;  %v917_v10 = vld [vmem:[%s376_s12] ss:$0 sm:$0xff] }
   0xf   : > { %v393_v0 = vld [vmem:[%s373_s15] sm:$0xf]  ;;  %s974_s9 = smov 24   ;;  %s858_s15 = sshll.u32 %s1143_s27, 3 }
  0x10   : > { %v413_v1 = vsel %vm408_vm0, %v393_v0, 0  ;;  %v392_v2 = vld [vmem:[%s369_s18] sm:$0xf]  ;;  %v443_v3 = vunpack.c.l.b16 %v393_v0  ;;  %vm402_vm1 = vcmp.gt.s32.totalorder %v401_v9, %v397_v8 }
  0x11   : > { %422 = vmatpush.bf16.xpose.msra.mxu0 %v413_v1  ;;  %v468_v5 = vunpack.c.l.b16 %v392_v2  ;;  %v403_v12 = vsel %vm402_vm1, -1e+30, %v968_v11 }
  0x12   : > { %v1055_v4 = vpack.c.b16 %v443_v3, %v443_v3  ;;  %v407_v13 = vadd.f32 %v917_v10, %v403_v12 }
  0x13   : > { %v469_v6 = vpack.c.b16 %v468_v5, %v468_v5 }
  0x14   : > { %445 = vrot.lane.b32.xlu2 %v1055_v4, %s965_s19 }
  0x18   : > { %860 = vmatmul.msk.bf16.vlgmr.msra.gmra.mxu0 %vm408_vm0, %v392_v2 }
  0x1c   : > { %530 = vrot.lane.b32.xlu2 %v1055_v4, %s966_s20 }
  0x24   : > { %588 = vrot.lane.b32.xlu2 %v1055_v4, %s967_s21 }
  0x2c   : > { %528 = vrot.lane.b32.xlu2 %v469_v6, %s966_s20  ;;  %s383_s20 = scalar_lea.vmem %s1132_s3, %s858_s15 }
  0x6e   : > { %v446_v19 = vpop.permute.xlu2 %445 }
  0x6f   : > { %v452_v30 = vsel %vm450_vm2, %v446_v19, 0 }
  0x70   : > { %461 = vmatpush.bf16.msra.mxu1 %v452_v30 }
  0x76   : > { %v531_v20 = vpop.permute.xlu2 %530 }
  0x77   : > { %v536_v31 = vsel %vm408_vm0, %v531_v20, 0 }
  0x78   : > { %545 = vmatpush.bf16.xpose.msrb.mxu1 %v536_v31  ;;  %v880_v31 = vld [vmem:[%s1133_s4 + $0x8] sm:$0xff] }
  0x7e   : > { %v589_v24 = vpop.permute.xlu2 %588 }
  0x7f   : > { %v594_v25 = vsel %vm408_vm0, %v589_v24, 0 }
  0x80   : > { %603 = vmatpush.bf16.xpose.msrb.mxu0 %v594_v25 }
  0x86   : > { %v529_v38 = vpop.permute.xlu2 %528 }
  0x95   : > { %v424_v14 = vpop.f32.mrf.mxu0 }
  0x96   : > { %v428_v15 = vmul.f32 0.35355338, %v424_v14 }
  0x98   : > { %v429_v16 = vadd.f32 %v428_v15, %v407_v13 }
  0x9a   : > { %v430_v17 = vsel %vm408_vm0, %v429_v16, -inf }
  0x9b   : > { %431 = vmax.xlane.f32.xlu0 %v430_v17 }
  0x9d   : > { %v426_v18 = vpop.f32.mrf.mxu0 }
  0xaf   : > { %472 = vrot.lane.b32.xlu0 %v1055_v4, %s969_s22 }
  0xb7   : > { %586 = vrot.lane.b32.xlu0 %v469_v6, %s967_s21 }
 0x10e   : > { %v432_v21 = vpop.xlane.xlu0 %431 }
 0x10f   : > { %v433_v22 = vsub.f32 %v429_v16, %v432_v21 }
 0x111   : > { %v434_v23 = vmul.f32 1.442695, %v433_v22 }
 0x113   : > { %921 = vpow2.f32 %v434_v23 }
 0x119   : > { %v922_v26 = vpop.eup %921 }
 0x11a   : > { %v436_v27 = vsel %vm408_vm0, %v922_v26, 0.0 }
 0x11b   : > { %437 = vadd.xlane.f32.xlu1 %v436_v27 }
 0x121   : > { %v473_v28 = vpop.permute.xlu0 %472 }
 0x122   : > { %v478_v32 = vsel %vm408_vm0, %v473_v28, 0 }
 0x123   : > { %487 = vmatpush.bf16.xpose.msra.mxu2 %v478_v32  ;;  %v879_v32 = vld [vmem:[%s1133_s4] sm:$0xff] }
 0x129   : > { %v587_v29 = vpop.permute.xlu0 %586 }
 0x12a   : > { %866 = vmatmul.msk.bf16.vlgmr.msrb.gmra.mxu0 %vm408_vm0, %v587_v29 }
 0x134   : > { %470 = vrot.lane.b32.xlu1 %v469_v6, %s969_s22 }
 0x18e   : > { %v438_v33 = vpop.xlane.xlu1 %437 }
 0x18f   : > { %923 = vrcp.f32 %v438_v33 }
 0x195   : > { %v924_v34 = vpop.eup %923 }
 0x196   : > { %v440_v35 = vmul.f32 %v924_v34, %v922_v26 }
 0x198   : > { %v441_v36 = vpack.c.bf16 %v440_v35, %v440_v35 }
 0x19a   : > { %861 = vmatmul.msk.bf16.vlgmr.msra.gmra.mxu1 %vm408_vm0, %v441_v36 }
 0x19b   : > { %692 = vmatpush.bf16.msra.mxu1 %v880_v31 }
 0x19f   : > { %693 = vmatpush.bf16.msra.mxu1 %v879_v32 }
 0x1a6   : > { %v471_v37 = vpop.permute.xlu1 %470 }
 0x1a7   : > { %862 = vmatmul.msk.bf16.vlgmr.msra.gmra.mxu2 %vm408_vm0, %v471_v37  ;;  %v605_v39 = vpop.f32.mrf.mxu0 }
 0x1a8   : > { %v609_v40 = vmul.f32 0.35355338, %v605_v39 }
 0x1aa   : > { %864 = vmatmul.msk.bf16.vlgmr.msrb.gmra.mxu1 %vm408_vm0, %v529_v38  ;;  %v610_v41 = vadd.f32 %v609_v40, %v407_v13  ;;  %v918_v40 = vld [vmem:[%s1134_s5] ss:$0 sm:$0xff] }
 0x1ac   : > { %v611_v42 = vsel %vm408_vm0, %v610_v41, -inf }
 0x1ad   : > { %612 = vmax.xlane.f32.xlu0 %v611_v42  ;;  %v699_v42 = vld [vmem:[%s383_s20] sm:$0xff] }
 0x1af   : > { %v607_v43 = vpop.f32.mrf.mxu0 }
 0x217   : > { %v1072_v44 = vpop.f32.mrf.mxu1 }
 0x21f   : > { %v465_v45 = vpop.f32.mrf.mxu1 }
 0x220   : > { %v613_v58 = vpop.xlane.xlu0 %612 }
 0x221   : > { %v614_v62 = vsub.f32 %v610_v41, %v613_v58 }
 0x223   : > { %v615_v0 = vmul.f32 1.442695, %v614_v62 }
 0x227   : > { %v547_v46 = vpop.f32.mrf.mxu1 }
 0x228   : > { %v551_v47 = vmul.f32 0.35355338, %v547_v46 }
 0x22a   : > { %v489_v48 = vpop.f32.mrf.mxu2  ;;  %v552_v49 = vadd.f32 %v551_v47, %v407_v13  ;;  %v976_v47 = vmov 32.0  }
 0x22b   : > { %v493_v50 = vmul.f32 0.35355338, %v489_v48 }
 0x22c   : > { %v553_v51 = vsel %vm408_vm0, %v552_v49, -inf }
 0x22d   : > { %554 = vmax.xlane.f32.xlu1 %v553_v51  ;;  %v494_v52 = vadd.f32 %v493_v50, %v407_v13 }
 0x22f   : > { %v549_v53 = vpop.f32.mrf.mxu1  ;;  %v495_v54 = vsel %vm408_vm0, %v494_v52, -inf }
 0x230   : > { %496 = vmax.xlane.f32.xlu2 %v495_v54 }
 0x232   : > { %v491_v55 = vpop.f32.mrf.mxu2 }
 0x246   : > { %507 = vrot.lane.b32.xlu1 %v1055_v4, %s970_s23 }
 0x2a0   : > { %v555_v56 = vpop.xlane.xlu1 %554 }
 0x2a1   : > { %v556_v57 = vsub.f32 %v552_v49, %v555_v56 }
 0x2a3   : > { %v557_v59 = vmul.f32 1.442695, %v556_v57  ;;  %v497_v60 = vpop.xlane.xlu2 %496 }
 0x2a4   : > { %v498_v61 = vsub.f32 %v494_v52, %v497_v60 }
 0x2a5   : > { %925 = vpow2.f32 %v557_v59 }
 0x2a6   : > { %v499_v63 = vmul.f32 1.442695, %v498_v61 }
 0x2a8   : > { %927 = vpow2.f32 %v499_v63 }
 0x2a9   : > { %929 = vpow2.f32 %v615_v0 }
 0x2ab   : > { %v926_v1 = vpop.eup %925 }
 0x2ac   : > { %v559_v2 = vsel %vm408_vm0, %v926_v1, 0.0 }
 0x2ad   : > { %560 = vadd.xlane.f32.xlu0 %v559_v2 }
 0x2ae   : > { %v928_v3 = vpop.eup %927 }
 0x2af   : > { %v501_v5 = vsel %vm408_vm0, %v928_v3, 0.0  ;;  %v930_v6 = vpop.eup %929 }
 0x2b0   : > { %502 = vadd.xlane.f32.xlu2 %v501_v5  ;;  %v617_v7 = vsel %vm408_vm0, %v930_v6, 0.0  ;;  %v919_v5 = vld [vmem:[%s1135_s6] ss:$0 sm:$0xff] }
 0x2b8   : > { %618 = vadd.xlane.f32.xlu2 %v617_v7  ;;  %v508_v8 = vpop.permute.xlu1 %507  ;;  %v920_v7 = vld [vmem:[%s1136_s7] ss:$0 sm:$0xff] }
 0x2b9   : > { %v513_v9 = vsel %vm450_vm2, %v508_v8, 0 }
 0x2ba   : > { %522 = vmatpush.bf16.msra.mxu3 %v513_v9 }
 0x2c1   : > { %565 = vrot.lane.b32.xlu0 %v1055_v4, %s971_s24 }
 0x2d0   : > { %623 = vrot.lane.b32.xlu2 %v1055_v4, %s972_s25 }
 0x320   : > { %v561_v12 = vpop.xlane.xlu0 %560 }
 0x323   : > { %v503_v10 = vpop.xlane.xlu2 %502 }
 0x324   : > { %931 = vrcp.f32 %v503_v10 }
 0x32a   : > { %v932_v11 = vpop.eup %931 }
 0x32b   : > { %v619_v13 = vpop.xlane.xlu2 %618  ;;  %v505_v14 = vmul.f32 %v932_v11, %v928_v3 }
 0x32c   : > { %933 = vrcp.f32 %v619_v13 }
 0x32d   : > { %v506_v15 = vpack.c.bf16 %v505_v14, %v505_v14  ;;  %935 = vrcp.f32 %v561_v12 }
 0x32e   : > { %937 = vrcp.f32 %v976_v47 }
 0x32f   : > { %863 = vmatmul.msk.bf16.vlgmr.msra.gmra.mxu3 %vm408_vm0, %v506_v15 }
 0x332   : > { %v934_v16 = vpop.eup %933 }
 0x333   : > { %v621_v17 = vmul.f32 %v934_v16, %v930_v6  ;;  %v624_v18 = vpop.permute.xlu2 %623  ;;  %v566_v19 = vpop.permute.xlu0 %565 }
 0x334   : > { %v571_v4 = vsel %vm450_vm2, %v566_v19, 0  ;;  %v629_v20 = vsel %vm450_vm2, %v624_v18, 0  ;;  %v936_v22 = vpop.eup %935 }
 0x335   : > { %580 = vmatpush.bf16.msrb.mxu3 %v571_v4  ;;  %638 = vmatpush.bf16.msrb.mxu2 %v629_v20  ;;  %v622_v21 = vpack.c.bf16 %v621_v17, %v621_v17  ;;  %v563_v23 = vmul.f32 %v936_v22, %v926_v1  ;;  %v938_v48 = vpop.eup %937 }
 0x336   : > { %v707_v49 = vmul.f32 32.0, %v938_v48  ;;  %vm711_vm6 = vweird.f32 %v938_v48 }
 0x337   : > { %v564_v24 = vpack.c.bf16 %v563_v23, %v563_v23 }
 0x338   : > { %867 = vmatmul.msk.bf16.vlgmr.msrb.gmra.mxu2 %vm408_vm0, %v622_v21  ;;  %v708_v50 = vsub.f32 1.0, %v707_v49 }
 0x33a   : > { %v709_v51 = vmul.f32 %v938_v48, %v708_v50 }
 0x33c   : > { %v710_v52 = vadd.f32 %v938_v48, %v709_v51 }
 0x33e   : > { %v712_v53 = vsel %vm711_vm6, %v938_v48, %v710_v52 }
 0x33f   : > { %865 = vmatmul.msk.bf16.vlgmr.msrb.gmra.mxu3 %vm408_vm0, %v564_v24 }
 0x3b2   : > { %v524_v25 = vpop.f32.mrf.mxu3 }
 0x3b3   : > { %645 = vrot.lane.b32.xlu1 %v524_v25, %s973_s26 }
 0x3ba   : > { %v526_v26 = vpop.f32.mrf.mxu3 }
 0x3bb   : > { %v640_v27 = vpop.f32.mrf.mxu2 }
 0x3bc   : > { %653 = vrot.lane.b32.xlu1 %v640_v27, %s974_s9  ;;  %s390_s9 = scalar_lea.vmem %s1137_s8, %s858_s15 }
 0x3c2   : > { %v582_v28 = vpop.f32.mrf.mxu3 }
 0x3c3   : > { %v642_v29 = vpop.f32.mrf.mxu2  ;;  %649 = vrot.lane.b32.xlu0 %v582_v28, %s975_s10 }
 0x3ca   : > { %v584_v30 = vpop.f32.mrf.mxu3 }
 0x425   : > { %v646_v33 = vpop.permute.xlu1 %645 }
 0x426   : > { %v656_v34 = vsel %vm408_vm0, %v1072_v44, %v646_v33 }
 0x42e   : > { %v654_v36 = vpop.permute.xlu1 %653 }
 0x435   : > { %v650_v35 = vpop.permute.xlu0 %649 }
 0x436   : > { %v658_v37 = vsel %vm657_vm3, %v656_v34, %v650_v35 }
 0x437   : > { %v660_v38 = vsel %vm659_vm4, %v658_v37, %v654_v36 }
 0x438   : > { %v661_v39 = vpack.c.bf16 %v660_v38, %v660_v38 }
 0x43a   : > { %876 = vmatmul.msk.bf16.vlgmr.msra.gmra.mxu1 %vm682_vm5, %v661_v39 }
 0x4b7   : > { %v695_v41 = vpop.f32.mrf.mxu1 }
 0x4b8   : > { %v696_v43 = vadd.f32 %v918_v40, %v695_v41 }
 0x4ba   : > { %v700_v44 = vadd.f32 %v699_v42, %v696_v43 }
 0x4bc   : > { %v703_v45 = vsel %vm682_vm5, %v700_v44, 0.0 }
 0x4bd   : > { %704 = vadd.xlane.f32.xlu2 %v703_v45 }
 0x4bf   : > { %v697_v46 = vpop.f32.mrf.mxu1 }
 0x530   : > { %v705_v54 = vpop.xlane.xlu2 %704 }
 0x531   : > { %v713_v55 = vmul.f32 %v712_v53, %v705_v54 }
 0x533   : > { %v714_v56 = vsub.f32 %v700_v44, %v713_v55 }
 0x535   : > { %v715_v57 = vmul.f32 %v714_v56, %v714_v56 }
 0x537   : > { %v716_v58 = vsel %vm682_vm5, %v715_v57, 0.0 }
 0x538   : > { %717 = vadd.xlane.f32.xlu0 %v716_v58 }
 0x5ab   : > { %v718_v59 = vpop.xlane.xlu0 %717 }
 0x5ac   : > { %v719_v60 = vmul.f32 %v718_v59, %v712_v53 }
 0x5ae   : > { %v720_v61 = vadd.f32 1e-05, %v719_v60 }
 0x5b0   : > { %939 = vrsqrt.f32 %v720_v61  ;;  %vm727_vm8 = vweird.f32 %v720_v61 }
 0x5b6   : > { %v940_v62 = vpop.eup %939 }
 0x5b7   : > { %v722_v63 = vmul.f32 %v940_v62, %v720_v61  ;;  %vm728_vm7 = vweird.f32 %v940_v62 }
 0x5b8   : > { %vm729_vm9 = vmor %vm727_vm8, %vm728_vm7 }
 0x5b9   : > { %v723_v0 = vmul.f32 %v940_v62, %v722_v63 }
 0x5bb   : > { %v724_v1 = vmul.f32 0.5, %v723_v0 }
 0x5bd   : > { %v725_v2 = vsub.f32 1.5, %v724_v1 }
 0x5bf   : > { %v726_v3 = vmul.f32 %v940_v62, %v725_v2 }
 0x5c1   : > { %v730_v6 = vsel %vm729_vm9, %v940_v62, %v726_v3 }
 0x5c2   : > { %v731_v8 = vmul.f32 %v730_v6, %v714_v56 }
 0x5c4   : > { %v735_v9 = vmul.f32 %v919_v5, %v731_v8 }
 0x5c6   : > { %v739_v10 = vadd.f32 %v920_v7, %v735_v9 }
 0x5c8   : > { %740 = vst.msk [vmem:[%s390_s9] sm:$0xff] %vm682_vm5, %v739_v10 }
 0x5c9 PF: > { %s18_s29 = sadd.s32 1, %s963_s29   ;;  %s1138_s27 = smov %s959_s28 }
 0x5ca   : > { %p15_p5 = scmp.ge.s32.totalorder %s18_s29, 4   ;;  %s1139_s28 = smov %s1141_s30 }
 0x5cc   :  { %17 = sbr.rel (!%p15_p5) target bundleno = 2 (0x2), region = 91 }

// kernel: transformer_forward.31
= control target key start
LH: loop header
LB: loop body
LE: loop exit
PB: predicated region body
PF: predicated region fallthrough
CT: control target
= control target key end

     0   :  { %vm38_vm0 = vcmask 261120   ;;  %vm58_vm1 = vcmask 257024   ;;  %s118_s1 = inlined_call_operand.vmem [shape: bf16[32,32], index: 1, kind: input, shape index: {}]   ;;  %s119_s0 = inlined_call_operand.vmem [shape: f32[16,32], index: 0, kind: input, shape index: {}]   ;;  %s120_s2 = inlined_call_operand.vmem [shape: f32[1,32], index: 2, kind: input, shape index: {}]   ;;  %s121_s3 = inlined_call_operand.vmem [shape: bf16[16,32], index: 3, kind: output, shape index: {}]  }
   0x1   :  { %v75_v0 = vld [vmem:[%s118_s1 + $0x8] sm:$0xff]  ;;  %v74_v1 = vld [vmem:[%s118_s1] sm:$0xff] }
   0x2   :  { %48 = vmatpush.bf16.msra.mxu0 %v75_v0  ;;  %v15_v2 = vld [vmem:[%s119_s0] sm:$0xff]  ;;  %v16_v3 = vld [vmem:[%s119_s0 + $0x8] sm:$0xff] }
   0x3   :  { %v17_v4 = vpack.c.bf16 %v16_v3, %v15_v2  ;;  %v76_v5 = vld [vmem:[%s120_s2] ss:$0 sm:$0xff] }
   0x6   :  { %49 = vmatpush.bf16.msra.mxu0 %v74_v1 }
   0x9   :  { %73 = vmatmul.msk.bf16.vlgmr.msra.gmra.mxu0 %vm38_vm0, %v17_v4 }
  0x86   :  { %v51_v6 = vpop.f32.mrf.mxu0 }
  0x87   :  { %v52_v7 = vadd.f32 %v76_v5, %v51_v6 }
  0x89   :  { %v56_v8 = vpack.c.bf16 %v52_v7, %v52_v7 }
  0x8b   :  { %59 = vst.msk [vmem:[%s121_s3] sm:$0xf] %vm58_vm1, %v56_v8 }
  0x8e   :  { %v53_v9 = vpop.f32.mrf.mxu0 }
  0x8f   :  { %v54_v10 = vadd.f32 %v76_v5, %v53_v9 }
  0x91   :  { %v57_v11 = vpack.c.bf16 %v54_v10, %v54_v10 }
  0x93   :  { %60 = vst.msk [vmem:[%s121_s3 + $0x4] sm:$0xf] %vm58_vm1, %v57_v11 }

// kernel: transformer_forward.24
= control target key start
LH: loop header
LB: loop body
LE: loop exit
PB: predicated region body
PF: predicated region fallthrough
CT: control target
= control target key end

     0   :  { %s1010_s27 = smov 0   ;;  %s1012_s28 = smov 0   ;;  %s1117_s0 = inlined_call_operand.vmem [shape: bf16[2,8,32], index: 0, kind: input, shape index: {}]   ;;  %s1118_s1 = inlined_call_operand.vmem [shape: bf16[2,8,64], index: 1, kind: input, shape index: {}]   ;;  %s1119_s2 = inlined_call_operand.vmem [shape: f32[2,1,8], index: 2, kind: input, shape index: {}]   ;;  %s1120_s3 = inlined_call_operand.vmem [shape: f32[2,8,32], index: 3, kind: input, shape index: {}]   ;;  %s1121_s4 = inlined_call_operand.vmem [shape: bf16[32,32], index: 4, kind: input, shape index: {}]   ;;  %s1122_s5 = inlined_call_operand.vmem [shape: f32[1,32], index: 5, kind: input, shape index: {}]   ;;  %s1123_s6 = inlined_call_operand.vmem [shape: f32[1,32], index: 6, kind: input, shape index: {}]   ;;  %s1124_s7 = inlined_call_operand.vmem [shape: f32[1,32], index: 7, kind: input, shape index: {}]   ;;  %s1125_s8 = inlined_call_operand.vmem [shape: f32[2,8,32], index: 8, kind: output, shape index: {}]  }
   0x1   :  { %s1014_s29 = smov 0  }
   0x2 LB: > { %s30_s30 = sadd.s32 1, %s948_s28  ;;  %p845_p0 = scmp.ge.s32.totalorder %s952_s29, 1  ;;  %s952_s29 = sphi %s1014_s29, %s18_s29   ;;  %s948_s28 = sphi %s1012_s28, %s1127_s28   ;;  %s944_s27 = sphi %s1010_s27, %s1126_s27  }
   0x3   : > { %p32_p1 = scmp.ge.s32.totalorder %s30_s30, 2  ;;  %p311_p2 = scmp.lt.s32.totalorder %s952_s29, 3 }
   0x5   : > { %s1129_s30 = smov (%p32_p1, %s30_s30), 0  ;;  %p312_p3 = pnand %p845_p0, %p311_p2 }
   0x6   : > { %p363_p4 = scmp.lt.s32.totalorder (!%p312_p3), %s944_s27, 1  ;;  %s954_s19 = smov (!%p312_p3), 96  }
   0x7   : > { %315 = sbr.rel (%p312_p3) target bundleno = 1481 (0x5c9), region = 52  ;;  %s955_s20 = smov (!%p312_p3), 112  }
   0x8   : > { %s956_s21 = smov (!%p312_p3), 104   ;;  %s957_s22 = smov (!%p312_p3), 120  }
   0x9   : > { %s958_s23 = smov (!%p312_p3), 88   ;;  %s959_s24 = smov (!%p312_p3), 80  }
   0xa   : > { %s960_s25 = smov (!%p312_p3), 72   ;;  %s961_s26 = smov (!%p312_p3), 8  }
   0xb   : > { %s963_s10 = smov (!%p312_p3), 16  }
   0xc   : > { %s1131_s27 = smov (!%p363_p4, %s944_s27), 1  ;;  %vm395_vm0 = vcmask 64512   ;;  %vm440_vm1 = vcmask 1043456   ;;  %vm647_vm2 = vcmask 130048   ;;  %vm649_vm3 = vcmask 195584  }
   0xd   : > { %s846_s9 = sshll.u32 %s1131_s27, 2  ;;  %s376_s18 = scalar_lea.vmem %s1119_s2, %s1131_s27  ;;  %vm672_vm4 = vcmask 261120  }
   0xe   : > { %s373_s12 = scalar_lea.vmem %s1118_s1, %s846_s9  ;;  %s369_s15 = scalar_lea.vmem %s1117_s0, %s846_s9  ;;  %v906_v7 = vld [vmem:[%s376_s18] ss:$0 sm:$0xff] }
   0xf   : > { %v393_v0 = vld [vmem:[%s373_s12] sm:$0xf]  ;;  %s962_s9 = smov 24  }
  0x10   : > { %v400_v1 = vsel %vm395_vm0, %v393_v0, 0  ;;  %v392_v2 = vld [vmem:[%s369_s15] sm:$0xf]  ;;  %v433_v3 = vunpack.c.l.b16 %v393_v0  ;;  %s848_s15 = sshll.u32 %s1131_s27, 3 }
  0x11   : > { %409 = vmatpush.bf16.xpose.msra.mxu0 %v400_v1  ;;  %v458_v5 = vunpack.c.l.b16 %v392_v2 }
  0x12   : > { %v1043_v4 = vpack.c.b16 %v433_v3, %v433_v3 }
  0x13   : > { %v459_v6 = vpack.c.b16 %v458_v5, %v458_v5 }
  0x14   : > { %435 = vrot.lane.b32.xlu2 %v1043_v4, %s954_s19 }
  0x18   : > { %850 = vmatmul.msk.bf16.vlgmr.msra.gmra.mxu0 %vm395_vm0, %v392_v2 }
  0x1c   : > { %520 = vrot.lane.b32.xlu2 %v1043_v4, %s955_s20 }
  0x24   : > { %578 = vrot.lane.b32.xlu2 %v1043_v4, %s956_s21 }
  0x2c   : > { %518 = vrot.lane.b32.xlu2 %v459_v6, %s955_s20  ;;  %s383_s20 = scalar_lea.vmem %s1120_s3, %s848_s15 }
  0x6e   : > { %v436_v13 = vpop.permute.xlu2 %435 }
  0x6f   : > { %v442_v24 = vsel %vm440_vm1, %v436_v13, 0 }
  0x70   : > { %451 = vmatpush.bf16.msra.mxu1 %v442_v24 }
  0x76   : > { %v521_v14 = vpop.permute.xlu2 %520 }
  0x77   : > { %v526_v25 = vsel %vm395_vm0, %v521_v14, 0 }
  0x78   : > { %535 = vmatpush.bf16.xpose.msrb.mxu1 %v526_v25  ;;  %v870_v25 = vld [vmem:[%s1121_s4 + $0x8] sm:$0xff] }
  0x7e   : > { %v579_v18 = vpop.permute.xlu2 %578 }
  0x7f   : > { %v584_v19 = vsel %vm395_vm0, %v579_v18, 0 }
  0x80   : > { %593 = vmatpush.bf16.xpose.msrb.mxu0 %v584_v19 }
  0x86   : > { %v519_v32 = vpop.permute.xlu2 %518 }
  0x95   : > { %v411_v8 = vpop.f32.mrf.mxu0 }
  0x96   : > { %v415_v9 = vmul.f32 0.35355338, %v411_v8 }
  0x98   : > { %v419_v10 = vadd.f32 %v906_v7, %v415_v9 }
  0x9a   : > { %v420_v11 = vsel %vm395_vm0, %v419_v10, -inf }
  0x9b   : > { %421 = vmax.xlane.f32.xlu0 %v420_v11 }
  0x9d   : > { %v413_v12 = vpop.f32.mrf.mxu0 }
  0xaf   : > { %462 = vrot.lane.b32.xlu0 %v1043_v4, %s957_s22 }
  0xb7   : > { %576 = vrot.lane.b32.xlu0 %v459_v6, %s956_s21 }
 0x10e   : > { %v422_v15 = vpop.xlane.xlu0 %421 }
 0x10f   : > { %v423_v16 = vsub.f32 %v419_v10, %v422_v15 }
 0x111   : > { %v424_v17 = vmul.f32 1.442695, %v423_v16 }
 0x113   : > { %910 = vpow2.f32 %v424_v17 }
 0x119   : > { %v911_v20 = vpop.eup %910 }
 0x11a   : > { %v426_v21 = vsel %vm395_vm0, %v911_v20, 0.0 }
 0x11b   : > { %427 = vadd.xlane.f32.xlu1 %v426_v21 }
 0x121   : > { %v463_v22 = vpop.permute.xlu0 %462 }
 0x122   : > { %v468_v26 = vsel %vm395_vm0, %v463_v22, 0 }
 0x123   : > { %477 = vmatpush.bf16.xpose.msra.mxu2 %v468_v26  ;;  %v869_v26 = vld [vmem:[%s1121_s4] sm:$0xff] }
 0x129   : > { %v577_v23 = vpop.permute.xlu0 %576 }
 0x12a   : > { %856 = vmatmul.msk.bf16.vlgmr.msrb.gmra.mxu0 %vm395_vm0, %v577_v23 }
 0x134   : > { %460 = vrot.lane.b32.xlu1 %v459_v6, %s957_s22 }
 0x18e   : > { %v428_v27 = vpop.xlane.xlu1 %427 }
 0x18f   : > { %912 = vrcp.f32 %v428_v27 }
 0x195   : > { %v913_v28 = vpop.eup %912 }
 0x196   : > { %v430_v29 = vmul.f32 %v913_v28, %v911_v20 }
 0x198   : > { %v431_v30 = vpack.c.bf16 %v430_v29, %v430_v29 }
 0x19a   : > { %851 = vmatmul.msk.bf16.vlgmr.msra.gmra.mxu1 %vm395_vm0, %v431_v30 }
 0x19b   : > { %682 = vmatpush.bf16.msra.mxu1 %v870_v25 }
 0x19f   : > { %683 = vmatpush.bf16.msra.mxu1 %v869_v26 }
 0x1a6   : > { %v461_v31 = vpop.permute.xlu1 %460 }
 0x1a7   : > { %852 = vmatmul.msk.bf16.vlgmr.msra.gmra.mxu2 %vm395_vm0, %v461_v31  ;;  %v595_v33 = vpop.f32.mrf.mxu0 }
 0x1a8   : > { %v599_v34 = vmul.f32 0.35355338, %v595_v33 }
 0x1aa   : > { %854 = vmatmul.msk.bf16.vlgmr.msrb.gmra.mxu1 %vm395_vm0, %v519_v32  ;;  %v600_v35 = vadd.f32 %v906_v7, %v599_v34  ;;  %v907_v34 = vld [vmem:[%s1122_s5] ss:$0 sm:$0xff] }
 0x1ac   : > { %v601_v36 = vsel %vm395_vm0, %v600_v35, -inf }
 0x1ad   : > { %602 = vmax.xlane.f32.xlu0 %v601_v36  ;;  %v689_v36 = vld [vmem:[%s383_s20] sm:$0xff] }
 0x1af   : > { %v597_v37 = vpop.f32.mrf.mxu0 }
 0x217   : > { %v1060_v38 = vpop.f32.mrf.mxu1 }
 0x21f   : > { %v455_v39 = vpop.f32.mrf.mxu1 }
 0x220   : > { %v603_v52 = vpop.xlane.xlu0 %602 }
 0x221   : > { %v604_v56 = vsub.f32 %v600_v35, %v603_v52 }
 0x223   : > { %v605_v58 = vmul.f32 1.442695, %v604_v56 }
 0x227   : > { %v537_v40 = vpop.f32.mrf.mxu1 }
 0x228   : > { %v541_v41 = vmul.f32 0.35355338, %v537_v40 }
 0x22a   : > { %v479_v42 = vpop.f32.mrf.mxu2  ;;  %v542_v43 = vadd.f32 %v906_v7, %v541_v41  ;;  %v964_v41 = vmov 32.0  }
 0x22b   : > { %v483_v44 = vmul.f32 0.35355338, %v479_v42 }
 0x22c   : > { %v543_v45 = vsel %vm395_vm0, %v542_v43, -inf }
 0x22d   : > { %544 = vmax.xlane.f32.xlu1 %v543_v45  ;;  %v484_v46 = vadd.f32 %v906_v7, %v483_v44 }
 0x22f   : > { %v539_v47 = vpop.f32.mrf.mxu1  ;;  %v485_v48 = vsel %vm395_vm0, %v484_v46, -inf }
 0x230   : > { %486 = vmax.xlane.f32.xlu2 %v485_v48 }
 0x232   : > { %v481_v49 = vpop.f32.mrf.mxu2 }
 0x246   : > { %497 = vrot.lane.b32.xlu1 %v1043_v4, %s958_s23 }
 0x2a0   : > { %v545_v50 = vpop.xlane.xlu1 %544 }
 0x2a1   : > { %v546_v51 = vsub.f32 %v542_v43, %v545_v50 }
 0x2a3   : > { %v547_v53 = vmul.f32 1.442695, %v546_v51  ;;  %v487_v54 = vpop.xlane.xlu2 %486 }
 0x2a4   : > { %v488_v55 = vsub.f32 %v484_v46, %v487_v54 }
 0x2a5   : > { %914 = vpow2.f32 %v547_v53 }
 0x2a6   : > { %v489_v57 = vmul.f32 1.442695, %v488_v55 }
 0x2a8   : > { %916 = vpow2.f32 %v489_v57 }
 0x2a9   : > { %918 = vpow2.f32 %v605_v58 }
 0x2ab   : > { %v915_v59 = vpop.eup %914 }
 0x2ac   : > { %v549_v60 = vsel %vm395_vm0, %v915_v59, 0.0 }
 0x2ad   : > { %550 = vadd.xlane.f32.xlu0 %v549_v60 }
 0x2ae   : > { %v917_v61 = vpop.eup %916 }
 0x2af   : > { %v491_v62 = vsel %vm395_vm0, %v917_v61, 0.0  ;;  %v919_v63 = vpop.eup %918 }
 0x2b0   : > { %492 = vadd.xlane.f32.xlu2 %v491_v62  ;;  %v607_v0 = vsel %vm395_vm0, %v919_v63, 0.0  ;;  %v908_v62 = vld [vmem:[%s1123_s6] ss:$0 sm:$0xff] }
 0x2b8   : > { %608 = vadd.xlane.f32.xlu2 %v607_v0  ;;  %v498_v1 = vpop.permute.xlu1 %497  ;;  %v909_v0 = vld [vmem:[%s1124_s7] ss:$0 sm:$0xff] }
 0x2b9   : > { %v503_v2 = vsel %vm440_vm1, %v498_v1, 0 }
 0x2ba   : > { %512 = vmatpush.bf16.msra.mxu3 %v503_v2 }
 0x2c1   : > { %555 = vrot.lane.b32.xlu0 %v1043_v4, %s959_s24 }
 0x2d0   : > { %613 = vrot.lane.b32.xlu2 %v1043_v4, %s960_s25 }
 0x320   : > { %v551_v6 = vpop.xlane.xlu0 %550 }
 0x323   : > { %v493_v3 = vpop.xlane.xlu2 %492 }
 0x324   : > { %920 = vrcp.f32 %v493_v3 }
 0x32a   : > { %v921_v5 = vpop.eup %920 }
 0x32b   : > { %v609_v7 = vpop.xlane.xlu2 %608  ;;  %v495_v8 = vmul.f32 %v921_v5, %v917_v61 }
 0x32c   : > { %922 = vrcp.f32 %v609_v7 }
 0x32d   : > { %v496_v9 = vpack.c.bf16 %v495_v8, %v495_v8  ;;  %924 = vrcp.f32 %v551_v6 }
 0x32e   : > { %926 = vrcp.f32 %v964_v41 }
 0x32f   : > { %853 = vmatmul.msk.bf16.vlgmr.msra.gmra.mxu3 %vm395_vm0, %v496_v9 }
 0x332   : > { %v923_v10 = vpop.eup %922 }
 0x333   : > { %v611_v11 = vmul.f32 %v923_v10, %v919_v63  ;;  %v614_v12 = vpop.permute.xlu2 %613  ;;  %v556_v13 = vpop.permute.xlu0 %555 }
 0x334   : > { %v561_v4 = vsel %vm440_vm1, %v556_v13, 0  ;;  %v619_v14 = vsel %vm440_vm1, %v614_v12, 0  ;;  %v925_v16 = vpop.eup %924 }
 0x335   : > { %570 = vmatpush.bf16.msrb.mxu3 %v561_v4  ;;  %628 = vmatpush.bf16.msrb.mxu2 %v619_v14  ;;  %v612_v15 = vpack.c.bf16 %v611_v11, %v611_v11  ;;  %v553_v17 = vmul.f32 %v925_v16, %v915_v59  ;;  %v927_v42 = vpop.eup %926 }
 0x336   : > { %v697_v43 = vmul.f32 32.0, %v927_v42  ;;  %vm701_vm5 = vweird.f32 %v927_v42 }
 0x337   : > { %v554_v18 = vpack.c.bf16 %v553_v17, %v553_v17 }
 0x338   : > { %857 = vmatmul.msk.bf16.vlgmr.msrb.gmra.mxu2 %vm395_vm0, %v612_v15  ;;  %v698_v44 = vsub.f32 1.0, %v697_v43 }
 0x33a   : > { %v699_v45 = vmul.f32 %v927_v42, %v698_v44 }
 0x33c   : > { %v700_v46 = vadd.f32 %v927_v42, %v699_v45 }
 0x33e   : > { %v702_v47 = vsel %vm701_vm5, %v927_v42, %v700_v46 }
 0x33f   : > { %855 = vmatmul.msk.bf16.vlgmr.msrb.gmra.mxu3 %vm395_vm0, %v554_v18 }
 0x3b2   : > { %v514_v19 = vpop.f32.mrf.mxu3 }
 0x3b3   : > { %635 = vrot.lane.b32.xlu1 %v514_v19, %s961_s26 }
 0x3ba   : > { %v516_v20 = vpop.f32.mrf.mxu3 }
 0x3bb   : > { %v630_v21 = vpop.f32.mrf.mxu2 }
 0x3bc   : > { %643 = vrot.lane.b32.xlu1 %v630_v21, %s962_s9  ;;  %s390_s9 = scalar_lea.vmem %s1125_s8, %s848_s15 }
 0x3c2   : > { %v572_v22 = vpop.f32.mrf.mxu3 }
 0x3c3   : > { %v632_v23 = vpop.f32.mrf.mxu2  ;;  %639 = vrot.lane.b32.xlu0 %v572_v22, %s963_s10 }
 0x3ca   : > { %v574_v24 = vpop.f32.mrf.mxu3 }
 0x425   : > { %v636_v27 = vpop.permute.xlu1 %635 }
 0x426   : > { %v646_v28 = vsel %vm395_vm0, %v1060_v38, %v636_v27 }
 0x42e   : > { %v644_v30 = vpop.permute.xlu1 %643 }
 0x435   : > { %v640_v29 = vpop.permute.xlu0 %639 }
 0x436   : > { %v648_v31 = vsel %vm647_vm2, %v646_v28, %v640_v29 }
 0x437   : > { %v650_v32 = vsel %vm649_vm3, %v648_v31, %v644_v30 }
 0x438   : > { %v651_v33 = vpack.c.bf16 %v650_v32, %v650_v32 }
 0x43a   : > { %866 = vmatmul.msk.bf16.vlgmr.msra.gmra.mxu1 %vm672_vm4, %v651_v33 }
 0x4b7   : > { %v685_v35 = vpop.f32.mrf.mxu1 }
 0x4b8   : > { %v686_v37 = vadd.f32 %v907_v34, %v685_v35 }
 0x4ba   : > { %v690_v38 = vadd.f32 %v689_v36, %v686_v37 }
 0x4bc   : > { %v693_v39 = vsel %vm672_vm4, %v690_v38, 0.0 }
 0x4bd   : > { %694 = vadd.xlane.f32.xlu2 %v693_v39 }
 0x4bf   : > { %v687_v40 = vpop.f32.mrf.mxu1 }
 0x530   : > { %v695_v48 = vpop.xlane.xlu2 %694 }
 0x531   : > { %v703_v49 = vmul.f32 %v702_v47, %v695_v48 }
 0x533   : > { %v704_v50 = vsub.f32 %v690_v38, %v703_v49 }
 0x535   : > { %v705_v51 = vmul.f32 %v704_v50, %v704_v50 }
 0x537   : > { %v706_v52 = vsel %vm672_vm4, %v705_v51, 0.0 }
 0x538   : > { %707 = vadd.xlane.f32.xlu0 %v706_v52 }
 0x5ab   : > { %v708_v53 = vpop.xlane.xlu0 %707 }
 0x5ac   : > { %v709_v54 = vmul.f32 %v708_v53, %v702_v47 }
 0x5ae   : > { %v710_v55 = vadd.f32 1e-05, %v709_v54 }
 0x5b0   : > { %928 = vrsqrt.f32 %v710_v55  ;;  %vm717_vm7 = vweird.f32 %v710_v55 }
 0x5b6   : > { %v929_v56 = vpop.eup %928 }
 0x5b7   : > { %v712_v57 = vmul.f32 %v929_v56, %v710_v55  ;;  %vm718_vm6 = vweird.f32 %v929_v56 }
 0x5b8   : > { %vm719_vm8 = vmor %vm717_vm7, %vm718_vm6 }
 0x5b9   : > { %v713_v58 = vmul.f32 %v929_v56, %v712_v57 }
 0x5bb   : > { %v714_v59 = vmul.f32 0.5, %v713_v58 }
 0x5bd   : > { %v715_v60 = vsub.f32 1.5, %v714_v59 }
 0x5bf   : > { %v716_v61 = vmul.f32 %v929_v56, %v715_v60 }
 0x5c1   : > { %v720_v63 = vsel %vm719_vm8, %v929_v56, %v716_v61 }
 0x5c2   : > { %v721_v1 = vmul.f32 %v720_v63, %v704_v50 }
 0x5c4   : > { %v725_v2 = vmul.f32 %v908_v62, %v721_v1 }
 0x5c6   : > { %v729_v3 = vadd.f32 %v909_v0, %v725_v2 }
 0x5c8   : > { %730 = vst.msk [vmem:[%s390_s9] sm:$0xff] %vm672_vm4, %v729_v3 }
 0x5c9 PF: > { %s18_s29 = sadd.s32 1, %s952_s29   ;;  %s1126_s27 = smov %s948_s28 }
 0x5ca   : > { %p15_p5 = scmp.ge.s32.totalorder %s18_s29, 4   ;;  %s1127_s28 = smov %s1129_s30 }
 0x5cc   :  { %17 = sbr.rel (!%p15_p5) target bundleno = 2 (0x2), region = 91 }

// kernel: transformer_forward.32
= control target key start
LH: loop header
LB: loop body
LE: loop exit
PB: predicated region body
PF: predicated region fallthrough
CT: control target
= control target key end

     0   :  { %vm38_vm0 = vcmask 261120   ;;  %vm58_vm1 = vcmask 519168   ;;  %s118_s1 = inlined_call_operand.vmem [shape: bf16[32,64], index: 1, kind: input, shape index: {}]   ;;  %s119_s0 = inlined_call_operand.vmem [shape: f32[16,32], index: 0, kind: input, shape index: {}]   ;;  %s120_s2 = inlined_call_operand.vmem [shape: f32[1,64], index: 2, kind: input, shape index: {}]   ;;  %s121_s3 = inlined_call_operand.vmem [shape: bf16[16,64], index: 3, kind: output, shape index: {}]  }
   0x1   :  { %v75_v0 = vld [vmem:[%s118_s1 + $0x8] sm:$0xff]  ;;  %v74_v1 = vld [vmem:[%s118_s1] sm:$0xff] }
   0x2   :  { %48 = vmatpush.bf16.msra.mxu0 %v75_v0  ;;  %v15_v2 = vld [vmem:[%s119_s0] sm:$0xff]  ;;  %v16_v3 = vld [vmem:[%s119_s0 + $0x8] sm:$0xff] }
   0x3   :  { %v17_v4 = vpack.c.bf16 %v16_v3, %v15_v2  ;;  %v76_v5 = vld [vmem:[%s120_s2] ss:$0 sm:$0xff] }
   0x6   :  { %49 = vmatpush.bf16.msra.mxu0 %v74_v1 }
   0x9   :  { %73 = vmatmul.msk.bf16.vlgmr.msra.gmra.mxu0 %vm38_vm0, %v17_v4 }
  0x86   :  { %v51_v6 = vpop.f32.mrf.mxu0 }
  0x87   :  { %v52_v7 = vadd.f32 %v76_v5, %v51_v6 }
  0x89   :  { %v56_v8 = vpack.c.bf16 %v52_v7, %v52_v7 }
  0x8b   :  { %59 = vst.msk [vmem:[%s121_s3] sm:$0xf] %vm58_vm1, %v56_v8 }
  0x8e   :  { %v53_v9 = vpop.f32.mrf.mxu0 }
  0x8f   :  { %v54_v10 = vadd.f32 %v76_v5, %v53_v9 }
  0x91   :  { %v57_v11 = vpack.c.bf16 %v54_v10, %v54_v10 }
  0x93   :  { %60 = vst.msk [vmem:[%s121_s3 + $0x4] sm:$0xf] %vm58_vm1, %v57_v11 }

// kernel: transformer_forward.41
= control target key start
LH: loop header
LB: loop body
LE: loop exit
PB: predicated region body
PF: predicated region fallthrough
CT: control target
= control target key end

     0   :  { %s159_s0 = inlined_call_operand.vmem [shape: f32[16,32], index: 0, kind: input, shape index: {}]   ;;  %s160_s1 = inlined_call_operand.vmem [shape: bf16[32,128], index: 1, kind: input, shape index: {}]   ;;  %s161_s2 = inlined_call_operand.vmem [shape: f32[1,128], index: 2, kind: input, shape index: {}]   ;;  %s162_s3 = inlined_call_operand.hbm [shape: f32[16,128], index: 3, kind: output, shape index: {}]  }
   0x1   :  { %v87_v0 = vld [vmem:[%s160_s1 + $0x8] sm:$0xff]  ;;  %v86_v1 = vld [vmem:[%s160_s1] sm:$0xff] }
   0x2   :  { %49 = vmatpush.bf16.msra.mxu0 %v87_v0  ;;  %v16_v2 = vld [vmem:[%s159_s0] sm:$0xff]  ;;  %v17_v3 = vld [vmem:[%s159_s0 + $0x8] sm:$0xff] }
   0x3   :  { %8 = vsyncpa [#allocation3], 0  ;;  %v18_v4 = vpack.c.bf16 %v17_v3, %v16_v2  ;;  %vm39_vm0 = vcmask 261120   ;;  %v91_v5 = vld [vmem:[%s161_s2] ss:$0 sm:$0xff]  ;;  %s118_s1 = smov [#allocation2]  }
   0x4   :  { %s63_s22 = sshll.u32 %s118_s1, 4  ;;  %s65_s25 = sshll.u32 %s162_s3, 4  ;;  %s64_s22 = int_to_ptr.vmem [resolvable:$true] %s63_s22  ;;  %s66_s25 = int_to_ptr.hbm [resolvable:$true] %s65_s25 }
   0x5   :  { %s119_s0 = smov 128   ;;  %s120_s26 = smov 8  }
   0x6   :  { %50 = vmatpush.bf16.msra.mxu0 %v86_v1 }
   0x9   :  { %85 = vmatmul.msk.bf16.vlgmr.msra.gmra.mxu0 %vm39_vm0, %v18_v4 }
  0x86   :  { %v52_v6 = vpop.f32.mrf.mxu0 }
  0x87   :  { %v53_v7 = vadd.f32 %v91_v5, %v52_v6 }
  0x89   :  { %57 = vst [vmem:[#allocation2] sm:$0xff] %v53_v7 }
  0x8e   :  { %v54_v8 = vpop.f32.mrf.mxu0 }
  0x8f   :  { %v55_v9 = vadd.f32 %v91_v5, %v54_v8 }
  0x91   :  { %58 = vst [vmem:[#allocation2 + $0x8] sm:$0xff] %v55_v9 }
  0x92   :  { %71 = dma.vmem_to_hbm [thread:$0]  %s64_s22, 256, %s66_s25, [#allocation3], %s119_s0, %s119_s0, %s120_s26  }
  0x93   :  { %116 = dma.done.wait [#allocation3], 256  }
  0x94   :  { %117 = vsyncadd [#allocation3], 4294967040 }
  0x95   :  { %76 = vsyncpa [#allocation3], 1 }

// kernel: transformer_forward.25
= control target key start
LH: loop header
LB: loop body
LE: loop exit
PB: predicated region body
PF: predicated region fallthrough
CT: control target
= control target key end

     0   :  { %vm258_vm0 = vcmask 261120   ;;  %s3395_s1 = inlined_call_operand.vmem [shape: bf16[32,2048], index: 1, kind: input, shape index: {}]   ;;  %s3396_s0 = inlined_call_operand.vmem [shape: f32[16,32], index: 0, kind: input, shape index: {}]   ;;  %s3397_s3 = inlined_call_operand.vmem [shape: bf16[2048,32], index: 3, kind: input, shape index: {}]   ;;  %s3398_s4 = inlined_call_operand.vmem [shape: f32[1,32], index: 4, kind: input, shape index: {}]   ;;  %s3399_s2 = inlined_call_operand.vmem [shape: f32[1,2048], index: 2, kind: input, shape index: {}]   ;;  %s3400_s5 = inlined_call_operand.vmem [shape: f32[1,32], index: 5, kind: input, shape index: {}]   ;;  %s3401_s6 = inlined_call_operand.vmem [shape: f32[1,32], index: 6, kind: input, shape index: {}]   ;;  %s3402_s7 = inlined_call_operand.vmem [shape: f32[16,32], index: 7, kind: output, shape index: {}]  }
   0x1   :  { %v1923_v0 = vld [vmem:[%s3395_s1 + $0x80] sm:$0xf]  ;;  %v2529_v2 = vld [vmem:[%s3395_s1 + $0x84] sm:$0xf]  ;;  %v1931_v5 = vld [vmem:[%s3395_s1 + $0x88] sm:$0xf] }
   0x2   :  { %v2537_v1 = vld [vmem:[%s3395_s1 + $0xbc] sm:$0xf0]  ;;  %v1925_v4 = vld [vmem:[%s3395_s1 + $0xc0] sm:$0xf0]  ;;  %v2538_v6 = vld [vmem:[%s3395_s1 + $0xc4] sm:$0xf0] }
   0x3   :  { %v1924_v3 = vor.u32 %v2537_v1, %v1923_v0  ;;  %v1928_v7 = vor.u32 %v2529_v2, %v1925_v4  ;;  %v1932_v8 = vor.u32 %v2538_v6, %v1931_v5  ;;  %v2530_v9 = vld [vmem:[%s3395_s1 + $0x8c] sm:$0xf]  ;;  %v1859_v11 = vld [vmem:[%s3395_s1] sm:$0xf]  ;;  %v2513_v14 = vld [vmem:[%s3395_s1 + $0x4] sm:$0xf] }
   0x4   :  { %v1933_v10 = vld [vmem:[%s3395_s1 + $0xc8] sm:$0xf0]  ;;  %v2521_v13 = vld [vmem:[%s3395_s1 + $0x3c] sm:$0xf0]  ;;  %v1861_v15 = vld [vmem:[%s3395_s1 + $0x40] sm:$0xf0] }
   0x5   :  { %268 = vmatpush.bf16.msra.mxu0 %v1924_v3  ;;  %v1936_v12 = vor.u32 %v2530_v9, %v1933_v10  ;;  %282 = vmatpush.bf16.msra.mxu1 %v1928_v7  ;;  %v1860_v16 = vor.u32 %v2521_v13, %v1859_v11  ;;  %v1864_v17 = vor.u32 %v2513_v14, %v1861_v15  ;;  %v1867_v18 = vld [vmem:[%s3395_s1 + $0x8] sm:$0xf]  ;;  %v2514_v20 = vld [vmem:[%s3395_s1 + $0xc] sm:$0xf]  ;;  %v27_v23 = vld [vmem:[%s3396_s0] sm:$0xff] }
   0x6   :  { %296 = vmatpush.bf16.msra.mxu2 %v1932_v8  ;;  %v2522_v19 = vld [vmem:[%s3395_s1 + $0x44] sm:$0xf0]  ;;  %v1869_v22 = vld [vmem:[%s3395_s1 + $0x48] sm:$0xf0]  ;;  %v1939_v27 = vld [vmem:[%s3395_s1 + $0x90] sm:$0xf] }
   0x7   :  { %310 = vmatpush.bf16.msra.mxu3 %v1936_v12  ;;  %v1868_v21 = vor.u32 %v2522_v19, %v1867_v18  ;;  %v28_v24 = vld [vmem:[%s3396_s0 + $0x8] sm:$0xff]  ;;  %v1872_v25 = vor.u32 %v2514_v20, %v1869_v22  ;;  %v2539_v28 = vld [vmem:[%s3395_s1 + $0xcc] sm:$0xf0]  ;;  %v1947_v29 = vld [vmem:[%s3395_s1 + $0x98] sm:$0xf] }
   0x8   :  { %v2780_v26 = vpack.c.bf16 %v28_v24, %v27_v23  ;;  %v1940_v30 = vor.u32 %v2539_v28, %v1939_v27  ;;  %v2540_v31 = vld [vmem:[%s3395_s1 + $0xd4] sm:$0xf0]  ;;  %v2532_v32 = vld [vmem:[%s3395_s1 + $0x9c] sm:$0xf]  ;;  %v2531_v35 = vld [vmem:[%s3395_s1 + $0x94] sm:$0xf] }
   0x9   :  { %269 = vmatpush.bf16.msra.mxu0 %v1860_v16  ;;  %v1949_v33 = vld [vmem:[%s3395_s1 + $0xd8] sm:$0xf0]  ;;  %283 = vmatpush.bf16.msra.mxu1 %v1864_v17  ;;  %v1948_v34 = vor.u32 %v2540_v31, %v1947_v29  ;;  %v1941_v36 = vld [vmem:[%s3395_s1 + $0xd0] sm:$0xf0]  ;;  %v1875_v37 = vld [vmem:[%s3395_s1 + $0x10] sm:$0xf] }
   0xa   :  { %297 = vmatpush.bf16.msra.mxu2 %v1868_v21  ;;  %v1952_v38 = vor.u32 %v2532_v32, %v1949_v33  ;;  %v1944_v39 = vor.u32 %v2531_v35, %v1941_v36  ;;  %v2523_v40 = vld [vmem:[%s3395_s1 + $0x4c] sm:$0xf0]  ;;  %v1883_v41 = vld [vmem:[%s3395_s1 + $0x18] sm:$0xf]  ;;  %v2516_v45 = vld [vmem:[%s3395_s1 + $0x1c] sm:$0xf] }
   0xb   :  { %311 = vmatpush.bf16.msra.mxu3 %v1872_v25  ;;  %v2524_v42 = vld [vmem:[%s3395_s1 + $0x54] sm:$0xf0]  ;;  %v1876_v43 = vor.u32 %v2523_v40, %v1875_v37  ;;  %v1885_v46 = vld [vmem:[%s3395_s1 + $0x58] sm:$0xf0]  ;;  %v2515_v47 = vld [vmem:[%s3395_s1 + $0x14] sm:$0xf] }
   0xc   :  { %1985 = vmatmul.msk.bf16.vlgmr.msra.gmra.mxu0 %vm258_vm0, %v2780_v26  ;;  %v1884_v44 = vor.u32 %v2524_v42, %v1883_v41  ;;  %1986 = vmatmul.msk.bf16.vlgmr.msra.gmra.mxu1 %vm258_vm0, %v2780_v26  ;;  %v1877_v48 = vld [vmem:[%s3395_s1 + $0x50] sm:$0xf0]  ;;  %v1955_v49 = vld [vmem:[%s3395_s1 + $0xa0] sm:$0xf]  ;;  %v1963_v53 = vld [vmem:[%s3395_s1 + $0xa8] sm:$0xf]  ;;  %v1888_v56 = vor.u32 %v2516_v45, %v1885_v46 }
   0xd   :  { %324 = vmatpush.bf16.msrb.mxu0 %v1940_v30  ;;  %1987 = vmatmul.msk.bf16.vlgmr.msra.gmra.mxu2 %vm258_vm0, %v2780_v26  ;;  %v2541_v50 = vld [vmem:[%s3395_s1 + $0xdc] sm:$0xf0]  ;;  %v1880_v51 = vor.u32 %v2515_v47, %v1877_v48  ;;  %v2542_v54 = vld [vmem:[%s3395_s1 + $0xe4] sm:$0xf0]  ;;  %v2534_v55 = vld [vmem:[%s3395_s1 + $0xac] sm:$0xf] }
   0xe   :  { %352 = vmatpush.bf16.msrb.mxu2 %v1948_v34  ;;  %1988 = vmatmul.msk.bf16.vlgmr.msra.gmra.mxu3 %vm258_vm0, %v2780_v26  ;;  %v1956_v52 = vor.u32 %v2541_v50, %v1955_v49  ;;  %v1964_v57 = vor.u32 %v2542_v54, %v1963_v53  ;;  %v1965_v58 = vld [vmem:[%s3395_s1 + $0xe8] sm:$0xf0]  ;;  %v2533_v59 = vld [vmem:[%s3395_s1 + $0xa4] sm:$0xf]  ;;  %v1891_v63 = vld [vmem:[%s3395_s1 + $0x20] sm:$0xf] }
   0xf   :  { %338 = vmatpush.bf16.msrb.mxu1 %v1944_v39  ;;  %366 = vmatpush.bf16.msrb.mxu3 %v1952_v38  ;;  %v1957_v60 = vld [vmem:[%s3395_s1 + $0xe0] sm:$0xf0]  ;;  %v1968_v61 = vor.u32 %v2534_v55, %v1965_v58  ;;  %v2525_v0 = vld [vmem:[%s3395_s1 + $0x5c] sm:$0xf0]  ;;  %v1899_v1 = vld [vmem:[%s3395_s1 + $0x28] sm:$0xf] }
  0x10   :  { %v1960_v62 = vor.u32 %v2533_v59, %v1957_v60  ;;  %v1892_v2 = vor.u32 %v2525_v0, %v1891_v63  ;;  %v2526_v3 = vld [vmem:[%s3395_s1 + $0x64] sm:$0xf0]  ;;  %v2518_v4 = vld [vmem:[%s3395_s1 + $0x2c] sm:$0xf]  ;;  %v2517_v7 = vld [vmem:[%s3395_s1 + $0x24] sm:$0xf] }
  0x11   :  { %325 = vmatpush.bf16.msrb.mxu0 %v1876_v43  ;;  %v1901_v5 = vld [vmem:[%s3395_s1 + $0x68] sm:$0xf0]  ;;  %v1900_v6 = vor.u32 %v2526_v3, %v1899_v1  ;;  %v1893_v8 = vld [vmem:[%s3395_s1 + $0x60] sm:$0xf0]  ;;  %v1979_v11 = vld [vmem:[%s3395_s1 + $0xb8] sm:$0xf] }
  0x12   :  { %353 = vmatpush.bf16.msrb.mxu2 %v1884_v44  ;;  %v1896_v9 = vor.u32 %v2517_v7, %v1893_v8  ;;  %v1904_v10 = vor.u32 %v2518_v4, %v1901_v5  ;;  %v2544_v12 = vld [vmem:[%s3395_s1 + $0xf4] sm:$0xf0]  ;;  %v2536_v13 = vld [vmem:[%s3395_s1 + $0xbc] sm:$0xf]  ;;  %v1971_v15 = vld [vmem:[%s3395_s1 + $0xb0] sm:$0xf] }
  0x13   :  { %339 = vmatpush.bf16.msrb.mxu1 %v1880_v51  ;;  %367 = vmatpush.bf16.msrb.mxu3 %v1888_v56  ;;  %v1981_v14 = vld [vmem:[%s3395_s1 + $0xf8] sm:$0xf0]  ;;  %v2543_v16 = vld [vmem:[%s3395_s1 + $0xec] sm:$0xf0]  ;;  %v1980_v17 = vor.u32 %v2544_v12, %v1979_v11  ;;  %v1915_v19 = vld [vmem:[%s3395_s1 + $0x38] sm:$0xf] }
  0x14   :  { %v1984_v18 = vor.u32 %v2536_v13, %v1981_v14  ;;  %v2528_v20 = vld [vmem:[%s3395_s1 + $0x74] sm:$0xf0]  ;;  %v1972_v21 = vor.u32 %v2543_v16, %v1971_v15  ;;  %v2520_v22 = vld [vmem:[%s3395_s1 + $0x3c] sm:$0xf]  ;;  %v2535_v24 = vld [vmem:[%s3395_s1 + $0xb4] sm:$0xf] }
  0x15   :  { %380 = vmatpush.bf16.msra.mxu0 %v1956_v52  ;;  %v1917_v23 = vld [vmem:[%s3395_s1 + $0x78] sm:$0xf0]  ;;  %v1973_v25 = vld [vmem:[%s3395_s1 + $0xf0] sm:$0xf0]  ;;  %v1916_v27 = vor.u32 %v2528_v20, %v1915_v19  ;;  %v1907_v29 = vld [vmem:[%s3395_s1 + $0x30] sm:$0xf] }
  0x16   :  { %408 = vmatpush.bf16.msra.mxu2 %v1964_v57  ;;  %v1976_v28 = vor.u32 %v2535_v24, %v1973_v25  ;;  %v2527_v30 = vld [vmem:[%s3395_s1 + $0x6c] sm:$0xf0]  ;;  %v2519_v31 = vld [vmem:[%s3395_s1 + $0x34] sm:$0xf]  ;;  %v1920_v32 = vor.u32 %v2520_v22, %v1917_v23  ;;  %v2552_v36 = vld [vmem:[%s3397_s3 + $0x38] sm:$0xff] }
  0x17   :  { %394 = vmatpush.bf16.msra.mxu1 %v1960_v62  ;;  %422 = vmatpush.bf16.msra.mxu3 %v1968_v61  ;;  %v1908_v33 = vor.u32 %v2527_v30, %v1907_v29  ;;  %v1909_v34 = vld [vmem:[%s3395_s1 + $0x70] sm:$0xf0]  ;;  %v2560_v37 = vld [vmem:[%s3397_s3 + $0x78] sm:$0xff]  ;;  %v2550_v44 = vld [vmem:[%s3397_s3 + $0x28] sm:$0xff] }
  0x18   :  { %v1912_v35 = vor.u32 %v2519_v31, %v1909_v34  ;;  %v2568_v38 = vld [vmem:[%s3397_s3 + $0xb8] sm:$0xff]  ;;  %v2551_v40 = vld [vmem:[%s3397_s3 + $0x30] sm:$0xff]  ;;  %v2558_v45 = vld [vmem:[%s3397_s3 + $0x68] sm:$0xff] }
  0x19   :  { %381 = vmatpush.bf16.msra.mxu0 %v1892_v2  ;;  %v2576_v39 = vld [vmem:[%s3397_s3 + $0xf8] sm:$0xff]  ;;  %v2559_v41 = vld [vmem:[%s3397_s3 + $0x70] sm:$0xff]  ;;  %v2566_v46 = vld [vmem:[%s3397_s3 + $0xa8] sm:$0xff] }
  0x1a   :  { %409 = vmatpush.bf16.msra.mxu2 %v1900_v6  ;;  %v2567_v42 = vld [vmem:[%s3397_s3 + $0xb0] sm:$0xff]  ;;  %v2574_v47 = vld [vmem:[%s3397_s3 + $0xe8] sm:$0xff]  ;;  %v2549_v48 = vld [vmem:[%s3397_s3 + $0x20] sm:$0xff] }
  0x1b   :  { %395 = vmatpush.bf16.msra.mxu1 %v1896_v9  ;;  %423 = vmatpush.bf16.msra.mxu3 %v1904_v10  ;;  %v2575_v43 = vld [vmem:[%s3397_s3 + $0xf0] sm:$0xff]  ;;  %v2557_v49 = vld [vmem:[%s3397_s3 + $0x60] sm:$0xff]  ;;  %v2548_v52 = vld [vmem:[%s3397_s3 + $0x18] sm:$0xff] }
  0x1c   :  { %1989 = vmatmul.msk.bf16.vlgmr.msrb.gmra.mxu0 %vm258_vm0, %v2780_v26  ;;  %1990 = vmatmul.msk.bf16.vlgmr.msrb.gmra.mxu1 %vm258_vm0, %v2780_v26  ;;  %v2565_v50 = vld [vmem:[%s3397_s3 + $0xa0] sm:$0xff]  ;;  %v2556_v53 = vld [vmem:[%s3397_s3 + $0x58] sm:$0xff]  ;;  %v2547_v56 = vld [vmem:[%s3397_s3 + $0x10] sm:$0xff] }
  0x1d   :  { %1991 = vmatmul.msk.bf16.vlgmr.msrb.gmra.mxu2 %vm258_vm0, %v2780_v26  ;;  %436 = vmatpush.bf16.msrb.mxu0 %v1972_v21  ;;  %v2573_v51 = vld [vmem:[%s3397_s3 + $0xe0] sm:$0xff]  ;;  %v2564_v54 = vld [vmem:[%s3397_s3 + $0x98] sm:$0xff]  ;;  %v2555_v57 = vld [vmem:[%s3397_s3 + $0x50] sm:$0xff] }
  0x1e   :  { %1992 = vmatmul.msk.bf16.vlgmr.msrb.gmra.mxu3 %vm258_vm0, %v2780_v26  ;;  %464 = vmatpush.bf16.msrb.mxu2 %v1980_v17  ;;  %v2572_v55 = vld [vmem:[%s3397_s3 + $0xd8] sm:$0xff]  ;;  %v2563_v58 = vld [vmem:[%s3397_s3 + $0x90] sm:$0xff]  ;;  %v2546_v59 = vld [vmem:[%s3397_s3 + $0x8] sm:$0xff] }
  0x1f   :  { %478 = vmatpush.bf16.msrb.mxu3 %v1984_v18  ;;  %450 = vmatpush.bf16.msrb.mxu1 %v1976_v28  ;;  %v2554_v60 = vld [vmem:[%s3397_s3 + $0x48] sm:$0xff]  ;;  %v2545_v63 = vld [vmem:[%s3397_s3] sm:$0xff]  ;;  %v2584_v1 = vld [vmem:[%s3397_s3 + $0x138] sm:$0xff] }
  0x20   :  { %v2562_v61 = vld [vmem:[%s3397_s3 + $0x88] sm:$0xff]  ;;  %v2553_v0 = vld [vmem:[%s3397_s3 + $0x40] sm:$0xff]  ;;  %v2592_v2 = vld [vmem:[%s3397_s3 + $0x178] sm:$0xff] }
  0x21   :  { %437 = vmatpush.bf16.msrb.mxu0 %v1908_v33  ;;  %v2570_v62 = vld [vmem:[%s3397_s3 + $0xc8] sm:$0xff]  ;;  %v2561_v3 = vld [vmem:[%s3397_s3 + $0x80] sm:$0xff]  ;;  %v2600_v5 = vld [vmem:[%s3397_s3 + $0x1b8] sm:$0xff] }
  0x22   :  { %465 = vmatpush.bf16.msrb.mxu2 %v1916_v27  ;;  %v2569_v4 = vld [vmem:[%s3397_s3 + $0xc0] sm:$0xff]  ;;  %v2608_v6 = vld [vmem:[%s3397_s3 + $0x1f8] sm:$0xff]  ;;  %v2583_v7 = vld [vmem:[%s3397_s3 + $0x130] sm:$0xff] }
  0x23   :  { %479 = vmatpush.bf16.msrb.mxu3 %v1920_v32  ;;  %451 = vmatpush.bf16.msrb.mxu1 %v1912_v35  ;;  %v2591_v8 = vld [vmem:[%s3397_s3 + $0x170] sm:$0xff]  ;;  %v2582_v11 = vld [vmem:[%s3397_s3 + $0x128] sm:$0xff]  ;;  %v2581_v13 = vld [vmem:[%s3397_s3 + $0x120] sm:$0xff] }
  0x24   :  { %v2599_v9 = vld [vmem:[%s3397_s3 + $0x1b0] sm:$0xff]  ;;  %v2590_v12 = vld [vmem:[%s3397_s3 + $0x168] sm:$0xff]  ;;  %v2589_v14 = vld [vmem:[%s3397_s3 + $0x160] sm:$0xff] }
  0x25   :  { %v2607_v10 = vld [vmem:[%s3397_s3 + $0x1f0] sm:$0xff]  ;;  %v2598_v15 = vld [vmem:[%s3397_s3 + $0x1a8] sm:$0xff]  ;;  %v2580_v17 = vld [vmem:[%s3397_s3 + $0x118] sm:$0xff] }
  0x26   :  { %v2606_v16 = vld [vmem:[%s3397_s3 + $0x1e8] sm:$0xff]  ;;  %v2588_v18 = vld [vmem:[%s3397_s3 + $0x158] sm:$0xff]  ;;  %v2597_v19 = vld [vmem:[%s3397_s3 + $0x1a0] sm:$0xff] }
  0x27   :  { %v2605_v20 = vld [vmem:[%s3397_s3 + $0x1e0] sm:$0xff]  ;;  %v2579_v21 = vld [vmem:[%s3397_s3 + $0x110] sm:$0xff]  ;;  %v2596_v23 = vld [vmem:[%s3397_s3 + $0x198] sm:$0xff] }
  0x28   :  { %v2587_v22 = vld [vmem:[%s3397_s3 + $0x150] sm:$0xff]  ;;  %v2604_v24 = vld [vmem:[%s3397_s3 + $0x1d8] sm:$0xff]  ;;  %v2578_v25 = vld [vmem:[%s3397_s3 + $0x108] sm:$0xff] }
  0x29   :  { %v2586_v27 = vld [vmem:[%s3397_s3 + $0x148] sm:$0xff]  ;;  %v2595_v28 = vld [vmem:[%s3397_s3 + $0x190] sm:$0xff]  ;;  %v2577_v30 = vld [vmem:[%s3397_s3 + $0x100] sm:$0xff] }
  0x2a   :  { %v2603_v29 = vld [vmem:[%s3397_s3 + $0x1d0] sm:$0xff]  ;;  %v2585_v31 = vld [vmem:[%s3397_s3 + $0x140] sm:$0xff]  ;;  %v2594_v32 = vld [vmem:[%s3397_s3 + $0x188] sm:$0xff] }
  0x2b   :  { %v2602_v33 = vld [vmem:[%s3397_s3 + $0x1c8] sm:$0xff]  ;;  %v2593_v34 = vld [vmem:[%s3397_s3 + $0x180] sm:$0xff] }
  0x2c   :  { %1993 = vmatmul.msk.bf16.vlgmr.msra.gmra.mxu0 %vm258_vm0, %v2780_v26  ;;  %1994 = vmatmul.msk.bf16.vlgmr.msra.gmra.mxu1 %vm258_vm0, %v2780_v26  ;;  %v2601_v35 = vld [vmem:[%s3397_s3 + $0x1c0] sm:$0xff] }
  0x2d   :  { %1995 = vmatmul.msk.bf16.vlgmr.msra.gmra.mxu2 %vm258_vm0, %v2780_v26  ;;  %1562 = vmatpush.bf16.msra.mxu0 %v2552_v36  ;;  %v3153_v36 = vld [vmem:[%s3399_s2] sm:$0xff] }
  0x2e   :  { %1996 = vmatmul.msk.bf16.vlgmr.msra.gmra.mxu3 %vm258_vm0, %v2780_v26  ;;  %1576 = vmatpush.bf16.msra.mxu1 %v2560_v37 }
  0x2f   :  { %1590 = vmatpush.bf16.msra.mxu2 %v2568_v38  ;;  %1604 = vmatpush.bf16.msra.mxu3 %v2576_v39  ;;  %v66_v38 = vperm.slane %v3153_v36, 0 }
  0x31   :  { %1563 = vmatpush.bf16.msra.mxu0 %v2551_v40  ;;  %v67_v40 = vperm.slane %v3153_v36, 1 }
  0x32   :  { %1577 = vmatpush.bf16.msra.mxu1 %v2559_v41 }
  0x33   :  { %1591 = vmatpush.bf16.msra.mxu2 %v2567_v42  ;;  %1605 = vmatpush.bf16.msra.mxu3 %v2575_v43 }
  0x35   :  { %1564 = vmatpush.bf16.msra.mxu0 %v2550_v44 }
  0x36   :  { %1578 = vmatpush.bf16.msra.mxu1 %v2558_v45 }
  0x37   :  { %1592 = vmatpush.bf16.msra.mxu2 %v2566_v46  ;;  %1606 = vmatpush.bf16.msra.mxu3 %v2574_v47 }
  0x39   :  { %1565 = vmatpush.bf16.msra.mxu0 %v2549_v48 }
  0x3a   :  { %1579 = vmatpush.bf16.msra.mxu1 %v2557_v49 }
  0x3b   :  { %1593 = vmatpush.bf16.msra.mxu2 %v2565_v50  ;;  %1607 = vmatpush.bf16.msra.mxu3 %v2573_v51  ;;  %v68_v50 = vperm.slane %v3153_v36, 2 }
  0x3c   :  { %1997 = vmatmul.msk.bf16.vlgmr.msrb.gmra.mxu0 %vm258_vm0, %v2780_v26  ;;  %1998 = vmatmul.msk.bf16.vlgmr.msrb.gmra.mxu1 %vm258_vm0, %v2780_v26 }
  0x3d   :  { %1999 = vmatmul.msk.bf16.vlgmr.msrb.gmra.mxu2 %vm258_vm0, %v2780_v26  ;;  %1566 = vmatpush.bf16.msra.mxu0 %v2548_v52  ;;  %v69_v52 = vperm.slane %v3153_v36, 3 }
  0x3e   :  { %2000 = vmatmul.msk.bf16.vlgmr.msrb.gmra.mxu3 %vm258_vm0, %v2780_v26  ;;  %1580 = vmatpush.bf16.msra.mxu1 %v2556_v53  ;;  %v2571_v26 = vld [vmem:[%s3397_s3 + $0xd0] sm:$0xff] }
  0x3f   :  { %1594 = vmatpush.bf16.msra.mxu2 %v2564_v54  ;;  %1608 = vmatpush.bf16.msra.mxu3 %v2572_v55  ;;  %v2616_v55 = vld [vmem:[%s3397_s3 + $0x238] sm:$0xff] }
  0x41   :  { %1567 = vmatpush.bf16.msra.mxu0 %v2547_v56 }
  0x42   :  { %1581 = vmatpush.bf16.msra.mxu1 %v2555_v57  ;;  %v2624_v57 = vld [vmem:[%s3397_s3 + $0x278] sm:$0xff] }
  0x43   :  { %1595 = vmatpush.bf16.msra.mxu2 %v2563_v58  ;;  %1609 = vmatpush.bf16.msra.mxu3 %v2571_v26 }
  0x45   :  { %1568 = vmatpush.bf16.msra.mxu0 %v2546_v59 }
  0x46   :  { %1582 = vmatpush.bf16.msra.mxu1 %v2554_v60 }
  0x47   :  { %1596 = vmatpush.bf16.msra.mxu2 %v2562_v61  ;;  %1610 = vmatpush.bf16.msra.mxu3 %v2570_v62 }
  0x49   :  { %1569 = vmatpush.bf16.msra.mxu0 %v2545_v63 }
  0x4a   :  { %1583 = vmatpush.bf16.msra.mxu1 %v2553_v0  ;;  %v2615_v0 = vld [vmem:[%s3397_s3 + $0x230] sm:$0xff] }
  0x4b   :  { %1597 = vmatpush.bf16.msra.mxu2 %v2561_v3  ;;  %1611 = vmatpush.bf16.msra.mxu3 %v2569_v4  ;;  %v2623_v4 = vld [vmem:[%s3397_s3 + $0x270] sm:$0xff] }
  0x4d   :  { %1618 = vmatpush.bf16.msrb.mxu0 %v2584_v1 }
  0x4e   :  { %1632 = vmatpush.bf16.msrb.mxu1 %v2592_v2  ;;  %v70_v2 = vperm.slane %v3153_v36, 4 }
  0x4f   :  { %1646 = vmatpush.bf16.msrb.mxu2 %v2600_v5  ;;  %1660 = vmatpush.bf16.msrb.mxu3 %v2608_v6 }
  0x51   :  { %1619 = vmatpush.bf16.msrb.mxu0 %v2583_v7  ;;  %v71_v7 = vperm.slane %v3153_v36, 5 }
  0x52   :  { %1633 = vmatpush.bf16.msrb.mxu1 %v2591_v8 }
  0x53   :  { %1647 = vmatpush.bf16.msrb.mxu2 %v2599_v9  ;;  %1661 = vmatpush.bf16.msrb.mxu3 %v2607_v10  ;;  %v2632_v10 = vld [vmem:[%s3397_s3 + $0x2b8] sm:$0xff] }
  0x55   :  { %1620 = vmatpush.bf16.msrb.mxu0 %v2582_v11 }
  0x56   :  { %1634 = vmatpush.bf16.msrb.mxu1 %v2590_v12  ;;  %v2640_v12 = vld [vmem:[%s3397_s3 + $0x2f8] sm:$0xff] }
  0x57   :  { %1648 = vmatpush.bf16.msrb.mxu2 %v2598_v15  ;;  %1662 = vmatpush.bf16.msrb.mxu3 %v2606_v16  ;;  %v2622_v16 = vld [vmem:[%s3397_s3 + $0x268] sm:$0xff] }
  0x59   :  { %1621 = vmatpush.bf16.msrb.mxu0 %v2581_v13  ;;  %v2614_v13 = vld [vmem:[%s3397_s3 + $0x228] sm:$0xff] }
  0x5a   :  { %1635 = vmatpush.bf16.msrb.mxu1 %v2589_v14 }
  0x5b   :  { %1649 = vmatpush.bf16.msrb.mxu2 %v2597_v19  ;;  %1663 = vmatpush.bf16.msrb.mxu3 %v2605_v20  ;;  %v2631_v19 = vld [vmem:[%s3397_s3 + $0x2b0] sm:$0xff]  ;;  %v72_v20 = vperm.slane %v3153_v36, 6 }
  0x5d   :  { %1622 = vmatpush.bf16.msrb.mxu0 %v2580_v17 }
  0x5e   :  { %1636 = vmatpush.bf16.msrb.mxu1 %v2588_v18 }
  0x5f   :  { %1650 = vmatpush.bf16.msrb.mxu2 %v2596_v23  ;;  %1664 = vmatpush.bf16.msrb.mxu3 %v2604_v24  ;;  %v2639_v23 = vld [vmem:[%s3397_s3 + $0x2f0] sm:$0xff]  ;;  %v2613_v24 = vld [vmem:[%s3397_s3 + $0x220] sm:$0xff] }
  0x61   :  { %1623 = vmatpush.bf16.msrb.mxu0 %v2579_v21 }
  0x62   :  { %1637 = vmatpush.bf16.msrb.mxu1 %v2587_v22 }
  0x63   :  { %1651 = vmatpush.bf16.msrb.mxu2 %v2595_v28  ;;  %1665 = vmatpush.bf16.msrb.mxu3 %v2603_v29 }
  0x65   :  { %1624 = vmatpush.bf16.msrb.mxu0 %v2578_v25 }
  0x66   :  { %1638 = vmatpush.bf16.msrb.mxu1 %v2586_v27  ;;  %v73_v27 = vperm.slane %v3153_v36, 7  ;;  %v2638_v36 = vld [vmem:[%s3397_s3 + $0x2e8] sm:$0xff] }
  0x67   :  { %1652 = vmatpush.bf16.msrb.mxu2 %v2594_v32  ;;  %1666 = vmatpush.bf16.msrb.mxu3 %v2602_v33 }
  0x69   :  { %1625 = vmatpush.bf16.msrb.mxu0 %v2577_v30  ;;  %v2621_v30 = vld [vmem:[%s3397_s3 + $0x260] sm:$0xff] }
  0x6a   :  { %1639 = vmatpush.bf16.msrb.mxu1 %v2585_v31 }
  0x6b   :  { %1653 = vmatpush.bf16.msrb.mxu2 %v2593_v34  ;;  %1667 = vmatpush.bf16.msrb.mxu3 %v2601_v35  ;;  %v2630_v34 = vld [vmem:[%s3397_s3 + $0x2a8] sm:$0xff] }
  0x89   :  { %v271_v37 = vpop.f32.mrf.mxu0  ;;  %v285_v39 = vpop.f32.mrf.mxu1 }
  0x8a   :  { %v272_v41 = vadd.f32 %v271_v37, %v66_v38  ;;  %v286_v42 = vadd.f32 %v285_v39, %v67_v40 }
  0x8c   :  { %v486_v46 = vmax.f32 %v272_v41, 0.0  ;;  %v487_v49 = vmax.f32 %v286_v42, 0.0  ;;  %v2620_v41 = vld [vmem:[%s3397_s3 + $0x258] sm:$0xff] }
  0x90   :  { %v299_v43 = vpop.f32.mrf.mxu2 }
  0x91   :  { %v313_v44 = vpop.f32.mrf.mxu3  ;;  %v273_v45 = vpop.f32.mrf.mxu0  ;;  %v300_v58 = vadd.f32 %v299_v43, %v68_v50  ;;  %v3214_v43 = vld [vmem:[%s3399_s2 + $0x8] sm:$0xff] }
  0x92   :  { %v274_v47 = vadd.f32 %v273_v45, %v66_v38  ;;  %v287_v48 = vpop.f32.mrf.mxu1  ;;  %v314_v59 = vadd.f32 %v313_v44, %v69_v52  ;;  %v2612_v38 = vld [vmem:[%s3397_s3 + $0x218] sm:$0xff]  ;;  %v2629_v45 = vld [vmem:[%s3397_s3 + $0x2a0] sm:$0xff] }
  0x93   :  { %v288_v51 = vadd.f32 %v287_v48, %v67_v40  ;;  %v488_v5 = vmax.f32 %v300_v58, 0.0 }
  0x94   :  { %v502_v53 = vmax.f32 %v274_v47, 0.0  ;;  %v489_v8 = vmax.f32 %v314_v59, 0.0  ;;  %v2628_v59 = vld [vmem:[%s3397_s3 + $0x298] sm:$0xff] }
  0x95   :  { %v503_v54 = vmax.f32 %v288_v51, 0.0  ;;  %v2611_v51 = vld [vmem:[%s3397_s3 + $0x210] sm:$0xff] }
  0x96   :  { %v518_v56 = vpack.c.bf16 %v502_v53, %v486_v46 }
  0x97   :  { %v519_v26 = vpack.c.bf16 %v503_v54, %v487_v49  ;;  %v74_v54 = vperm.slane %v3214_v43, 0 }
  0x98   :  { %v301_v60 = vpop.f32.mrf.mxu2  ;;  %1570 = vmatmul.bf16.vlgmr.msra.gmra.mxu0 %v518_v56  ;;  %v2619_v56 = vld [vmem:[%s3397_s3 + $0x250] sm:$0xff] }
  0x99   :  { %v302_v61 = vadd.f32 %v301_v60, %v68_v50  ;;  %v315_v62 = vpop.f32.mrf.mxu3  ;;  %1584 = vmatmul.bf16.vlgmr.msra.gmra.mxu1 %v519_v26  ;;  %1674 = vmatpush.bf16.msra.mxu0 %v2616_v55  ;;  %v327_v63 = vpop.f32.mrf.mxu0  ;;  %v2637_v50 = vld [vmem:[%s3397_s3 + $0x2e0] sm:$0xff]  ;;  %v75_v26 = vperm.slane %v3214_v43, 1 }
  0x9a   :  { %v316_v1 = vadd.f32 %v315_v62, %v69_v52  ;;  %1688 = vmatpush.bf16.msra.mxu1 %v2624_v57  ;;  %v341_v3 = vpop.f32.mrf.mxu1  ;;  %v328_v15 = vadd.f32 %v327_v63, %v70_v2  ;;  %v2610_v62 = vld [vmem:[%s3397_s3 + $0x208] sm:$0xff] }
  0x9b   :  { %v504_v6 = vmax.f32 %v302_v61, 0.0  ;;  %v342_v17 = vadd.f32 %v341_v3, %v71_v7  ;;  %v2636_v61 = vld [vmem:[%s3397_s3 + $0x2d8] sm:$0xff] }
  0x9c   :  { %v505_v9 = vmax.f32 %v316_v1, 0.0  ;;  %v490_v25 = vmax.f32 %v328_v15, 0.0  ;;  %v2618_v1 = vld [vmem:[%s3397_s3 + $0x248] sm:$0xff]  ;;  %v2648_v15 = vld [vmem:[%s3397_s3 + $0x338] sm:$0xff] }
  0x9d   :  { %v520_v11 = vpack.c.bf16 %v504_v6, %v488_v5  ;;  %1675 = vmatpush.bf16.msra.mxu0 %v2615_v0  ;;  %v491_v31 = vmax.f32 %v342_v17, 0.0  ;;  %v76_v5 = vperm.slane %v3214_v43, 2  ;;  %v2656_v17 = vld [vmem:[%s3397_s3 + $0x378] sm:$0xff] }
  0x9e   :  { %v521_v14 = vpack.c.bf16 %v505_v9, %v489_v8  ;;  %1689 = vmatpush.bf16.msra.mxu1 %v2623_v4  ;;  %v2627_v4 = vld [vmem:[%s3397_s3 + $0x290] sm:$0xff]  ;;  %v2609_v9 = vld [vmem:[%s3397_s3 + $0x200] sm:$0xff] }
  0x9f   :  { %1598 = vmatmul.bf16.vlgmr.msra.gmra.mxu2 %v520_v11  ;;  %v2635_v8 = vld [vmem:[%s3397_s3 + $0x2d0] sm:$0xff]  ;;  %v77_v11 = vperm.slane %v3214_v43, 3 }
  0xa0   :  { %1612 = vmatmul.bf16.vlgmr.msra.gmra.mxu3 %v521_v14  ;;  %1702 = vmatpush.bf16.msra.mxu2 %v2632_v10  ;;  %v355_v18 = vpop.f32.mrf.mxu2  ;;  %v2617_v14 = vld [vmem:[%s3397_s3 + $0x240] sm:$0xff] }
  0xa1   :  { %1716 = vmatpush.bf16.msra.mxu3 %v2640_v12  ;;  %v369_v21 = vpop.f32.mrf.mxu3  ;;  %1676 = vmatpush.bf16.msra.mxu0 %v2614_v13  ;;  %v329_v22 = vpop.f32.mrf.mxu0  ;;  %v356_v35 = vadd.f32 %v355_v18, %v72_v20 }
  0xa2   :  { %1690 = vmatpush.bf16.msra.mxu1 %v2622_v16  ;;  %v330_v28 = vadd.f32 %v329_v22, %v70_v2  ;;  %v343_v29 = vpop.f32.mrf.mxu1  ;;  %v370_v39 = vadd.f32 %v369_v21, %v73_v27 }
  0xa3   :  { %v344_v32 = vadd.f32 %v343_v29, %v71_v7  ;;  %v492_v46 = vmax.f32 %v356_v35, 0.0  ;;  %v2633_v35 = vld [vmem:[%s3397_s3 + $0x2c0] sm:$0xff] }
  0xa4   :  { %v506_v33 = vmax.f32 %v330_v28, 0.0  ;;  %1703 = vmatpush.bf16.msra.mxu2 %v2631_v19  ;;  %v493_v52 = vmax.f32 %v370_v39, 0.0  ;;  %v2655_v28 = vld [vmem:[%s3397_s3 + $0x370] sm:$0xff]  ;;  %v2672_v39 = vld [vmem:[%s3397_s3 + $0x3f8] sm:$0xff] }
  0xa5   :  { %1717 = vmatpush.bf16.msra.mxu3 %v2639_v23  ;;  %v507_v37 = vmax.f32 %v344_v32, 0.0  ;;  %1677 = vmatpush.bf16.msra.mxu0 %v2613_v24  ;;  %v2634_v23 = vld [vmem:[%s3397_s3 + $0x2c8] sm:$0xff] }
  0xa6   :  { %v522_v40 = vpack.c.bf16 %v506_v33, %v490_v25  ;;  %1691 = vmatpush.bf16.msra.mxu1 %v2621_v30 }
  0xa7   :  { %v523_v42 = vpack.c.bf16 %v507_v37, %v491_v31  ;;  %v2625_v31 = vld [vmem:[%s3397_s3 + $0x280] sm:$0xff]  ;;  %v2664_v37 = vld [vmem:[%s3397_s3 + $0x3b8] sm:$0xff] }
  0xa8   :  { %1704 = vmatpush.bf16.msra.mxu2 %v2630_v34  ;;  %v357_v44 = vpop.f32.mrf.mxu2  ;;  %1626 = vmatmul.bf16.vlgmr.msrb.gmra.mxu0 %v522_v40  ;;  %v2646_v40 = vld [vmem:[%s3397_s3 + $0x328] sm:$0xff] }
  0xa9   :  { %1718 = vmatpush.bf16.msra.mxu3 %v2638_v36  ;;  %v358_v47 = vadd.f32 %v357_v44, %v72_v20  ;;  %v371_v48 = vpop.f32.mrf.mxu3  ;;  %1678 = vmatpush.bf16.msra.mxu0 %v2612_v38  ;;  %v383_v49 = vpop.f32.mrf.mxu0  ;;  %v2626_v20 = vld [vmem:[%s3397_s3 + $0x288] sm:$0xff] }
  0xaa   :  { %v372_v53 = vadd.f32 %v371_v48, %v73_v27  ;;  %1692 = vmatpush.bf16.msra.mxu1 %v2620_v41  ;;  %v397_v55 = vpop.f32.mrf.mxu1  ;;  %v384_v0 = vadd.f32 %v383_v49, %v74_v54  ;;  %v2647_v27 = vld [vmem:[%s3397_s3 + $0x330] sm:$0xff] }
  0xab   :  { %v508_v57 = vmax.f32 %v358_v47, 0.0  ;;  %1640 = vmatmul.bf16.vlgmr.msrb.gmra.mxu1 %v523_v42  ;;  %v398_v2 = vadd.f32 %v397_v55, %v75_v26  ;;  %v2654_v42 = vld [vmem:[%s3397_s3 + $0x368] sm:$0xff]  ;;  %v2663_v47 = vld [vmem:[%s3397_s3 + $0x3b0] sm:$0xff]  ;;  %v2644_v55 = vld [vmem:[%s3397_s3 + $0x318] sm:$0xff] }
  0xac   :  { %v509_v58 = vmax.f32 %v372_v53, 0.0  ;;  %1705 = vmatpush.bf16.msra.mxu2 %v2629_v45  ;;  %v494_v10 = vmax.f32 %v384_v0, 0.0  ;;  %v2662_v53 = vld [vmem:[%s3397_s3 + $0x3a8] sm:$0xff]  ;;  %v2651_v0 = vld [vmem:[%s3397_s3 + $0x350] sm:$0xff] }
  0xad   :  { %v524_v60 = vpack.c.bf16 %v508_v57, %v492_v46  ;;  %1719 = vmatpush.bf16.msra.mxu3 %v2637_v50  ;;  %1679 = vmatpush.bf16.msra.mxu0 %v2611_v51  ;;  %v495_v18 = vmax.f32 %v398_v2, 0.0  ;;  %v2671_v50 = vld [vmem:[%s3397_s3 + $0x3f0] sm:$0xff]  ;;  %v2645_v51 = vld [vmem:[%s3397_s3 + $0x320] sm:$0xff] }
  0xae   :  { %v525_v63 = vpack.c.bf16 %v509_v58, %v493_v52  ;;  %1693 = vmatpush.bf16.msra.mxu1 %v2619_v56  ;;  %v2653_v52 = vld [vmem:[%s3397_s3 + $0x360] sm:$0xff]  ;;  %v2652_v56 = vld [vmem:[%s3397_s3 + $0x358] sm:$0xff]  ;;  %v78_v58 = vperm.slane %v3214_v43, 4 }
  0xaf   :  { %1654 = vmatmul.bf16.vlgmr.msrb.gmra.mxu2 %v524_v60 }
  0xb0   :  { %1668 = vmatmul.bf16.vlgmr.msrb.gmra.mxu3 %v525_v63  ;;  %1706 = vmatpush.bf16.msra.mxu2 %v2628_v59  ;;  %v411_v3 = vpop.f32.mrf.mxu2  ;;  %v79_v59 = vperm.slane %v3214_v43, 5 }
  0xb1   :  { %1720 = vmatpush.bf16.msra.mxu3 %v2636_v61  ;;  %v425_v6 = vpop.f32.mrf.mxu3  ;;  %1680 = vmatpush.bf16.msra.mxu0 %v2610_v62  ;;  %v385_v7 = vpop.f32.mrf.mxu0  ;;  %v412_v21 = vadd.f32 %v411_v3, %v76_v5  ;;  %v2669_v61 = vld [vmem:[%s3397_s3 + $0x3e0] sm:$0xff]  ;;  %v2643_v62 = vld [vmem:[%s3397_s3 + $0x310] sm:$0xff]  ;;  %v2660_v3 = vld [vmem:[%s3397_s3 + $0x398] sm:$0xff] }
  0xb2   :  { %1694 = vmatpush.bf16.msra.mxu1 %v2618_v1  ;;  %v386_v12 = vadd.f32 %v385_v7, %v74_v54  ;;  %v399_v13 = vpop.f32.mrf.mxu1  ;;  %v426_v24 = vadd.f32 %v425_v6, %v77_v11  ;;  %v2670_v54 = vld [vmem:[%s3397_s3 + $0x3e8] sm:$0xff]  ;;  %v2668_v6 = vld [vmem:[%s3397_s3 + $0x3d8] sm:$0xff] }
  0xb3   :  { %v400_v16 = vadd.f32 %v399_v13, %v75_v26  ;;  %v496_v32 = vmax.f32 %v412_v21, 0.0  ;;  %v2661_v26 = vld [vmem:[%s3397_s3 + $0x3a0] sm:$0xff]  ;;  %v80_v13 = vperm.slane %v3214_v43, 6 }
  0xb4   :  { %v510_v19 = vmax.f32 %v386_v12, 0.0  ;;  %1707 = vmatpush.bf16.msra.mxu2 %v2627_v4  ;;  %v497_v36 = vmax.f32 %v426_v24, 0.0  ;;  %v2659_v12 = vld [vmem:[%s3397_s3 + $0x390] sm:$0xff] }
  0xb5   :  { %1721 = vmatpush.bf16.msra.mxu3 %v2635_v8  ;;  %v511_v22 = vmax.f32 %v400_v16, 0.0  ;;  %1681 = vmatpush.bf16.msra.mxu0 %v2609_v9  ;;  %v2642_v8 = vld [vmem:[%s3397_s3 + $0x308] sm:$0xff]  ;;  %v2667_v16 = vld [vmem:[%s3397_s3 + $0x3d0] sm:$0xff] }
  0xb6   :  { %v526_v25 = vpack.c.bf16 %v510_v19, %v494_v10  ;;  %1695 = vmatpush.bf16.msra.mxu1 %v2617_v14  ;;  %v2650_v9 = vld [vmem:[%s3397_s3 + $0x348] sm:$0xff] }
  0xb7   :  { %v527_v29 = vpack.c.bf16 %v511_v22, %v495_v18  ;;  %v81_v18 = vperm.slane %v3214_v43, 7  ;;  %v2666_v43 = vld [vmem:[%s3397_s3 + $0x3c8] sm:$0xff] }
  0xb8   :  { %1708 = vmatpush.bf16.msra.mxu2 %v2626_v20  ;;  %v413_v30 = vpop.f32.mrf.mxu2  ;;  %1682 = vmatmul.bf16.vlgmr.msra.gmra.mxu0 %v526_v25  ;;  %v2649_v20 = vld [vmem:[%s3397_s3 + $0x340] sm:$0xff] }
  0xb9   :  { %1730 = vmatpush.bf16.msrb.mxu0 %v2648_v15  ;;  %1722 = vmatpush.bf16.msra.mxu3 %v2634_v23  ;;  %v414_v33 = vadd.f32 %v413_v30, %v76_v5  ;;  %v427_v34 = vpop.f32.mrf.mxu3  ;;  %v439_v45 = vpop.f32.mrf.mxu0  ;;  %v2658_v23 = vld [vmem:[%s3397_s3 + $0x388] sm:$0xff]  ;;  %v2657_v30 = vld [vmem:[%s3397_s3 + $0x380] sm:$0xff] }
  0xba   :  { %1744 = vmatpush.bf16.msrb.mxu1 %v2656_v17  ;;  %v428_v38 = vadd.f32 %v427_v34, %v77_v11  ;;  %v453_v48 = vpop.f32.mrf.mxu1  ;;  %v440_v2 = vadd.f32 %v439_v45, %v78_v58  ;;  %v2641_v17 = vld [vmem:[%s3397_s3 + $0x300] sm:$0xff] }
  0xbb   :  { %v512_v41 = vmax.f32 %v414_v33, 0.0  ;;  %1696 = vmatmul.bf16.vlgmr.msra.gmra.mxu1 %v527_v29  ;;  %v454_v5 = vadd.f32 %v453_v48, %v79_v59  ;;  %v2665_v33 = vld [vmem:[%s3397_s3 + $0x3c0] sm:$0xff] }
  0xbc   :  { %v513_v44 = vmax.f32 %v428_v38, 0.0  ;;  %1709 = vmatpush.bf16.msra.mxu2 %v2625_v31  ;;  %v498_v10 = vmax.f32 %v440_v2, 0.0  ;;  %v2674_v45 = vld [vmem:[%s3398_s4] ss:$0 sm:$0xff] }
  0xbd   :  { %1731 = vmatpush.bf16.msrb.mxu0 %v2647_v27  ;;  %v528_v46 = vpack.c.bf16 %v512_v41, %v496_v32  ;;  %1723 = vmatpush.bf16.msra.mxu3 %v2633_v35  ;;  %v499_v14 = vmax.f32 %v454_v5, 0.0 }
  0xbe   :  { %1745 = vmatpush.bf16.msrb.mxu1 %v2655_v28  ;;  %v529_v49 = vpack.c.bf16 %v513_v44, %v497_v36 }
  0xbf   :  { %1710 = vmatmul.bf16.vlgmr.msra.gmra.mxu2 %v528_v46 }
  0xc0   :  { %1758 = vmatpush.bf16.msrb.mxu2 %v2664_v37  ;;  %1724 = vmatmul.bf16.vlgmr.msra.gmra.mxu3 %v529_v49  ;;  %v467_v57 = vpop.f32.mrf.mxu2 }
  0xc1   :  { %1772 = vmatpush.bf16.msrb.mxu3 %v2672_v39  ;;  %1732 = vmatpush.bf16.msrb.mxu0 %v2646_v40  ;;  %v481_v60 = vpop.f32.mrf.mxu3  ;;  %v441_v63 = vpop.f32.mrf.mxu0  ;;  %v468_v24 = vadd.f32 %v467_v57, %v80_v13 }
  0xc2   :  { %1746 = vmatpush.bf16.msrb.mxu1 %v2654_v42  ;;  %v455_v1 = vpop.f32.mrf.mxu1  ;;  %v442_v4 = vadd.f32 %v441_v63, %v78_v58  ;;  %v482_v28 = vadd.f32 %v481_v60, %v81_v18 }
  0xc3   :  { %v456_v7 = vadd.f32 %v455_v1, %v79_v59  ;;  %v500_v31 = vmax.f32 %v468_v24, 0.0 }
  0xc4   :  { %1759 = vmatpush.bf16.msrb.mxu2 %v2663_v47  ;;  %v514_v11 = vmax.f32 %v442_v4, 0.0  ;;  %v501_v34 = vmax.f32 %v482_v28, 0.0 }
  0xc5   :  { %1773 = vmatpush.bf16.msrb.mxu3 %v2671_v50  ;;  %1733 = vmatpush.bf16.msrb.mxu0 %v2645_v51  ;;  %v515_v15 = vmax.f32 %v456_v7, 0.0 }
  0xc6   :  { %1747 = vmatpush.bf16.msrb.mxu1 %v2653_v52  ;;  %v530_v22 = vpack.c.bf16 %v514_v11, %v498_v10 }
  0xc7   :  { %v531_v27 = vpack.c.bf16 %v515_v15, %v499_v14 }
  0xc8   :  { %1760 = vmatpush.bf16.msrb.mxu2 %v2662_v53  ;;  %v469_v19 = vpop.f32.mrf.mxu2 }
  0xc9   :  { %1774 = vmatpush.bf16.msrb.mxu3 %v2670_v54  ;;  %1734 = vmatpush.bf16.msrb.mxu0 %v2644_v55  ;;  %v483_v21 = vpop.f32.mrf.mxu3  ;;  %v470_v25 = vadd.f32 %v469_v19, %v80_v13 }
  0xca   :  { %1748 = vmatpush.bf16.msrb.mxu1 %v2652_v56  ;;  %v484_v29 = vadd.f32 %v483_v21, %v81_v18 }
  0xcb   :  { %v516_v32 = vmax.f32 %v470_v25, 0.0 }
  0xcc   :  { %1761 = vmatpush.bf16.msrb.mxu2 %v2661_v26  ;;  %v517_v35 = vmax.f32 %v484_v29, 0.0 }
  0xcd   :  { %1775 = vmatpush.bf16.msrb.mxu3 %v2669_v61  ;;  %1735 = vmatpush.bf16.msrb.mxu0 %v2643_v62  ;;  %v532_v37 = vpack.c.bf16 %v516_v32, %v500_v31 }
  0xce   :  { %1749 = vmatpush.bf16.msrb.mxu1 %v2651_v0  ;;  %v533_v36 = vpack.c.bf16 %v517_v35, %v501_v34 }
  0xd0   :  { %1762 = vmatpush.bf16.msrb.mxu2 %v2660_v3 }
  0xd1   :  { %1776 = vmatpush.bf16.msrb.mxu3 %v2668_v6  ;;  %1736 = vmatpush.bf16.msrb.mxu0 %v2642_v8 }
  0xd2   :  { %1750 = vmatpush.bf16.msrb.mxu1 %v2650_v9 }
  0xd4   :  { %1763 = vmatpush.bf16.msrb.mxu2 %v2659_v12 }
  0xd5   :  { %1777 = vmatpush.bf16.msrb.mxu3 %v2667_v16  ;;  %1737 = vmatpush.bf16.msrb.mxu0 %v2641_v17 }
  0xd6   :  { %1751 = vmatpush.bf16.msrb.mxu1 %v2649_v20 }
  0xd8   :  { %1764 = vmatpush.bf16.msrb.mxu2 %v2658_v23  ;;  %1738 = vmatmul.bf16.vlgmr.msrb.gmra.mxu0 %v530_v22 }
  0xd9   :  { %1778 = vmatpush.bf16.msrb.mxu3 %v2666_v43  ;;  %1752 = vmatmul.bf16.vlgmr.msrb.gmra.mxu1 %v531_v27 }
  0xdc   :  { %1765 = vmatpush.bf16.msrb.mxu2 %v2657_v30 }
  0xdd   :  { %1779 = vmatpush.bf16.msrb.mxu3 %v2665_v33  ;;  %v2683_v33 = vld [vmem:[%s3396_s0] sm:$0xff] }
  0xdf   :  { %1766 = vmatmul.bf16.vlgmr.msrb.gmra.mxu2 %v532_v37 }
  0xe0   :  { %1780 = vmatmul.bf16.vlgmr.msrb.gmra.mxu3 %v533_v36 }
 0x115   :  { %v1571_v38 = vpop.f32.mrf.mxu0 }
 0x116   :  { %v1585_v39 = vpop.f32.mrf.mxu1  ;;  %v1572_v49 = vadd.f32 %v2674_v45, %v1571_v38 }
 0x118   :  { %v1586_v51 = vadd.f32 %v1585_v39, %v1572_v49 }
 0x11d   :  { %v1573_v40 = vpop.f32.mrf.mxu0 }
 0x11e   :  { %v1587_v44 = vpop.f32.mrf.mxu1  ;;  %v1574_v55 = vadd.f32 %v2674_v45, %v1573_v40 }
 0x120   :  { %v1588_v58 = vadd.f32 %v1587_v44, %v1574_v55 }
 0x122   :  { %v1599_v41 = vpop.f32.mrf.mxu2 }
 0x123   :  { %v1613_v42 = vpop.f32.mrf.mxu3  ;;  %v1600_v52 = vadd.f32 %v1599_v41, %v1586_v51 }
 0x125   :  { %v1627_v46 = vpop.f32.mrf.mxu0  ;;  %v1614_v57 = vadd.f32 %v1613_v42, %v1600_v52  ;;  %v2684_v42 = vld [vmem:[%s3396_s0 + $0x8] sm:$0xff] }
 0x127   :  { %v1628_v59 = vadd.f32 %v1627_v46, %v1614_v57  ;;  %v2685_v46 = vmov 32.0  }
 0x128   :  { %v1641_v50 = vpop.f32.mrf.mxu1  ;;  %2677 = vrcp.f32 %v2685_v46 }
 0x129   :  { %v1642_v63 = vadd.f32 %v1641_v50, %v1628_v59 }
 0x12a   :  { %v1601_v47 = vpop.f32.mrf.mxu2 }
 0x12b   :  { %v1615_v48 = vpop.f32.mrf.mxu3  ;;  %v1602_v60 = vadd.f32 %v1601_v47, %v1588_v58 }
 0x12d   :  { %v1629_v53 = vpop.f32.mrf.mxu0  ;;  %v1616_v0 = vadd.f32 %v1615_v48, %v1602_v60 }
 0x12e   :  { %v2678_v47 = vpop.eup %2677 }
 0x12f   :  { %v1630_v3 = vadd.f32 %v1629_v53, %v1616_v0  ;;  %v1797_v48 = vmul.f32 32.0, %v2678_v47  ;;  %vm1801_vm1 = vweird.f32 %v2678_v47 }
 0x130   :  { %v1643_v26 = vpop.f32.mrf.mxu1 }
 0x131   :  { %v1644_v6 = vadd.f32 %v1643_v26, %v1630_v3  ;;  %v1798_v49 = vsub.f32 1.0, %v1797_v48 }
 0x132   :  { %v1655_v54 = vpop.f32.mrf.mxu2 }
 0x133   :  { %v1669_v56 = vpop.f32.mrf.mxu3  ;;  %v1656_v2 = vadd.f32 %v1655_v54, %v1642_v63  ;;  %v1799_v50 = vmul.f32 %v2678_v47, %v1798_v49 }
 0x135   :  { %v1683_v61 = vpop.f32.mrf.mxu0  ;;  %v1670_v5 = vadd.f32 %v1669_v56, %v1656_v2  ;;  %v1800_v51 = vadd.f32 %v2678_v47, %v1799_v50 }
 0x137   :  { %v1684_v9 = vadd.f32 %v1683_v61, %v1670_v5  ;;  %v1802_v52 = vsel %vm1801_vm1, %v2678_v47, %v1800_v51 }
 0x138   :  { %v1697_v4 = vpop.f32.mrf.mxu1 }
 0x139   :  { %v1698_v12 = vadd.f32 %v1697_v4, %v1684_v9 }
 0x13a   :  { %v1657_v62 = vpop.f32.mrf.mxu2 }
 0x13b   :  { %v1671_v1 = vpop.f32.mrf.mxu3  ;;  %v1658_v10 = vadd.f32 %v1657_v62, %v1644_v6 }
 0x13d   :  { %v1685_v7 = vpop.f32.mrf.mxu0  ;;  %v1672_v13 = vadd.f32 %v1671_v1, %v1658_v10 }
 0x13f   :  { %v1686_v17 = vadd.f32 %v1685_v7, %v1672_v13 }
 0x140   :  { %v1699_v14 = vpop.f32.mrf.mxu1 }
 0x141   :  { %v1700_v21 = vadd.f32 %v1699_v14, %v1686_v17 }
 0x142   :  { %v1711_v8 = vpop.f32.mrf.mxu2 }
 0x143   :  { %v1725_v11 = vpop.f32.mrf.mxu3  ;;  %v1712_v15 = vadd.f32 %v1711_v8, %v1698_v12  ;;  %v2675_v12 = vld [vmem:[%s3400_s5] ss:$0 sm:$0xff] }
 0x145   :  { %v1726_v19 = vadd.f32 %v1725_v11, %v1712_v15  ;;  %v2676_v15 = vld [vmem:[%s3401_s6] ss:$0 sm:$0xff] }
 0x14a   :  { %v1713_v18 = vpop.f32.mrf.mxu2 }
 0x14b   :  { %v1727_v20 = vpop.f32.mrf.mxu3  ;;  %v1714_v24 = vadd.f32 %v1713_v18, %v1700_v21 }
 0x14d   :  { %v1728_v28 = vadd.f32 %v1727_v20, %v1714_v24 }
 0x155   :  { %v1739_v16 = vpop.f32.mrf.mxu0 }
 0x156   :  { %v1740_v22 = vadd.f32 %v1739_v16, %v1726_v19  ;;  %v1753_v23 = vpop.f32.mrf.mxu1 }
 0x158   :  { %v1754_v25 = vadd.f32 %v1753_v23, %v1740_v22 }
 0x15d   :  { %v1741_v27 = vpop.f32.mrf.mxu0 }
 0x15e   :  { %v1742_v31 = vadd.f32 %v1741_v27, %v1728_v28  ;;  %v1755_v35 = vpop.f32.mrf.mxu1 }
 0x160   :  { %v1756_v37 = vadd.f32 %v1755_v35, %v1742_v31 }
 0x162   :  { %v1767_v43 = vpop.f32.mrf.mxu2 }
 0x163   :  { %v1768_v29 = vadd.f32 %v1767_v43, %v1754_v25  ;;  %v1781_v30 = vpop.f32.mrf.mxu3 }
 0x165   :  { %v1782_v32 = vadd.f32 %v1781_v30, %v1768_v29 }
 0x167   :  { %v1786_v34 = vadd.f32 %v2683_v33, %v1782_v32 }
 0x169   :  { %v1790_v36 = vsel %vm258_vm0, %v1786_v34, 0.0 }
 0x16a   :  { %v1769_v38 = vpop.f32.mrf.mxu2  ;;  %1791 = vadd.xlane.f32.xlu0 %v1790_v36 }
 0x16b   :  { %v1770_v39 = vadd.f32 %v1769_v38, %v1756_v37  ;;  %v1783_v40 = vpop.f32.mrf.mxu3 }
 0x16d   :  { %v1784_v41 = vadd.f32 %v1783_v40, %v1770_v39 }
 0x16f   :  { %v1787_v44 = vadd.f32 %v2684_v42, %v1784_v41 }
 0x171   :  { %v1793_v45 = vsel %vm258_vm0, %v1787_v44, 0.0 }
 0x172   :  { %1794 = vadd.xlane.f32.xlu0 %v1793_v45 }
 0x1dd   :  { %v1792_v53 = vpop.xlane.xlu0 %1791 }
 0x1de   :  { %v1803_v54 = vmul.f32 %v1802_v52, %v1792_v53 }
 0x1e0   :  { %v1805_v55 = vsub.f32 %v1786_v34, %v1803_v54 }
 0x1e2   :  { %v1807_v56 = vmul.f32 %v1805_v55, %v1805_v55 }
 0x1e4   :  { %v1809_v57 = vsel %vm258_vm0, %v1807_v56, 0.0 }
 0x1e5   :  { %1810 = vadd.xlane.f32.xlu1 %v1809_v57  ;;  %v1795_v58 = vpop.xlane.xlu0 %1794 }
 0x1e6   :  { %v1804_v26 = vmul.f32 %v1802_v52, %v1795_v58 }
 0x1e8   :  { %v1806_v59 = vsub.f32 %v1787_v44, %v1804_v26 }
 0x1ea   :  { %v1808_v60 = vmul.f32 %v1806_v59, %v1806_v59 }
 0x1ec   :  { %v1812_v61 = vsel %vm258_vm0, %v1808_v60, 0.0 }
 0x1ed   :  { %1813 = vadd.xlane.f32.xlu1 %v1812_v61 }
 0x258   :  { %v1811_v62 = vpop.xlane.xlu1 %1810 }
 0x259   :  { %v1815_v63 = vmul.f32 %v1811_v62, %v1802_v52 }
 0x25b   :  { %v1817_v0 = vadd.f32 1e-05, %v1815_v63 }
 0x25d   :  { %2679 = vrsqrt.f32 %v1817_v0  ;;  %vm1825_vm3 = vweird.f32 %v1817_v0 }
 0x260   :  { %v1814_v1 = vpop.xlane.xlu1 %1813 }
 0x261   :  { %v1816_v2 = vmul.f32 %v1814_v1, %v1802_v52 }
 0x263   :  { %v2680_v3 = vpop.eup %2679  ;;  %v1818_v4 = vadd.f32 1e-05, %v1816_v2 }
 0x264   :  { %v1820_v5 = vmul.f32 %v2680_v3, %v1817_v0  ;;  %vm1826_vm2 = vweird.f32 %v2680_v3 }
 0x265   :  { %2681 = vrsqrt.f32 %v1818_v4  ;;  %vm1827_vm4 = vmor %vm1825_vm3, %vm1826_vm2  ;;  %vm1835_vm6 = vweird.f32 %v1818_v4 }
 0x266   :  { %v1821_v6 = vmul.f32 %v2680_v3, %v1820_v5 }
 0x268   :  { %v1822_v7 = vmul.f32 0.5, %v1821_v6 }
 0x26a   :  { %v1823_v8 = vsub.f32 1.5, %v1822_v7 }
 0x26b   :  { %v2682_v9 = vpop.eup %2681 }
 0x26c   :  { %v1824_v10 = vmul.f32 %v2680_v3, %v1823_v8  ;;  %v1830_v11 = vmul.f32 %v2682_v9, %v1818_v4  ;;  %vm1836_vm5 = vweird.f32 %v2682_v9 }
 0x26d   :  { %vm1837_vm7 = vmor %vm1835_vm6, %vm1836_vm5 }
 0x26e   :  { %v1828_v13 = vsel %vm1827_vm4, %v2680_v3, %v1824_v10  ;;  %v1831_v14 = vmul.f32 %v2682_v9, %v1830_v11 }
 0x26f   :  { %v1839_v16 = vmul.f32 %v1828_v13, %v1805_v55 }
 0x270   :  { %v1832_v17 = vmul.f32 0.5, %v1831_v14 }
 0x271   :  { %v1844_v18 = vmul.f32 %v2675_v12, %v1839_v16 }
 0x272   :  { %v1833_v19 = vsub.f32 1.5, %v1832_v17 }
 0x273   :  { %v1849_v20 = vadd.f32 %v2676_v15, %v1844_v18 }
 0x274   :  { %v1834_v21 = vmul.f32 %v2682_v9, %v1833_v19 }
 0x275   :  { %1851 = vst.msk [vmem:[%s3402_s7] sm:$0xff] %vm258_vm0, %v1849_v20 }
 0x276   :  { %v1838_v22 = vsel %vm1837_vm7, %v2682_v9, %v1834_v21 }
 0x277   :  { %v1840_v23 = vmul.f32 %v1838_v22, %v1806_v59 }
 0x279   :  { %v1845_v24 = vmul.f32 %v2675_v12, %v1840_v23 }
 0x27b   :  { %v1850_v25 = vadd.f32 %v2676_v15, %v1845_v24 }
 0x27d   :  { %1852 = vst.msk [vmem:[%s3402_s7 + $0x8] sm:$0xff] %vm258_vm0, %v1850_v25 }

</bundles_post_ra>
